<compile_context>
chip_gen: v7x
topology: tpu7x:2x2x1
jax: 0.10.0
libtpu: 0.0.40
codegen_flags: <defaults>
</compile_context>

<pallas_src>
import numpy as np
import jax
import jax.numpy as jnp
from jax.experimental import pallas as pl
from jax.experimental.pallas import tpu as pltpu

GN_EPS = 1e-5          # nn.GroupNorm default eps
LRELU_SLOPE = 0.2      # nn.LeakyReLU(0.2)

# synthetic config (fixed for this script)
NC, NDF, START_SZ, END_SZ, Z_DIM = 4, 32, 32, 8, 16
HW1 = START_SZ // 2        # 16  (after DownBlock 1)
HW2 = START_SZ // 4        # 8   (after DownBlock 2)
HW3 = HW2 - 4 + 1          # 5   (after final 4x4 valid conv)
P3_PAD = 32                # 5*5 = 25 output positions, padded to 32 rows
FPAD = 256                 # flattened feature dim 200, padded lane-dense to 256


# ------------------------------------------------------------------ kernel

def _encoder_kernel(p1_ref, w1_ref, aff_ref, pair_ref,
                    s2_ref, w2_ref, s3_ref, w3_ref,
                    gc_ref, hp_ref, wh_ref, bh_ref, out_ref):
    """Fused encoder forward for one batch element.

    p1_ref : (1, P1, F1)   bf16  im2col patches of the input image
    w1_ref : (F1, C)       bf16  layer-1 conv weight (matrix form)
    aff_ref: (2, 3, C)     f32   [layer][bias, gamma, beta]
    pair_ref:(C, C)        f32   1 where channels share a GroupNorm group
    s2_ref : (16*P2, P1)   bf16  merged one-hot gather matrix (layer 2)
    w2_ref : (16, C, C)    bf16  per-tap layer-2 conv weights
    s3_ref : (16*P3, P2)   bf16  merged one-hot gather (final conv, pad rows 0)
    w3_ref : (16, C, 8)    bf16  per-tap final conv weights
    gc_ref : (8, FPAD)     f32   one-hot: column j -> channel j//25
    hp_ref : (P3, FPAD)    f32   one-hot: column j -> position j%25
    wh_ref : (FPAD, 2Z)    bf16  merged [fc1 | fc2] weight (torch-flatten order)
    bh_ref : (1, 2Z)       f32   merged [fc1_b | fc2_b]
    out_ref: (1, 1, 2Z)    f32   [mu | logvar]
    """
    pair = pair_ref[...]

    def gn_lrelu(y, n_elems, aff):
        # conv bias + GroupNorm(groups of 2 channels) + LeakyReLU(0.2), f32.
        bias = aff[0:1, :]
        gamma = aff[1:2, :]
        beta = aff[2:3, :]
        y = y + bias
        s = jnp.sum(y, axis=0, keepdims=True)            # (1, C)
        q = jnp.sum(y * y, axis=0, keepdims=True)        # (1, C)
        g = jnp.dot(jnp.concatenate([s, q], axis=0), pair,
                    preferred_element_type=jnp.float32)  # (2, C) group sums
        n = jnp.float32(n_elems)
        mean = g[0:1, :] / n
        var = jnp.maximum(g[1:2, :] / n - mean * mean, 0.0)   # clamp (bf16 inputs)
        inv = jax.lax.rsqrt(var + GN_EPS)
        scale = gamma * inv
        shift = beta - mean * scale
        yn = y * scale + shift
        return jnp.where(yn >= 0, yn, LRELU_SLOPE * yn)

    # ---- Layer 1: conv(4,2,1) as one (P1,F1)@(F1,C) matmul + GN + LReLU
    y1 = jnp.dot(p1_ref[0], w1_ref[...], preferred_element_type=jnp.float32)
    P1 = y1.shape[0]
    h1b = gn_lrelu(y1, P1 * 2, aff_ref[0]).astype(jnp.bfloat16)       # (P1, C)

    # ---- Layer 2: conv(4,2,1).  One merged gather matmul, then 16 small
    #      per-tap conv matmuls on static 64-row (sublane-aligned) slices.
    nt2 = w2_ref.shape[0]
    C2 = w2_ref.shape[2]
    P2 = s2_ref.shape[0] // nt2
    g2 = jnp.dot(s2_ref[...], h1b,
                 preferred_element_type=jnp.float32).astype(jnp.bfloat16)  # (16*P2, C)
    acc2 = jnp.zeros((P2, C2), jnp.float32)
    for t in range(nt2):
        acc2 = acc2 + jnp.dot(g2[t * P2:(t + 1) * P2], w2_ref[t],
                              preferred_element_type=jnp.float32)
    h2b = gn_lrelu(acc2, P2 * 2, aff_ref[1]).astype(jnp.bfloat16)     # (P2, C)

    # ---- Layer 3: final conv(4,1,0), bias-free, no norm/activation
    nt3 = w3_ref.shape[0]
    C3 = w3_ref.shape[2]
    P3 = s3_ref.shape[0] // nt3
    g3 = jnp.dot(s3_ref[...], h2b,
                 preferred_element_type=jnp.float32).astype(jnp.bfloat16)  # (16*P3, C)
    acc3 = jnp.zeros((P3, C3), jnp.float32)
    for t in range(nt3):
        acc3 = acc3 + jnp.dot(g3[t * P3:(t + 1) * P3], w3_ref[t],
                              preferred_element_type=jnp.float32)     # (P3, 8)

    # ---- torch.flatten (channel-major) without a lane-merging reshape:
    #      one-hot channel-selection matmul + position mask + row-sum.
    sel = jnp.dot(acc3, gc_ref[...],
                  preferred_element_type=jnp.float32)                 # (P3, FPAD)
    flat = jnp.sum(sel * hp_ref[...], axis=0, keepdims=True)          # (1, FPAD)

    # ---- fused fc head: [mu | logvar] = flat @ [W1|W2] + [b1|b2]
    head = jnp.dot(flat.astype(jnp.bfloat16), wh_ref[...],
                   preferred_element_type=jnp.float32) + bh_ref[...]  # (1, 2Z)
    out_ref[0] = head


# --------------------------------------------------------------- pl wrapper

def _const_spec(arr):
    n = arr.ndim
    return pl.BlockSpec(arr.shape, lambda b, _n=n: (0,) * _n)


def encoder_fused_pallas(patches1, w1mat, aff, pair, s2cat, w2tap,
                         s3cat, w3tap, gc, hp, whead, bhead):
    B, P1, F1 = patches1.shape
    Z2 = whead.shape[1]
    out = pl.pallas_call(
        _encoder_kernel,
        out_shape=jax.ShapeDtypeStruct((B, 1, Z2), jnp.float32),
        grid_spec=pltpu.PrefetchScalarGridSpec(
            num_scalar_prefetch=0,
            grid=(B,),
            in_specs=[
                pl.BlockSpec((1, P1, F1), lambda b: (b, 0, 0)),
                _const_spec(w1mat), _const_spec(aff), _const_spec(pair),
                _const_spec(s2cat), _const_spec(w2tap),
                _const_spec(s3cat), _const_spec(w3tap),
                _const_spec(gc), _const_spec(hp),
                _const_spec(whead), _const_spec(bhead),
            ],
            out_specs=pl.BlockSpec((1, 1, Z2), lambda b: (b, 0, 0)),
        ),
        compiler_params=pltpu.CompilerParams(
            dimension_semantics=("parallel",)),   # v7x: 2 TCs split the batch
    )(patches1, w1mat, aff, pair, s2cat, w2tap, s3cat, w3tap,
      gc, hp, whead, bhead)
    return out.reshape(B, Z2)


# -------------------------------------------------------------------- glue

def im2col(x_nchw, k, stride, pad):
    """NCHW -> (B, OH*OW, Cin*k*k) patches, feature order (cin, ky, kx)."""
    x = jnp.pad(x_nchw, ((0, 0), (0, 0), (pad, pad), (pad, pad)))
    B, C, H, W = x.shape
    OH = (H - k) // stride + 1
    OW = (W - k) // stride + 1
    cols = []
    for ky in range(k):
        for kx in range(k):
            cols.append(x[:, :, ky:ky + stride * OH:stride,
                             kx:kx + stride * OW:stride])
    p = jnp.stack(cols, axis=0)          # (k*k, B, C, OH, OW)
    p = p.transpose(1, 3, 4, 2, 0)       # (B, OH, OW, C, k*k)
    p = p.reshape(B, OH * OW, C * k * k)
    return p, OH, OW


def build_pair_matrix(c):
    """(C, C) indicator: 1 where channels i, j share a GroupNorm group of 2."""
    idx = np.arange(c)
    return (idx[:, None] // 2 == idx[None, :] // 2).astype(np.float32)


def build_conv_gather(in_hw, k, stride, pad):
    """One-hot gather matrices (k*k, OH*OW, in_hw*in_hw) for a square conv.

    S[t, o, r] = 1 iff conv tap t of output position o reads input row r;
    rows that fall in the zero-padding region stay all-zero.
    """
    oh = (in_hw + 2 * pad - k) // stride + 1
    S = np.zeros((k * k, oh * oh, in_hw * in_hw), np.float32)
    for ky in range(k):
        for kx in range(k):
            t = ky * k + kx
            for oy in range(oh):
                ih = stride * oy + ky - pad
                if ih < 0 or ih >= in_hw:
                    continue
                for ox in range(oh):
                    iw = stride * ox + kx - pad
                    if iw < 0 or iw >= in_hw:
                        continue
                    S[t, oy * oh + ox, ih * in_hw + iw] = 1.0
    return S


def spectral_normalize(w, key, n_iter=1, eps=1e-12):
    """torch.nn.utils.spectral_norm semantics (1 power iteration)."""
    wm = w.reshape(w.shape[0], -1)
    u = jax.random.normal(key, (wm.shape[0],), dtype=jnp.float32)
    u = u / (jnp.linalg.norm(u) + eps)
    v = None
    for _ in range(n_iter):
        v = wm.T @ u
        v = v / (jnp.linalg.norm(v) + eps)
        u = wm @ v
        u = u / (jnp.linalg.norm(u) + eps)
    sigma = u @ (wm @ v)
    return w / sigma


def init_params(key, nc=4, ndf=32, start_sz=32, end_sz=8, z_dim=16):
    channel_sizes = (4, 8, 16, 32, 64, 128, 256, 512, 1024)
    nfc = {k: ndf for k in channel_sizes}
    nfc[start_sz] = nc                      # nc is not None, head is None

    keys = iter(jax.random.split(key, 64))
    params = {"down": []}
    sz = start_sz
    while sz > end_sz:
        cin, cout = nfc[sz], nfc[sz // 2]
        w = 0.1 * jax.random.normal(next(keys), (cout, cin, 4, 4), jnp.float32)
        w = spectral_normalize(w, next(keys))
        b = 0.1 * jax.random.normal(next(keys), (cout,), jnp.float32)
        gamma = 1.0 + 0.1 * jax.random.normal(next(keys), (cout,), jnp.float32)
        beta = 0.1 * jax.random.normal(next(keys), (cout,), jnp.float32)
        params["down"].append((w, b, gamma, beta))
        sz //= 2

    wf = 0.1 * jax.random.normal(next(keys), (8, nfc[end_sz], 4, 4), jnp.float32)
    params["final_w"] = spectral_normalize(wf, next(keys))

    params["fc1_w"] = 0.05 * jax.random.normal(next(keys), (z_dim, 200), jnp.float32)
    params["fc1_b"] = 0.05 * jax.random.normal(next(keys), (z_dim,), jnp.float32)
    params["fc2_w"] = 0.05 * jax.random.normal(next(keys), (z_dim, 200), jnp.float32)
    params["fc2_b"] = 0.05 * jax.random.normal(next(keys), (z_dim,), jnp.float32)
    return params


def prepare_for_pallas(params):
    """One-time parameter / layout preprocessing for the fused kernel."""
    (w1, b1, g1, be1), (w2, b2, g2, be2) = params["down"]
    wf = params["final_w"]
    C = w1.shape[0]            # 32
    Cf = wf.shape[0]           # 8

    prep = {}
    # layer-1 weight in im2col matrix form (feature order (cin, ky, kx))
    prep["w1mat"] = w1.reshape(C, -1).T.astype(jnp.bfloat16)             # (64, C)
    # packed [bias, gamma, beta] per DownBlock
    prep["aff"] = jnp.stack([jnp.stack([b1, g1, be1]),
                             jnp.stack([b2, g2, be2])]).astype(jnp.float32)  # (2,3,C)
    # GroupNorm same-group indicator (constant)
    prep["pair"] = jnp.asarray(build_pair_matrix(C))                     # (C, C)

    # merged one-hot gather matrices + per-tap weights, layers 2 and 3
    s2 = build_conv_gather(HW1, 4, 2, 1)                                 # (16, 64, 256)
    prep["s2cat"] = jnp.asarray(
        s2.reshape(-1, s2.shape[2])).astype(jnp.bfloat16)                # (1024, 256)
    prep["w2tap"] = jnp.transpose(w2, (2, 3, 1, 0)).reshape(16, C, C).astype(jnp.bfloat16)
    s3 = build_conv_gather(HW2, 4, 1, 0)                                 # (16, 25, 64)
    s3 = np.pad(s3, ((0, 0), (0, P3_PAD - s3.shape[1]), (0, 0)))         # (16, 32, 64)
    prep["s3cat"] = jnp.asarray(
        s3.reshape(-1, s3.shape[2])).astype(jnp.bfloat16)                # (512, 64)
    prep["w3tap"] = jnp.transpose(wf, (2, 3, 1, 0)).reshape(16, C, Cf).astype(jnp.bfloat16)

    # in-kernel torch.flatten constants: column j (< 200) corresponds to
    # channel co = j // 25, position o = j % 25 (channel-major, as in torch).
    n_pos = HW3 * HW3            # 25
    n_feat = Cf * n_pos          # 200
    gc = np.zeros((Cf, FPAD), np.float32)
    hp = np.zeros((P3_PAD, FPAD), np.float32)
    for j in range(n_feat):
        co, o = divmod(j, n_pos)
        gc[co, j] = 1.0
        hp[o, j] = 1.0
    prep["gc"] = jnp.asarray(gc)                                         # (8, 256)
    prep["hp"] = jnp.asarray(hp)                                         # (32, 256)

    # merged fc head in torch-flatten order, zero-padded to FPAD rows, bf16.
    wcat = jnp.concatenate([params["fc1_w"].T, params["fc2_w"].T], axis=1)  # (200, 2Z)
    wh = jnp.zeros((FPAD, wcat.shape[1]), jnp.float32).at[:n_feat].set(wcat)
    prep["whead"] = wh.astype(jnp.bfloat16)                              # (256, 2Z)
    prep["bhead"] = jnp.concatenate([params["fc1_b"],
                                     params["fc2_b"]]).reshape(1, -1).astype(jnp.float32)
    return prep


def encoder_pg_forward(x_nchw, prep):
    """forward(x) -> (mu, logvar), matching encoder_pg semantics."""
    # only the input image is im2col'ed at the JAX level; everything
    # downstream stays in VMEM inside one fused kernel.
    patches1, _, _ = im2col(x_nchw.astype(jnp.float32), k=4, stride=2, pad=1)
    out = encoder_fused_pallas(
        patches1.astype(jnp.bfloat16),
        prep["w1mat"], prep["aff"], prep["pair"],
        prep["s2cat"], prep["w2tap"], prep["s3cat"], prep["w3tap"],
        prep["gc"], prep["hp"], prep["whead"], prep["bhead"])     # (B, 2Z)
    Z = out.shape[1] // 2
    return out[:, :Z], out[:, Z:]


# ------------------------------------------------------ pure-JAX reference

def reference_forward(x, params):
    h = x.astype(jnp.float32)
    for (w, bias, gamma, beta) in params["down"]:
        y = jax.lax.conv_general_dilated(
            h, w, (2, 2), ((1, 1), (1, 1)),
            dimension_numbers=("NCHW", "OIHW", "NCHW"))
        y = y + bias[None, :, None, None]
        B, C, H, W = y.shape
        g = C // 2
        yr = y.reshape(B, g, 2, H, W)
        mean = yr.mean(axis=(2, 3, 4), keepdims=True)
        var = yr.var(axis=(2, 3, 4), keepdims=True)
        yn = ((yr - mean) / jnp.sqrt(var + GN_EPS)).reshape(B, C, H, W)
        yn = yn * gamma[None, :, None, None] + beta[None, :, None, None]
        h = jnp.where(yn >= 0, yn, LRELU_SLOPE * yn)
    y = jax.lax.conv_general_dilated(
        h, params["final_w"], (1, 1), ((0, 0), (0, 0)),
        dimension_numbers=("NCHW", "OIHW", "NCHW"))
    flat = y.reshape(y.shape[0], -1)
    mu = flat @ params["fc1_w"].T + params["fc1_b"]
    lv = flat @ params["fc2_w"].T + params["fc2_b"]
    return mu, lv


# -------------------------------------------------------------------- main

if __name__ == "__main__":
    key = jax.random.PRNGKey(0)
    k_param, k_x = jax.random.split(key)

    B = 2
    params = init_params(k_param, nc=NC, ndf=NDF, start_sz=START_SZ,
                         end_sz=END_SZ, z_dim=Z_DIM)
    prep = prepare_for_pallas(params)
    x = jax.random.normal(k_x, (B, NC, START_SZ, START_SZ), jnp.float32)

    fwd = jax.jit(encoder_pg_forward)
    mu, logvar = jax.block_until_ready(fwd(x, prep))

    mu_ref, lv_ref = reference_forward(x, params)
    # bf16 MXU inputs (f32 accumulation) vs. f32 reference -> 2e-2 tolerance.
    np.testing.assert_allclose(np.asarray(mu), np.asarray(mu_ref),
                               rtol=2e-2, atol=2e-2)
    np.testing.assert_allclose(np.asarray(logvar), np.asarray(lv_ref),
                               rtol=2e-2, atol=2e-2)
    assert mu.shape == (B, Z_DIM) and logvar.shape == (B, Z_DIM)
    assert np.all(np.isfinite(np.asarray(mu))) and np.all(np.isfinite(np.asarray(logvar)))

    print("KERNEL_OK")
</pallas_src>

<mosaic_0001>
module attributes {stable_mosaic.version = 11 : i64} {
  func.func @_encoder_kernel(%arg0: i32, %arg1: memref<1x256x64xbf16, #tpu.memory_space<vmem>>, %arg2: memref<64x32xbf16, #tpu.memory_space<vmem>>, %arg3: memref<2x3x32xf32, #tpu.memory_space<vmem>>, %arg4: memref<32x32xf32, #tpu.memory_space<vmem>>, %arg5: memref<1024x256xbf16, #tpu.memory_space<vmem>>, %arg6: memref<16x32x32xbf16, #tpu.memory_space<vmem>>, %arg7: memref<512x64xbf16, #tpu.memory_space<vmem>>, %arg8: memref<16x32x8xbf16, #tpu.memory_space<vmem>>, %arg9: memref<8x256xf32, #tpu.memory_space<vmem>>, %arg10: memref<32x256xf32, #tpu.memory_space<vmem>>, %arg11: memref<256x32xbf16, #tpu.memory_space<vmem>>, %arg12: memref<1x32xf32, #tpu.memory_space<vmem>>, %arg13: memref<1x1x32xf32, #tpu.memory_space<vmem>>) attributes {dimension_semantics = [#tpu.dimension_semantics<parallel>], iteration_bounds = array<i64: 2>, scalar_prefetch = 0 : i64, scratch_operands = 0 : i64, tpu.core_type = #tpu.core_type<tc>, window_params = [{transform_indices = @transform_0, window_bounds = array<i64: 1, 256, 64>}, {pipeline_mode = #tpu.pipeline_mode<synchronous>, transform_indices = @transform_1, window_bounds = array<i64: 64, 32>}, {pipeline_mode = #tpu.pipeline_mode<synchronous>, transform_indices = @transform_2, window_bounds = array<i64: 2, 3, 32>}, {pipeline_mode = #tpu.pipeline_mode<synchronous>, transform_indices = @transform_3, window_bounds = array<i64: 32, 32>}, {pipeline_mode = #tpu.pipeline_mode<synchronous>, transform_indices = @transform_4, window_bounds = array<i64: 1024, 256>}, {pipeline_mode = #tpu.pipeline_mode<synchronous>, transform_indices = @transform_5, window_bounds = array<i64: 16, 32, 32>}, {pipeline_mode = #tpu.pipeline_mode<synchronous>, transform_indices = @transform_6, window_bounds = array<i64: 512, 64>}, {pipeline_mode = #tpu.pipeline_mode<synchronous>, transform_indices = @transform_7, window_bounds = array<i64: 16, 32, 8>}, {pipeline_mode = #tpu.pipeline_mode<synchronous>, transform_indices = @transform_8, window_bounds = array<i64: 8, 256>}, {pipeline_mode = #tpu.pipeline_mode<synchronous>, transform_indices = @transform_9, window_bounds = array<i64: 32, 256>}, {pipeline_mode = #tpu.pipeline_mode<synchronous>, transform_indices = @transform_10, window_bounds = array<i64: 256, 32>}, {pipeline_mode = #tpu.pipeline_mode<synchronous>, transform_indices = @transform_11, window_bounds = array<i64: 1, 32>}, {transform_indices = @transform_12, window_bounds = array<i64: 1, 1, 32>}]} {
    %c0 = arith.constant 0 : index
    %c0_0 = arith.constant 0 : index
    %0 = vector.load %arg4[%c0, %c0_0] : memref<32x32xf32, #tpu.memory_space<vmem>>, vector<32x32xf32>
    %c0_1 = arith.constant 0 : index
    %c0_2 = arith.constant 0 : index
    %c0_3 = arith.constant 0 : index
    %1 = vector.load %arg1[%c0_1, %c0_2, %c0_3] : memref<1x256x64xbf16, #tpu.memory_space<vmem>>, vector<1x256x64xbf16>
    %2 = vector.shape_cast %1 : vector<1x256x64xbf16> to vector<256x64xbf16>
    %c0_4 = arith.constant 0 : index
    %c0_5 = arith.constant 0 : index
    %3 = vector.load %arg2[%c0_4, %c0_5] : memref<64x32xbf16, #tpu.memory_space<vmem>>, vector<64x32xbf16>
    %cst = arith.constant dense<0.000000e+00> : vector<256x32xf32>
    %4 = tpu.matmul %2, %3, %cst {dimension_numbers = #tpu.dot_dimension_numbers<[1], [0], [0], [1], [0, 0, 1, 1], [], []>} : vector<256x64xbf16>, vector<64x32xbf16>, vector<256x32xf32> -> vector<256x32xf32>
    %c0_6 = arith.constant 0 : index
    %c0_7 = arith.constant 0 : index
    %c0_8 = arith.constant 0 : index
    %5 = vector.load %arg3[%c0_6, %c0_7, %c0_8] : memref<2x3x32xf32, #tpu.memory_space<vmem>>, vector<1x3x32xf32>
    %6 = vector.shape_cast %5 : vector<1x3x32xf32> to vector<3x32xf32>
    %7 = vector.extract_strided_slice %6 {offsets = [0, 0], sizes = [1, 32], strides = [1, 1]} : vector<3x32xf32> to vector<1x32xf32>
    %8 = vector.extract_strided_slice %6 {offsets = [1, 0], sizes = [1, 32], strides = [1, 1]} : vector<3x32xf32> to vector<1x32xf32>
    %9 = vector.extract_strided_slice %6 {offsets = [2, 0], sizes = [1, 32], strides = [1, 1]} : vector<3x32xf32> to vector<1x32xf32>
    %10 = vector.broadcast %7 : vector<1x32xf32> to vector<256x32xf32>
    %11 = arith.addf %4, %10 : vector<256x32xf32>
    %cst_9 = arith.constant dense<0.000000e+00> : vector<32xf32>
    %12 = vector.multi_reduction <add>, %11, %cst_9 [0] : vector<256x32xf32> to vector<32xf32>
    %13 = vector.shape_cast %12 : vector<32xf32> to vector<1x32xf32>
    %14 = arith.mulf %11, %11 : vector<256x32xf32>
    %cst_10 = arith.constant dense<0.000000e+00> : vector<32xf32>
    %15 = vector.multi_reduction <add>, %14, %cst_10 [0] : vector<256x32xf32> to vector<32xf32>
    %16 = vector.shape_cast %15 : vector<32xf32> to vector<1x32xf32>
    %17 = tpu.concatenate %13, %16 in 0 : vector<1x32xf32>, vector<1x32xf32> -> vector<2x32xf32>
    %cst_11 = arith.constant dense<0.000000e+00> : vector<2x32xf32>
    %18 = tpu.matmul %17, %0, %cst_11 {dimension_numbers = #tpu.dot_dimension_numbers<[1], [0], [0], [1], [0, 0, 1, 1], [], []>} : vector<2x32xf32>, vector<32x32xf32>, vector<2x32xf32> -> vector<2x32xf32>
    %19 = vector.extract_strided_slice %18 {offsets = [0, 0], sizes = [1, 32], strides = [1, 1]} : vector<2x32xf32> to vector<1x32xf32>
    %cst_12 = arith.constant 5.120000e+02 : f32
    %20 = vector.broadcast %cst_12 : f32 to vector<1x32xf32>
    %21 = arith.divf %19, %20 : vector<1x32xf32>
    %22 = vector.extract_strided_slice %18 {offsets = [1, 0], sizes = [1, 32], strides = [1, 1]} : vector<2x32xf32> to vector<1x32xf32>
    %cst_13 = arith.constant 5.120000e+02 : f32
    %23 = vector.broadcast %cst_13 : f32 to vector<1x32xf32>
    %24 = arith.divf %22, %23 : vector<1x32xf32>
    %25 = arith.mulf %21, %21 : vector<1x32xf32>
    %26 = arith.subf %24, %25 : vector<1x32xf32>
    %cst_14 = arith.constant 0.000000e+00 : f32
    %27 = vector.broadcast %cst_14 : f32 to vector<1x32xf32>
    %28 = arith.maximumf %26, %27 : vector<1x32xf32>
    %cst_15 = arith.constant 9.99999974E-6 : f32
    %29 = vector.broadcast %cst_15 : f32 to vector<1x32xf32>
    %30 = arith.addf %28, %29 : vector<1x32xf32>
    %31 = math.rsqrt %30 : vector<1x32xf32>
    %32 = arith.mulf %8, %31 : vector<1x32xf32>
    %33 = arith.mulf %21, %32 : vector<1x32xf32>
    %34 = arith.subf %9, %33 : vector<1x32xf32>
    %35 = vector.broadcast %32 : vector<1x32xf32> to vector<256x32xf32>
    %36 = arith.mulf %11, %35 : vector<256x32xf32>
    %37 = vector.broadcast %34 : vector<1x32xf32> to vector<256x32xf32>
    %38 = arith.addf %36, %37 : vector<256x32xf32>
    %cst_16 = arith.constant 0.000000e+00 : f32
    %39 = vector.broadcast %cst_16 : f32 to vector<256x32xf32>
    %40 = arith.cmpf oge, %38, %39 : vector<256x32xf32>
    %cst_17 = arith.constant 2.000000e-01 : f32
    %41 = vector.broadcast %cst_17 : f32 to vector<256x32xf32>
    %42 = arith.mulf %41, %38 : vector<256x32xf32>
    %43 = arith.select %40, %38, %42 : vector<256x32xi1>, vector<256x32xf32>
    %44 = arith.truncf %43 : vector<256x32xf32> to vector<256x32xbf16>
    %c0_18 = arith.constant 0 : index
    %c0_19 = arith.constant 0 : index
    %45 = vector.load %arg5[%c0_18, %c0_19] : memref<1024x256xbf16, #tpu.memory_space<vmem>>, vector<1024x256xbf16>
    %cst_20 = arith.constant dense<0.000000e+00> : vector<1024x32xf32>
    %46 = tpu.matmul %45, %44, %cst_20 {dimension_numbers = #tpu.dot_dimension_numbers<[1], [0], [0], [1], [0, 0, 1, 1], [], []>} : vector<1024x256xbf16>, vector<256x32xbf16>, vector<1024x32xf32> -> vector<1024x32xf32>
    %47 = arith.truncf %46 : vector<1024x32xf32> to vector<1024x32xbf16>
    %cst_21 = arith.constant 0.000000e+00 : f32
    %48 = vector.broadcast %cst_21 : f32 to vector<64x32xf32>
    %49 = vector.extract_strided_slice %47 {offsets = [0, 0], sizes = [64, 32], strides = [1, 1]} : vector<1024x32xbf16> to vector<64x32xbf16>
    %c0_22 = arith.constant 0 : index
    %c0_23 = arith.constant 0 : index
    %c0_24 = arith.constant 0 : index
    %50 = vector.load %arg6[%c0_22, %c0_23, %c0_24] : memref<16x32x32xbf16, #tpu.memory_space<vmem>>, vector<1x32x32xbf16>
    %51 = vector.shape_cast %50 : vector<1x32x32xbf16> to vector<32x32xbf16>
    %cst_25 = arith.constant dense<0.000000e+00> : vector<64x32xf32>
    %52 = tpu.matmul %49, %51, %cst_25 {dimension_numbers = #tpu.dot_dimension_numbers<[1], [0], [0], [1], [0, 0, 1, 1], [], []>} : vector<64x32xbf16>, vector<32x32xbf16>, vector<64x32xf32> -> vector<64x32xf32>
    %53 = arith.addf %48, %52 : vector<64x32xf32>
    %54 = vector.extract_strided_slice %47 {offsets = [64, 0], sizes = [64, 32], strides = [1, 1]} : vector<1024x32xbf16> to vector<64x32xbf16>
    %c1 = arith.constant 1 : index
    %c0_26 = arith.constant 0 : index
    %c0_27 = arith.constant 0 : index
    %55 = vector.load %arg6[%c1, %c0_26, %c0_27] : memref<16x32x32xbf16, #tpu.memory_space<vmem>>, vector<1x32x32xbf16>
    %56 = vector.shape_cast %55 : vector<1x32x32xbf16> to vector<32x32xbf16>
    %cst_28 = arith.constant dense<0.000000e+00> : vector<64x32xf32>
    %57 = tpu.matmul %54, %56, %cst_28 {dimension_numbers = #tpu.dot_dimension_numbers<[1], [0], [0], [1], [0, 0, 1, 1], [], []>} : vector<64x32xbf16>, vector<32x32xbf16>, vector<64x32xf32> -> vector<64x32xf32>
    %58 = arith.addf %53, %57 : vector<64x32xf32>
    %59 = vector.extract_strided_slice %47 {offsets = [128, 0], sizes = [64, 32], strides = [1, 1]} : vector<1024x32xbf16> to vector<64x32xbf16>
    %c2 = arith.constant 2 : index
    %c0_29 = arith.constant 0 : index
    %c0_30 = arith.constant 0 : index
    %60 = vector.load %arg6[%c2, %c0_29, %c0_30] : memref<16x32x32xbf16, #tpu.memory_space<vmem>>, vector<1x32x32xbf16>
    %61 = vector.shape_cast %60 : vector<1x32x32xbf16> to vector<32x32xbf16>
    %cst_31 = arith.constant dense<0.000000e+00> : vector<64x32xf32>
    %62 = tpu.matmul %59, %61, %cst_31 {dimension_numbers = #tpu.dot_dimension_numbers<[1], [0], [0], [1], [0, 0, 1, 1], [], []>} : vector<64x32xbf16>, vector<32x32xbf16>, vector<64x32xf32> -> vector<64x32xf32>
    %63 = arith.addf %58, %62 : vector<64x32xf32>
    %64 = vector.extract_strided_slice %47 {offsets = [192, 0], sizes = [64, 32], strides = [1, 1]} : vector<1024x32xbf16> to vector<64x32xbf16>
    %c3 = arith.constant 3 : index
    %c0_32 = arith.constant 0 : index
    %c0_33 = arith.constant 0 : index
    %65 = vector.load %arg6[%c3, %c0_32, %c0_33] : memref<16x32x32xbf16, #tpu.memory_space<vmem>>, vector<1x32x32xbf16>
    %66 = vector.shape_cast %65 : vector<1x32x32xbf16> to vector<32x32xbf16>
    %cst_34 = arith.constant dense<0.000000e+00> : vector<64x32xf32>
    %67 = tpu.matmul %64, %66, %cst_34 {dimension_numbers = #tpu.dot_dimension_numbers<[1], [0], [0], [1], [0, 0, 1, 1], [], []>} : vector<64x32xbf16>, vector<32x32xbf16>, vector<64x32xf32> -> vector<64x32xf32>
    %68 = arith.addf %63, %67 : vector<64x32xf32>
    %69 = vector.extract_strided_slice %47 {offsets = [256, 0], sizes = [64, 32], strides = [1, 1]} : vector<1024x32xbf16> to vector<64x32xbf16>
    %c4 = arith.constant 4 : index
    %c0_35 = arith.constant 0 : index
    %c0_36 = arith.constant 0 : index
    %70 = vector.load %arg6[%c4, %c0_35, %c0_36] : memref<16x32x32xbf16, #tpu.memory_space<vmem>>, vector<1x32x32xbf16>
    %71 = vector.shape_cast %70 : vector<1x32x32xbf16> to vector<32x32xbf16>
    %cst_37 = arith.constant dense<0.000000e+00> : vector<64x32xf32>
    %72 = tpu.matmul %69, %71, %cst_37 {dimension_numbers = #tpu.dot_dimension_numbers<[1], [0], [0], [1], [0, 0, 1, 1], [], []>} : vector<64x32xbf16>, vector<32x32xbf16>, vector<64x32xf32> -> vector<64x32xf32>
    %73 = arith.addf %68, %72 : vector<64x32xf32>
    %74 = vector.extract_strided_slice %47 {offsets = [320, 0], sizes = [64, 32], strides = [1, 1]} : vector<1024x32xbf16> to vector<64x32xbf16>
    %c5 = arith.constant 5 : index
    %c0_38 = arith.constant 0 : index
    %c0_39 = arith.constant 0 : index
    %75 = vector.load %arg6[%c5, %c0_38, %c0_39] : memref<16x32x32xbf16, #tpu.memory_space<vmem>>, vector<1x32x32xbf16>
    %76 = vector.shape_cast %75 : vector<1x32x32xbf16> to vector<32x32xbf16>
    %cst_40 = arith.constant dense<0.000000e+00> : vector<64x32xf32>
    %77 = tpu.matmul %74, %76, %cst_40 {dimension_numbers = #tpu.dot_dimension_numbers<[1], [0], [0], [1], [0, 0, 1, 1], [], []>} : vector<64x32xbf16>, vector<32x32xbf16>, vector<64x32xf32> -> vector<64x32xf32>
    %78 = arith.addf %73, %77 : vector<64x32xf32>
    %79 = vector.extract_strided_slice %47 {offsets = [384, 0], sizes = [64, 32], strides = [1, 1]} : vector<1024x32xbf16> to vector<64x32xbf16>
    %c6 = arith.constant 6 : index
    %c0_41 = arith.constant 0 : index
    %c0_42 = arith.constant 0 : index
    %80 = vector.load %arg6[%c6, %c0_41, %c0_42] : memref<16x32x32xbf16, #tpu.memory_space<vmem>>, vector<1x32x32xbf16>
    %81 = vector.shape_cast %80 : vector<1x32x32xbf16> to vector<32x32xbf16>
    %cst_43 = arith.constant dense<0.000000e+00> : vector<64x32xf32>
    %82 = tpu.matmul %79, %81, %cst_43 {dimension_numbers = #tpu.dot_dimension_numbers<[1], [0], [0], [1], [0, 0, 1, 1], [], []>} : vector<64x32xbf16>, vector<32x32xbf16>, vector<64x32xf32> -> vector<64x32xf32>
    %83 = arith.addf %78, %82 : vector<64x32xf32>
    %84 = vector.extract_strided_slice %47 {offsets = [448, 0], sizes = [64, 32], strides = [1, 1]} : vector<1024x32xbf16> to vector<64x32xbf16>
    %c7 = arith.constant 7 : index
    %c0_44 = arith.constant 0 : index
    %c0_45 = arith.constant 0 : index
    %85 = vector.load %arg6[%c7, %c0_44, %c0_45] : memref<16x32x32xbf16, #tpu.memory_space<vmem>>, vector<1x32x32xbf16>
    %86 = vector.shape_cast %85 : vector<1x32x32xbf16> to vector<32x32xbf16>
    %cst_46 = arith.constant dense<0.000000e+00> : vector<64x32xf32>
    %87 = tpu.matmul %84, %86, %cst_46 {dimension_numbers = #tpu.dot_dimension_numbers<[1], [0], [0], [1], [0, 0, 1, 1], [], []>} : vector<64x32xbf16>, vector<32x32xbf16>, vector<64x32xf32> -> vector<64x32xf32>
    %88 = arith.addf %83, %87 : vector<64x32xf32>
    %89 = vector.extract_strided_slice %47 {offsets = [512, 0], sizes = [64, 32], strides = [1, 1]} : vector<1024x32xbf16> to vector<64x32xbf16>
    %c8 = arith.constant 8 : index
    %c0_47 = arith.constant 0 : index
    %c0_48 = arith.constant 0 : index
    %90 = vector.load %arg6[%c8, %c0_47, %c0_48] : memref<16x32x32xbf16, #tpu.memory_space<vmem>>, vector<1x32x32xbf16>
    %91 = vector.shape_cast %90 : vector<1x32x32xbf16> to vector<32x32xbf16>
    %cst_49 = arith.constant dense<0.000000e+00> : vector<64x32xf32>
    %92 = tpu.matmul %89, %91, %cst_49 {dimension_numbers = #tpu.dot_dimension_numbers<[1], [0], [0], [1], [0, 0, 1, 1], [], []>} : vector<64x32xbf16>, vector<32x32xbf16>, vector<64x32xf32> -> vector<64x32xf32>
    %93 = arith.addf %88, %92 : vector<64x32xf32>
    %94 = vector.extract_strided_slice %47 {offsets = [576, 0], sizes = [64, 32], strides = [1, 1]} : vector<1024x32xbf16> to vector<64x32xbf16>
    %c9 = arith.constant 9 : index
    %c0_50 = arith.constant 0 : index
    %c0_51 = arith.constant 0 : index
    %95 = vector.load %arg6[%c9, %c0_50, %c0_51] : memref<16x32x32xbf16, #tpu.memory_space<vmem>>, vector<1x32x32xbf16>
    %96 = vector.shape_cast %95 : vector<1x32x32xbf16> to vector<32x32xbf16>
    %cst_52 = arith.constant dense<0.000000e+00> : vector<64x32xf32>
    %97 = tpu.matmul %94, %96, %cst_52 {dimension_numbers = #tpu.dot_dimension_numbers<[1], [0], [0], [1], [0, 0, 1, 1], [], []>} : vector<64x32xbf16>, vector<32x32xbf16>, vector<64x32xf32> -> vector<64x32xf32>
    %98 = arith.addf %93, %97 : vector<64x32xf32>
    %99 = vector.extract_strided_slice %47 {offsets = [640, 0], sizes = [64, 32], strides = [1, 1]} : vector<1024x32xbf16> to vector<64x32xbf16>
    %c10 = arith.constant 10 : index
    %c0_53 = arith.constant 0 : index
    %c0_54 = arith.constant 0 : index
    %100 = vector.load %arg6[%c10, %c0_53, %c0_54] : memref<16x32x32xbf16, #tpu.memory_space<vmem>>, vector<1x32x32xbf16>
    %101 = vector.shape_cast %100 : vector<1x32x32xbf16> to vector<32x32xbf16>
    %cst_55 = arith.constant dense<0.000000e+00> : vector<64x32xf32>
    %102 = tpu.matmul %99, %101, %cst_55 {dimension_numbers = #tpu.dot_dimension_numbers<[1], [0], [0], [1], [0, 0, 1, 1], [], []>} : vector<64x32xbf16>, vector<32x32xbf16>, vector<64x32xf32> -> vector<64x32xf32>
    %103 = arith.addf %98, %102 : vector<64x32xf32>
    %104 = vector.extract_strided_slice %47 {offsets = [704, 0], sizes = [64, 32], strides = [1, 1]} : vector<1024x32xbf16> to vector<64x32xbf16>
    %c11 = arith.constant 11 : index
    %c0_56 = arith.constant 0 : index
    %c0_57 = arith.constant 0 : index
    %105 = vector.load %arg6[%c11, %c0_56, %c0_57] : memref<16x32x32xbf16, #tpu.memory_space<vmem>>, vector<1x32x32xbf16>
    %106 = vector.shape_cast %105 : vector<1x32x32xbf16> to vector<32x32xbf16>
    %cst_58 = arith.constant dense<0.000000e+00> : vector<64x32xf32>
    %107 = tpu.matmul %104, %106, %cst_58 {dimension_numbers = #tpu.dot_dimension_numbers<[1], [0], [0], [1], [0, 0, 1, 1], [], []>} : vector<64x32xbf16>, vector<32x32xbf16>, vector<64x32xf32> -> vector<64x32xf32>
    %108 = arith.addf %103, %107 : vector<64x32xf32>
    %109 = vector.extract_strided_slice %47 {offsets = [768, 0], sizes = [64, 32], strides = [1, 1]} : vector<1024x32xbf16> to vector<64x32xbf16>
    %c12 = arith.constant 12 : index
    %c0_59 = arith.constant 0 : index
    %c0_60 = arith.constant 0 : index
    %110 = vector.load %arg6[%c12, %c0_59, %c0_60] : memref<16x32x32xbf16, #tpu.memory_space<vmem>>, vector<1x32x32xbf16>
    %111 = vector.shape_cast %110 : vector<1x32x32xbf16> to vector<32x32xbf16>
    %cst_61 = arith.constant dense<0.000000e+00> : vector<64x32xf32>
    %112 = tpu.matmul %109, %111, %cst_61 {dimension_numbers = #tpu.dot_dimension_numbers<[1], [0], [0], [1], [0, 0, 1, 1], [], []>} : vector<64x32xbf16>, vector<32x32xbf16>, vector<64x32xf32> -> vector<64x32xf32>
    %113 = arith.addf %108, %112 : vector<64x32xf32>
    %114 = vector.extract_strided_slice %47 {offsets = [832, 0], sizes = [64, 32], strides = [1, 1]} : vector<1024x32xbf16> to vector<64x32xbf16>
    %c13 = arith.constant 13 : index
    %c0_62 = arith.constant 0 : index
    %c0_63 = arith.constant 0 : index
    %115 = vector.load %arg6[%c13, %c0_62, %c0_63] : memref<16x32x32xbf16, #tpu.memory_space<vmem>>, vector<1x32x32xbf16>
    %116 = vector.shape_cast %115 : vector<1x32x32xbf16> to vector<32x32xbf16>
    %cst_64 = arith.constant dense<0.000000e+00> : vector<64x32xf32>
    %117 = tpu.matmul %114, %116, %cst_64 {dimension_numbers = #tpu.dot_dimension_numbers<[1], [0], [0], [1], [0, 0, 1, 1], [], []>} : vector<64x32xbf16>, vector<32x32xbf16>, vector<64x32xf32> -> vector<64x32xf32>
    %118 = arith.addf %113, %117 : vector<64x32xf32>
    %119 = vector.extract_strided_slice %47 {offsets = [896, 0], sizes = [64, 32], strides = [1, 1]} : vector<1024x32xbf16> to vector<64x32xbf16>
    %c14 = arith.constant 14 : index
    %c0_65 = arith.constant 0 : index
    %c0_66 = arith.constant 0 : index
    %120 = vector.load %arg6[%c14, %c0_65, %c0_66] : memref<16x32x32xbf16, #tpu.memory_space<vmem>>, vector<1x32x32xbf16>
    %121 = vector.shape_cast %120 : vector<1x32x32xbf16> to vector<32x32xbf16>
    %cst_67 = arith.constant dense<0.000000e+00> : vector<64x32xf32>
    %122 = tpu.matmul %119, %121, %cst_67 {dimension_numbers = #tpu.dot_dimension_numbers<[1], [0], [0], [1], [0, 0, 1, 1], [], []>} : vector<64x32xbf16>, vector<32x32xbf16>, vector<64x32xf32> -> vector<64x32xf32>
    %123 = arith.addf %118, %122 : vector<64x32xf32>
    %124 = vector.extract_strided_slice %47 {offsets = [960, 0], sizes = [64, 32], strides = [1, 1]} : vector<1024x32xbf16> to vector<64x32xbf16>
    %c15 = arith.constant 15 : index
    %c0_68 = arith.constant 0 : index
    %c0_69 = arith.constant 0 : index
    %125 = vector.load %arg6[%c15, %c0_68, %c0_69] : memref<16x32x32xbf16, #tpu.memory_space<vmem>>, vector<1x32x32xbf16>
    %126 = vector.shape_cast %125 : vector<1x32x32xbf16> to vector<32x32xbf16>
    %cst_70 = arith.constant dense<0.000000e+00> : vector<64x32xf32>
    %127 = tpu.matmul %124, %126, %cst_70 {dimension_numbers = #tpu.dot_dimension_numbers<[1], [0], [0], [1], [0, 0, 1, 1], [], []>} : vector<64x32xbf16>, vector<32x32xbf16>, vector<64x32xf32> -> vector<64x32xf32>
    %128 = arith.addf %123, %127 : vector<64x32xf32>
    %c1_71 = arith.constant 1 : index
    %c0_72 = arith.constant 0 : index
    %c0_73 = arith.constant 0 : index
    %129 = vector.load %arg3[%c1_71, %c0_72, %c0_73] : memref<2x3x32xf32, #tpu.memory_space<vmem>>, vector<1x3x32xf32>
    %130 = vector.shape_cast %129 : vector<1x3x32xf32> to vector<3x32xf32>
    %131 = vector.extract_strided_slice %130 {offsets = [0, 0], sizes = [1, 32], strides = [1, 1]} : vector<3x32xf32> to vector<1x32xf32>
    %132 = vector.extract_strided_slice %130 {offsets = [1, 0], sizes = [1, 32], strides = [1, 1]} : vector<3x32xf32> to vector<1x32xf32>
    %133 = vector.extract_strided_slice %130 {offsets = [2, 0], sizes = [1, 32], strides = [1, 1]} : vector<3x32xf32> to vector<1x32xf32>
    %134 = vector.broadcast %131 : vector<1x32xf32> to vector<64x32xf32>
    %135 = arith.addf %128, %134 : vector<64x32xf32>
    %cst_74 = arith.constant dense<0.000000e+00> : vector<32xf32>
    %136 = vector.multi_reduction <add>, %135, %cst_74 [0] : vector<64x32xf32> to vector<32xf32>
    %137 = vector.shape_cast %136 : vector<32xf32> to vector<1x32xf32>
    %138 = arith.mulf %135, %135 : vector<64x32xf32>
    %cst_75 = arith.constant dense<0.000000e+00> : vector<32xf32>
    %139 = vector.multi_reduction <add>, %138, %cst_75 [0] : vector<64x32xf32> to vector<32xf32>
    %140 = vector.shape_cast %139 : vector<32xf32> to vector<1x32xf32>
    %141 = tpu.concatenate %137, %140 in 0 : vector<1x32xf32>, vector<1x32xf32> -> vector<2x32xf32>
    %cst_76 = arith.constant dense<0.000000e+00> : vector<2x32xf32>
    %142 = tpu.matmul %141, %0, %cst_76 {dimension_numbers = #tpu.dot_dimension_numbers<[1], [0], [0], [1], [0, 0, 1, 1], [], []>} : vector<2x32xf32>, vector<32x32xf32>, vector<2x32xf32> -> vector<2x32xf32>
    %143 = vector.extract_strided_slice %142 {offsets = [0, 0], sizes = [1, 32], strides = [1, 1]} : vector<2x32xf32> to vector<1x32xf32>
    %cst_77 = arith.constant 1.280000e+02 : f32
    %144 = vector.broadcast %cst_77 : f32 to vector<1x32xf32>
    %145 = arith.divf %143, %144 : vector<1x32xf32>
    %146 = vector.extract_strided_slice %142 {offsets = [1, 0], sizes = [1, 32], strides = [1, 1]} : vector<2x32xf32> to vector<1x32xf32>
    %cst_78 = arith.constant 1.280000e+02 : f32
    %147 = vector.broadcast %cst_78 : f32 to vector<1x32xf32>
    %148 = arith.divf %146, %147 : vector<1x32xf32>
    %149 = arith.mulf %145, %145 : vector<1x32xf32>
    %150 = arith.subf %148, %149 : vector<1x32xf32>
    %cst_79 = arith.constant 0.000000e+00 : f32
    %151 = vector.broadcast %cst_79 : f32 to vector<1x32xf32>
    %152 = arith.maximumf %150, %151 : vector<1x32xf32>
    %cst_80 = arith.constant 9.99999974E-6 : f32
    %153 = vector.broadcast %cst_80 : f32 to vector<1x32xf32>
    %154 = arith.addf %152, %153 : vector<1x32xf32>
    %155 = math.rsqrt %154 : vector<1x32xf32>
    %156 = arith.mulf %132, %155 : vector<1x32xf32>
    %157 = arith.mulf %145, %156 : vector<1x32xf32>
    %158 = arith.subf %133, %157 : vector<1x32xf32>
    %159 = vector.broadcast %156 : vector<1x32xf32> to vector<64x32xf32>
    %160 = arith.mulf %135, %159 : vector<64x32xf32>
    %161 = vector.broadcast %158 : vector<1x32xf32> to vector<64x32xf32>
    %162 = arith.addf %160, %161 : vector<64x32xf32>
    %cst_81 = arith.constant 0.000000e+00 : f32
    %163 = vector.broadcast %cst_81 : f32 to vector<64x32xf32>
    %164 = arith.cmpf oge, %162, %163 : vector<64x32xf32>
    %cst_82 = arith.constant 2.000000e-01 : f32
    %165 = vector.broadcast %cst_82 : f32 to vector<64x32xf32>
    %166 = arith.mulf %165, %162 : vector<64x32xf32>
    %167 = arith.select %164, %162, %166 : vector<64x32xi1>, vector<64x32xf32>
    %168 = arith.truncf %167 : vector<64x32xf32> to vector<64x32xbf16>
    %c0_83 = arith.constant 0 : index
    %c0_84 = arith.constant 0 : index
    %169 = vector.load %arg7[%c0_83, %c0_84] : memref<512x64xbf16, #tpu.memory_space<vmem>>, vector<512x64xbf16>
    %cst_85 = arith.constant dense<0.000000e+00> : vector<512x32xf32>
    %170 = tpu.matmul %169, %168, %cst_85 {dimension_numbers = #tpu.dot_dimension_numbers<[1], [0], [0], [1], [0, 0, 1, 1], [], []>} : vector<512x64xbf16>, vector<64x32xbf16>, vector<512x32xf32> -> vector<512x32xf32>
    %171 = arith.truncf %170 : vector<512x32xf32> to vector<512x32xbf16>
    %cst_86 = arith.constant 0.000000e+00 : f32
    %172 = vector.broadcast %cst_86 : f32 to vector<32x8xf32>
    %173 = vector.extract_strided_slice %171 {offsets = [0, 0], sizes = [32, 32], strides = [1, 1]} : vector<512x32xbf16> to vector<32x32xbf16>
    %c0_87 = arith.constant 0 : index
    %c0_88 = arith.constant 0 : index
    %c0_89 = arith.constant 0 : index
    %174 = vector.load %arg8[%c0_87, %c0_88, %c0_89] : memref<16x32x8xbf16, #tpu.memory_space<vmem>>, vector<1x32x8xbf16>
    %175 = vector.shape_cast %174 : vector<1x32x8xbf16> to vector<32x8xbf16>
    %cst_90 = arith.constant dense<0.000000e+00> : vector<32x8xf32>
    %176 = tpu.matmul %173, %175, %cst_90 {dimension_numbers = #tpu.dot_dimension_numbers<[1], [0], [0], [1], [0, 0, 1, 1], [], []>} : vector<32x32xbf16>, vector<32x8xbf16>, vector<32x8xf32> -> vector<32x8xf32>
    %177 = arith.addf %172, %176 : vector<32x8xf32>
    %178 = vector.extract_strided_slice %171 {offsets = [32, 0], sizes = [32, 32], strides = [1, 1]} : vector<512x32xbf16> to vector<32x32xbf16>
    %c1_91 = arith.constant 1 : index
    %c0_92 = arith.constant 0 : index
    %c0_93 = arith.constant 0 : index
    %179 = vector.load %arg8[%c1_91, %c0_92, %c0_93] : memref<16x32x8xbf16, #tpu.memory_space<vmem>>, vector<1x32x8xbf16>
    %180 = vector.shape_cast %179 : vector<1x32x8xbf16> to vector<32x8xbf16>
    %cst_94 = arith.constant dense<0.000000e+00> : vector<32x8xf32>
    %181 = tpu.matmul %178, %180, %cst_94 {dimension_numbers = #tpu.dot_dimension_numbers<[1], [0], [0], [1], [0, 0, 1, 1], [], []>} : vector<32x32xbf16>, vector<32x8xbf16>, vector<32x8xf32> -> vector<32x8xf32>
    %182 = arith.addf %177, %181 : vector<32x8xf32>
    %183 = vector.extract_strided_slice %171 {offsets = [64, 0], sizes = [32, 32], strides = [1, 1]} : vector<512x32xbf16> to vector<32x32xbf16>
    %c2_95 = arith.constant 2 : index
    %c0_96 = arith.constant 0 : index
    %c0_97 = arith.constant 0 : index
    %184 = vector.load %arg8[%c2_95, %c0_96, %c0_97] : memref<16x32x8xbf16, #tpu.memory_space<vmem>>, vector<1x32x8xbf16>
    %185 = vector.shape_cast %184 : vector<1x32x8xbf16> to vector<32x8xbf16>
    %cst_98 = arith.constant dense<0.000000e+00> : vector<32x8xf32>
    %186 = tpu.matmul %183, %185, %cst_98 {dimension_numbers = #tpu.dot_dimension_numbers<[1], [0], [0], [1], [0, 0, 1, 1], [], []>} : vector<32x32xbf16>, vector<32x8xbf16>, vector<32x8xf32> -> vector<32x8xf32>
    %187 = arith.addf %182, %186 : vector<32x8xf32>
    %188 = vector.extract_strided_slice %171 {offsets = [96, 0], sizes = [32, 32], strides = [1, 1]} : vector<512x32xbf16> to vector<32x32xbf16>
    %c3_99 = arith.constant 3 : index
    %c0_100 = arith.constant 0 : index
    %c0_101 = arith.constant 0 : index
    %189 = vector.load %arg8[%c3_99, %c0_100, %c0_101] : memref<16x32x8xbf16, #tpu.memory_space<vmem>>, vector<1x32x8xbf16>
    %190 = vector.shape_cast %189 : vector<1x32x8xbf16> to vector<32x8xbf16>
    %cst_102 = arith.constant dense<0.000000e+00> : vector<32x8xf32>
    %191 = tpu.matmul %188, %190, %cst_102 {dimension_numbers = #tpu.dot_dimension_numbers<[1], [0], [0], [1], [0, 0, 1, 1], [], []>} : vector<32x32xbf16>, vector<32x8xbf16>, vector<32x8xf32> -> vector<32x8xf32>
    %192 = arith.addf %187, %191 : vector<32x8xf32>
    %193 = vector.extract_strided_slice %171 {offsets = [128, 0], sizes = [32, 32], strides = [1, 1]} : vector<512x32xbf16> to vector<32x32xbf16>
    %c4_103 = arith.constant 4 : index
    %c0_104 = arith.constant 0 : index
    %c0_105 = arith.constant 0 : index
    %194 = vector.load %arg8[%c4_103, %c0_104, %c0_105] : memref<16x32x8xbf16, #tpu.memory_space<vmem>>, vector<1x32x8xbf16>
    %195 = vector.shape_cast %194 : vector<1x32x8xbf16> to vector<32x8xbf16>
    %cst_106 = arith.constant dense<0.000000e+00> : vector<32x8xf32>
    %196 = tpu.matmul %193, %195, %cst_106 {dimension_numbers = #tpu.dot_dimension_numbers<[1], [0], [0], [1], [0, 0, 1, 1], [], []>} : vector<32x32xbf16>, vector<32x8xbf16>, vector<32x8xf32> -> vector<32x8xf32>
    %197 = arith.addf %192, %196 : vector<32x8xf32>
    %198 = vector.extract_strided_slice %171 {offsets = [160, 0], sizes = [32, 32], strides = [1, 1]} : vector<512x32xbf16> to vector<32x32xbf16>
    %c5_107 = arith.constant 5 : index
    %c0_108 = arith.constant 0 : index
    %c0_109 = arith.constant 0 : index
    %199 = vector.load %arg8[%c5_107, %c0_108, %c0_109] : memref<16x32x8xbf16, #tpu.memory_space<vmem>>, vector<1x32x8xbf16>
    %200 = vector.shape_cast %199 : vector<1x32x8xbf16> to vector<32x8xbf16>
    %cst_110 = arith.constant dense<0.000000e+00> : vector<32x8xf32>
    %201 = tpu.matmul %198, %200, %cst_110 {dimension_numbers = #tpu.dot_dimension_numbers<[1], [0], [0], [1], [0, 0, 1, 1], [], []>} : vector<32x32xbf16>, vector<32x8xbf16>, vector<32x8xf32> -> vector<32x8xf32>
    %202 = arith.addf %197, %201 : vector<32x8xf32>
    %203 = vector.extract_strided_slice %171 {offsets = [192, 0], sizes = [32, 32], strides = [1, 1]} : vector<512x32xbf16> to vector<32x32xbf16>
    %c6_111 = arith.constant 6 : index
    %c0_112 = arith.constant 0 : index
    %c0_113 = arith.constant 0 : index
    %204 = vector.load %arg8[%c6_111, %c0_112, %c0_113] : memref<16x32x8xbf16, #tpu.memory_space<vmem>>, vector<1x32x8xbf16>
    %205 = vector.shape_cast %204 : vector<1x32x8xbf16> to vector<32x8xbf16>
    %cst_114 = arith.constant dense<0.000000e+00> : vector<32x8xf32>
    %206 = tpu.matmul %203, %205, %cst_114 {dimension_numbers = #tpu.dot_dimension_numbers<[1], [0], [0], [1], [0, 0, 1, 1], [], []>} : vector<32x32xbf16>, vector<32x8xbf16>, vector<32x8xf32> -> vector<32x8xf32>
    %207 = arith.addf %202, %206 : vector<32x8xf32>
    %208 = vector.extract_strided_slice %171 {offsets = [224, 0], sizes = [32, 32], strides = [1, 1]} : vector<512x32xbf16> to vector<32x32xbf16>
    %c7_115 = arith.constant 7 : index
    %c0_116 = arith.constant 0 : index
    %c0_117 = arith.constant 0 : index
    %209 = vector.load %arg8[%c7_115, %c0_116, %c0_117] : memref<16x32x8xbf16, #tpu.memory_space<vmem>>, vector<1x32x8xbf16>
    %210 = vector.shape_cast %209 : vector<1x32x8xbf16> to vector<32x8xbf16>
    %cst_118 = arith.constant dense<0.000000e+00> : vector<32x8xf32>
    %211 = tpu.matmul %208, %210, %cst_118 {dimension_numbers = #tpu.dot_dimension_numbers<[1], [0], [0], [1], [0, 0, 1, 1], [], []>} : vector<32x32xbf16>, vector<32x8xbf16>, vector<32x8xf32> -> vector<32x8xf32>
    %212 = arith.addf %207, %211 : vector<32x8xf32>
    %213 = vector.extract_strided_slice %171 {offsets = [256, 0], sizes = [32, 32], strides = [1, 1]} : vector<512x32xbf16> to vector<32x32xbf16>
    %c8_119 = arith.constant 8 : index
    %c0_120 = arith.constant 0 : index
    %c0_121 = arith.constant 0 : index
    %214 = vector.load %arg8[%c8_119, %c0_120, %c0_121] : memref<16x32x8xbf16, #tpu.memory_space<vmem>>, vector<1x32x8xbf16>
    %215 = vector.shape_cast %214 : vector<1x32x8xbf16> to vector<32x8xbf16>
    %cst_122 = arith.constant dense<0.000000e+00> : vector<32x8xf32>
    %216 = tpu.matmul %213, %215, %cst_122 {dimension_numbers = #tpu.dot_dimension_numbers<[1], [0], [0], [1], [0, 0, 1, 1], [], []>} : vector<32x32xbf16>, vector<32x8xbf16>, vector<32x8xf32> -> vector<32x8xf32>
    %217 = arith.addf %212, %216 : vector<32x8xf32>
    %218 = vector.extract_strided_slice %171 {offsets = [288, 0], sizes = [32, 32], strides = [1, 1]} : vector<512x32xbf16> to vector<32x32xbf16>
    %c9_123 = arith.constant 9 : index
    %c0_124 = arith.constant 0 : index
    %c0_125 = arith.constant 0 : index
    %219 = vector.load %arg8[%c9_123, %c0_124, %c0_125] : memref<16x32x8xbf16, #tpu.memory_space<vmem>>, vector<1x32x8xbf16>
    %220 = vector.shape_cast %219 : vector<1x32x8xbf16> to vector<32x8xbf16>
    %cst_126 = arith.constant dense<0.000000e+00> : vector<32x8xf32>
    %221 = tpu.matmul %218, %220, %cst_126 {dimension_numbers = #tpu.dot_dimension_numbers<[1], [0], [0], [1], [0, 0, 1, 1], [], []>} : vector<32x32xbf16>, vector<32x8xbf16>, vector<32x8xf32> -> vector<32x8xf32>
    %222 = arith.addf %217, %221 : vector<32x8xf32>
    %223 = vector.extract_strided_slice %171 {offsets = [320, 0], sizes = [32, 32], strides = [1, 1]} : vector<512x32xbf16> to vector<32x32xbf16>
    %c10_127 = arith.constant 10 : index
    %c0_128 = arith.constant 0 : index
    %c0_129 = arith.constant 0 : index
    %224 = vector.load %arg8[%c10_127, %c0_128, %c0_129] : memref<16x32x8xbf16, #tpu.memory_space<vmem>>, vector<1x32x8xbf16>
    %225 = vector.shape_cast %224 : vector<1x32x8xbf16> to vector<32x8xbf16>
    %cst_130 = arith.constant dense<0.000000e+00> : vector<32x8xf32>
    %226 = tpu.matmul %223, %225, %cst_130 {dimension_numbers = #tpu.dot_dimension_numbers<[1], [0], [0], [1], [0, 0, 1, 1], [], []>} : vector<32x32xbf16>, vector<32x8xbf16>, vector<32x8xf32> -> vector<32x8xf32>
    %227 = arith.addf %222, %226 : vector<32x8xf32>
    %228 = vector.extract_strided_slice %171 {offsets = [352, 0], sizes = [32, 32], strides = [1, 1]} : vector<512x32xbf16> to vector<32x32xbf16>
    %c11_131 = arith.constant 11 : index
    %c0_132 = arith.constant 0 : index
    %c0_133 = arith.constant 0 : index
    %229 = vector.load %arg8[%c11_131, %c0_132, %c0_133] : memref<16x32x8xbf16, #tpu.memory_space<vmem>>, vector<1x32x8xbf16>
    %230 = vector.shape_cast %229 : vector<1x32x8xbf16> to vector<32x8xbf16>
    %cst_134 = arith.constant dense<0.000000e+00> : vector<32x8xf32>
    %231 = tpu.matmul %228, %230, %cst_134 {dimension_numbers = #tpu.dot_dimension_numbers<[1], [0], [0], [1], [0, 0, 1, 1], [], []>} : vector<32x32xbf16>, vector<32x8xbf16>, vector<32x8xf32> -> vector<32x8xf32>
    %232 = arith.addf %227, %231 : vector<32x8xf32>
    %233 = vector.extract_strided_slice %171 {offsets = [384, 0], sizes = [32, 32], strides = [1, 1]} : vector<512x32xbf16> to vector<32x32xbf16>
    %c12_135 = arith.constant 12 : index
    %c0_136 = arith.constant 0 : index
    %c0_137 = arith.constant 0 : index
    %234 = vector.load %arg8[%c12_135, %c0_136, %c0_137] : memref<16x32x8xbf16, #tpu.memory_space<vmem>>, vector<1x32x8xbf16>
    %235 = vector.shape_cast %234 : vector<1x32x8xbf16> to vector<32x8xbf16>
    %cst_138 = arith.constant dense<0.000000e+00> : vector<32x8xf32>
    %236 = tpu.matmul %233, %235, %cst_138 {dimension_numbers = #tpu.dot_dimension_numbers<[1], [0], [0], [1], [0, 0, 1, 1], [], []>} : vector<32x32xbf16>, vector<32x8xbf16>, vector<32x8xf32> -> vector<32x8xf32>
    %237 = arith.addf %232, %236 : vector<32x8xf32>
    %238 = vector.extract_strided_slice %171 {offsets = [416, 0], sizes = [32, 32], strides = [1, 1]} : vector<512x32xbf16> to vector<32x32xbf16>
    %c13_139 = arith.constant 13 : index
    %c0_140 = arith.constant 0 : index
    %c0_141 = arith.constant 0 : index
    %239 = vector.load %arg8[%c13_139, %c0_140, %c0_141] : memref<16x32x8xbf16, #tpu.memory_space<vmem>>, vector<1x32x8xbf16>
    %240 = vector.shape_cast %239 : vector<1x32x8xbf16> to vector<32x8xbf16>
    %cst_142 = arith.constant dense<0.000000e+00> : vector<32x8xf32>
    %241 = tpu.matmul %238, %240, %cst_142 {dimension_numbers = #tpu.dot_dimension_numbers<[1], [0], [0], [1], [0, 0, 1, 1], [], []>} : vector<32x32xbf16>, vector<32x8xbf16>, vector<32x8xf32> -> vector<32x8xf32>
    %242 = arith.addf %237, %241 : vector<32x8xf32>
    %243 = vector.extract_strided_slice %171 {offsets = [448, 0], sizes = [32, 32], strides = [1, 1]} : vector<512x32xbf16> to vector<32x32xbf16>
    %c14_143 = arith.constant 14 : index
    %c0_144 = arith.constant 0 : index
    %c0_145 = arith.constant 0 : index
    %244 = vector.load %arg8[%c14_143, %c0_144, %c0_145] : memref<16x32x8xbf16, #tpu.memory_space<vmem>>, vector<1x32x8xbf16>
    %245 = vector.shape_cast %244 : vector<1x32x8xbf16> to vector<32x8xbf16>
    %cst_146 = arith.constant dense<0.000000e+00> : vector<32x8xf32>
    %246 = tpu.matmul %243, %245, %cst_146 {dimension_numbers = #tpu.dot_dimension_numbers<[1], [0], [0], [1], [0, 0, 1, 1], [], []>} : vector<32x32xbf16>, vector<32x8xbf16>, vector<32x8xf32> -> vector<32x8xf32>
    %247 = arith.addf %242, %246 : vector<32x8xf32>
    %248 = vector.extract_strided_slice %171 {offsets = [480, 0], sizes = [32, 32], strides = [1, 1]} : vector<512x32xbf16> to vector<32x32xbf16>
    %c15_147 = arith.constant 15 : index
    %c0_148 = arith.constant 0 : index
    %c0_149 = arith.constant 0 : index
    %249 = vector.load %arg8[%c15_147, %c0_148, %c0_149] : memref<16x32x8xbf16, #tpu.memory_space<vmem>>, vector<1x32x8xbf16>
    %250 = vector.shape_cast %249 : vector<1x32x8xbf16> to vector<32x8xbf16>
    %cst_150 = arith.constant dense<0.000000e+00> : vector<32x8xf32>
    %251 = tpu.matmul %248, %250, %cst_150 {dimension_numbers = #tpu.dot_dimension_numbers<[1], [0], [0], [1], [0, 0, 1, 1], [], []>} : vector<32x32xbf16>, vector<32x8xbf16>, vector<32x8xf32> -> vector<32x8xf32>
    %252 = arith.addf %247, %251 : vector<32x8xf32>
    %c0_151 = arith.constant 0 : index
    %c0_152 = arith.constant 0 : index
    %253 = vector.load %arg9[%c0_151, %c0_152] : memref<8x256xf32, #tpu.memory_space<vmem>>, vector<8x256xf32>
    %cst_153 = arith.constant dense<0.000000e+00> : vector<32x256xf32>
    %254 = tpu.matmul %252, %253, %cst_153 {dimension_numbers = #tpu.dot_dimension_numbers<[1], [0], [0], [1], [0, 0, 1, 1], [], []>} : vector<32x8xf32>, vector<8x256xf32>, vector<32x256xf32> -> vector<32x256xf32>
    %c0_154 = arith.constant 0 : index
    %c0_155 = arith.constant 0 : index
    %255 = vector.load %arg10[%c0_154, %c0_155] : memref<32x256xf32, #tpu.memory_space<vmem>>, vector<32x256xf32>
    %256 = arith.mulf %254, %255 : vector<32x256xf32>
    %cst_156 = arith.constant dense<0.000000e+00> : vector<256xf32>
    %257 = vector.multi_reduction <add>, %256, %cst_156 [0] : vector<32x256xf32> to vector<256xf32>
    %258 = vector.shape_cast %257 : vector<256xf32> to vector<1x256xf32>
    %259 = arith.truncf %258 : vector<1x256xf32> to vector<1x256xbf16>
    %c0_157 = arith.constant 0 : index
    %c0_158 = arith.constant 0 : index
    %260 = vector.load %arg11[%c0_157, %c0_158] : memref<256x32xbf16, #tpu.memory_space<vmem>>, vector<256x32xbf16>
    %cst_159 = arith.constant dense<0.000000e+00> : vector<1x32xf32>
    %261 = tpu.matmul %259, %260, %cst_159 {dimension_numbers = #tpu.dot_dimension_numbers<[1], [0], [0], [1], [0, 0, 1, 1], [], []>} : vector<1x256xbf16>, vector<256x32xbf16>, vector<1x32xf32> -> vector<1x32xf32>
    %c0_160 = arith.constant 0 : index
    %c0_161 = arith.constant 0 : index
    %262 = vector.load %arg12[%c0_160, %c0_161] : memref<1x32xf32, #tpu.memory_space<vmem>>, vector<1x32xf32>
    %263 = arith.addf %261, %262 : vector<1x32xf32>
    %c0_162 = arith.constant 0 : index
    %c0_163 = arith.constant 0 : index
    %c0_164 = arith.constant 0 : index
    %264 = vector.load %arg13[%c0_162, %c0_163, %c0_164] : memref<1x1x32xf32, #tpu.memory_space<vmem>>, vector<1x1x32xf32>
    %265 = vector.shape_cast %264 : vector<1x1x32xf32> to vector<1x32xf32>
    %266 = vector.shape_cast %263 : vector<1x32xf32> to vector<1x1x32xf32>
    tpu.vector_store %arg13[%c0_162, %c0_163, %c0_164], %266 {strides = array<i32>} : memref<1x1x32xf32, #tpu.memory_space<vmem>>, vector<1x1x32xf32>,
    return
  }
  func.func @transform_0(%arg0: i32) -> (i32, i32, i32) {
    %c0_i32 = arith.constant 0 : i32
    %c0_i32_0 = arith.constant 0 : i32
    %c0_i32_1 = arith.constant 0 : i32
    return %arg0, %c0_i32, %c0_i32_0 : i32, i32, i32
  }
  func.func @transform_1(%arg0: i32) -> (i32, i32) {
    %c0_i32 = arith.constant 0 : i32
    %c0_i32_0 = arith.constant 0 : i32
    %c0_i32_1 = arith.constant 0 : i32
    return %c0_i32, %c0_i32_0 : i32, i32
  }
  func.func @transform_2(%arg0: i32) -> (i32, i32, i32) {
    %c0_i32 = arith.constant 0 : i32
    %c0_i32_0 = arith.constant 0 : i32
    %c0_i32_1 = arith.constant 0 : i32
    %c0_i32_2 = arith.constant 0 : i32
    return %c0_i32, %c0_i32_0, %c0_i32_1 : i32, i32, i32
  }
  func.func @transform_3(%arg0: i32) -> (i32, i32) {
    %c0_i32 = arith.constant 0 : i32
    %c0_i32_0 = arith.constant 0 : i32
    %c0_i32_1 = arith.constant 0 : i32
    return %c0_i32, %c0_i32_0 : i32, i32
  }
  func.func @transform_4(%arg0: i32) -> (i32, i32) {
    %c0_i32 = arith.constant 0 : i32
    %c0_i32_0 = arith.constant 0 : i32
    %c0_i32_1 = arith.constant 0 : i32
    return %c0_i32, %c0_i32_0 : i32, i32
  }
  func.func @transform_5(%arg0: i32) -> (i32, i32, i32) {
    %c0_i32 = arith.constant 0 : i32
    %c0_i32_0 = arith.constant 0 : i32
    %c0_i32_1 = arith.constant 0 : i32
    %c0_i32_2 = arith.constant 0 : i32
    return %c0_i32, %c0_i32_0, %c0_i32_1 : i32, i32, i32
  }
  func.func @transform_6(%arg0: i32) -> (i32, i32) {
    %c0_i32 = arith.constant 0 : i32
    %c0_i32_0 = arith.constant 0 : i32
    %c0_i32_1 = arith.constant 0 : i32
    return %c0_i32, %c0_i32_0 : i32, i32
  }
  func.func @transform_7(%arg0: i32) -> (i32, i32, i32) {
    %c0_i32 = arith.constant 0 : i32
    %c0_i32_0 = arith.constant 0 : i32
    %c0_i32_1 = arith.constant 0 : i32
    %c0_i32_2 = arith.constant 0 : i32
    return %c0_i32, %c0_i32_0, %c0_i32_1 : i32, i32, i32
  }
  func.func @transform_8(%arg0: i32) -> (i32, i32) {
    %c0_i32 = arith.constant 0 : i32
    %c0_i32_0 = arith.constant 0 : i32
    %c0_i32_1 = arith.constant 0 : i32
    return %c0_i32, %c0_i32_0 : i32, i32
  }
  func.func @transform_9(%arg0: i32) -> (i32, i32) {
    %c0_i32 = arith.constant 0 : i32
    %c0_i32_0 = arith.constant 0 : i32
    %c0_i32_1 = arith.constant 0 : i32
    return %c0_i32, %c0_i32_0 : i32, i32
  }
  func.func @transform_10(%arg0: i32) -> (i32, i32) {
    %c0_i32 = arith.constant 0 : i32
    %c0_i32_0 = arith.constant 0 : i32
    %c0_i32_1 = arith.constant 0 : i32
    return %c0_i32, %c0_i32_0 : i32, i32
  }
  func.func @transform_11(%arg0: i32) -> (i32, i32) {
    %c0_i32 = arith.constant 0 : i32
    %c0_i32_0 = arith.constant 0 : i32
    %c0_i32_1 = arith.constant 0 : i32
    return %c0_i32, %c0_i32_0 : i32, i32
  }
  func.func @transform_12(%arg0: i32) -> (i32, i32, i32) {
    %c0_i32 = arith.constant 0 : i32
    %c0_i32_0 = arith.constant 0 : i32
    %c0_i32_1 = arith.constant 0 : i32
    return %arg0, %c0_i32, %c0_i32_0 : i32, i32, i32
  }
}

</mosaic_0001>

<bundles_post_ra>
// kernel: encoder_pg_forward.1
= control target key start
LH: loop header
LB: loop body
LE: loop exit
PB: predicated region body
PF: predicated region fallthrough
CT: control target
= control target key end

     0   :  { %s8482_s21 = smov 0   ;;  %s10004_s0 = inlined_call_operand.vmem [shape: bf16[2,256,64], index: 0, kind: input, shape index: {}]   ;;  %s10005_s1 = inlined_call_operand.vmem [shape: bf16[64,32], index: 1, kind: input, shape index: {}]   ;;  %s10006_s2 = inlined_call_operand.vmem [shape: f32[2,3,32], index: 2, kind: input, shape index: {}]   ;;  %s10007_s3 = inlined_call_operand.vmem [shape: f32[32,32], index: 3, kind: input, shape index: {}]   ;;  %s10008_s4 = inlined_call_operand.vmem [shape: bf16[1024,256], index: 4, kind: input, shape index: {}]   ;;  %s10009_s5 = inlined_call_operand.vmem [shape: bf16[16,32,32], index: 5, kind: input, shape index: {}]   ;;  %s10010_s6 = inlined_call_operand.vmem [shape: bf16[512,64], index: 6, kind: input, shape index: {}]   ;;  %s10011_s7 = inlined_call_operand.vmem [shape: bf16[16,32,8], index: 7, kind: input, shape index: {}]   ;;  %s10012_s8 = inlined_call_operand.vmem [shape: f32[8,256], index: 8, kind: input, shape index: {}]   ;;  %s10013_s9 = inlined_call_operand.vmem [shape: f32[32,256], index: 9, kind: input, shape index: {}]   ;;  %s10014_s10 = inlined_call_operand.vmem [shape: bf16[256,32], index: 10, kind: input, shape index: {}]   ;;  %s10015_s11 = inlined_call_operand.vmem [shape: f32[1,32], index: 11, kind: input, shape index: {}]   ;;  %s10016_s12 = inlined_call_operand.vmem [shape: f32[2,1,32], index: 12, kind: output, shape index: {}]  }
   0x1 LB: > { %s6630_s22 = sadd.s32 4294967295, %s8411_s21   ;;  %p6634_p0 = scmp.ge.s32.totalorder %s8411_s21, 1  ;;  %s8411_s21 = sphi %s8482_s21, %s22_s21  }
   0x2   : > { %p362_p1 = scmp.lt.s32.totalorder %s8411_s21, 3 }
   0x4   : > { %p363_p2 = pnand %p6634_p0, %p362_p1 }
   0x5   : > { %v8077_v0 = vld [vmem:[%s10005_s1] sm:$0xff] (!%p363_p2)   ;;  %p402_p3 = scmp.lt.s32.totalorder (!%p363_p2), %s6630_s22, 1  ;;  %v8078_v1 = vld [vmem:[%s10005_s1 + $0x8] sm:$0xff] (!%p363_p2)   ;;  %v8079_v2 = vld [vmem:[%s10005_s1 + $0x10] sm:$0xff] (!%p363_p2)   ;;  %vm564_vm0 = vcmask (!%p363_p2), 523264   ;;  %v8413_v22 = vmov (!%p363_p2), 0.0|0.0   ;;  %v456_v28 = vlaneseq (!%p363_p2) }
   0x6   : > { %366 = sbr.rel (%p363_p2) target bundleno = 2945 (0xb81), region = 68  ;;  %7419 = vmatprep.subr.bf16.mxu0 (!%p363_p2), %v8077_v0  ;;  %v8080_v4 = vld [vmem:[%s10005_s1 + $0x18] sm:$0xff] (!%p363_p2)   ;;  %v411_v20 = vld [vmem:[%s10007_s3] sm:$0xff] (!%p363_p2)  ;;  %v412_v21 = vld [vmem:[%s10007_s3 + $0x8] sm:$0xff] (!%p363_p2)  ;;  %vm8414_vm1 = vmmov (!%p363_p2), 0   ;;  %v8415_v27 = vmov (!%p363_p2), 0.0  }
   0x7   : > { %7420 = vmatpush3.bf16.msra.mxu0 (!%p363_p2), %v8077_v0  ;;  %v8549_v23 = vpack.c.bf16 (!%p363_p2), %v412_v21, %v411_v20  ;;  %v413_v24 = vld [vmem:[%s10007_s3 + $0x10] sm:$0xff] (!%p363_p2)  ;;  %v414_v25 = vld [vmem:[%s10007_s3 + $0x18] sm:$0xff] (!%p363_p2)  ;;  %v8564_v29 = vshrl.u32 (!%p363_p2), %v456_v28, 7  ;;  %v8570_v31 = vld [vmem:[%s10006_s2] sm:$0x7] (!%p363_p2)  ;;  %vm774_vm2 = vcmask (!%p363_p2), 261120  }
   0x8   : > { %7421 = vmatprep.subr.bf16.mxu0 (!%p363_p2), %v8078_v1  ;;  %v8559_v26 = vpack.c.bf16 (!%p363_p2), %v414_v25, %v413_v24  ;;  %vm945_vm3 = vcmask (!%p363_p2), 1040384  }
   0x9   : > { %v458_v30 = vsub.s32 (!%p363_p2), 0, %v8564_v29 }
   0xb   : > { %7422 = vmatpush3.bf16.msra.mxu0 (!%p363_p2), %v8078_v1  ;;  %v8575_v32 = vrot.slane (!%p363_p2), %v8570_v31, %v458_v30 }
   0xc   : > { %7423 = vmatprep.subr.bf16.mxu0 (!%p363_p2), %v8079_v2 }
   0xd   : > { %s10018_s22 = smov (!%p402_p3, %s6630_s22), 1 }
   0xe   : > { %s7170_s29 = sshll.u32 %s10018_s22, 7  ;;  %s409_s23 = scalar_lea.vmem %s10016_s12, %s10018_s22 }
   0xf   : > { %s8505_s14 = scalar_lea.vmem %s10004_s0, %s7170_s29  ;;  %7424 = vmatpush3.bf16.msra.mxu0 %v8079_v2 }
  0x10   : > { %v8081_v3 = vld [vmem:[%s8505_s14] sm:$0xff]   ;;  %7425 = vmatprep.subr.bf16.mxu0 %v8080_v4  ;;  %v8082_v5 = vld [vmem:[%s8505_s14 + $0x8] sm:$0xff]   ;;  %v8083_v6 = vld [vmem:[%s8505_s14 + $0x10] sm:$0xff]  }
  0x11   : > { %7427 = vmatprep.mubr.msk.bf16.mxu0 %vm564_vm0, %v8081_v3  ;;  %v8084_v7 = vld [vmem:[%s8505_s14 + $0x18] sm:$0xff]   ;;  %v8085_v8 = vld [vmem:[%s8505_s14 + $0x20] sm:$0xff]   ;;  %v8086_v9 = vld [vmem:[%s8505_s14 + $0x28] sm:$0xff]  }
  0x12   : > { %v8087_v10 = vld [vmem:[%s8505_s14 + $0x30] sm:$0xff]   ;;  %v8088_v11 = vld [vmem:[%s8505_s14 + $0x38] sm:$0xff]   ;;  %v8089_v12 = vld [vmem:[%s8505_s14 + $0x40] sm:$0xff]  }
  0x13   : > { %7426 = vmatpush3.bf16.msra.mxu0 %v8080_v4  ;;  %v8090_v13 = vld [vmem:[%s8505_s14 + $0x48] sm:$0xff]   ;;  %v8091_v14 = vld [vmem:[%s8505_s14 + $0x50] sm:$0xff]   ;;  %v8092_v15 = vld [vmem:[%s8505_s14 + $0x58] sm:$0xff]  }
  0x14   : > { %v8093_v16 = vld [vmem:[%s8505_s14 + $0x60] sm:$0xff]   ;;  %v8094_v17 = vld [vmem:[%s8505_s14 + $0x68] sm:$0xff]   ;;  %v8095_v18 = vld [vmem:[%s8505_s14 + $0x70] sm:$0xff]   ;;  %7873 = vmatprep.subr.bf16.mxu0 %v8413_v22 }
  0x15   : > { %v8096_v19 = vld [vmem:[%s8505_s14 + $0x78] sm:$0xff]  }
  0x16   : > { %7428 = vmatmul.mubr.msk.bf16.vlgmr.msra.gmra.mrb[0].mxu0 %vm564_vm0, %v8082_v5 }
  0x17   : > { %7431 = vmatprep.mubr.msk.bf16.mxu0 %vm564_vm0, %v8083_v6  ;;  %7875 = vmatpush3.bf16.msra.mxu0 %v8549_v23 }
  0x18   : > { %7876 = vmatprep.subr.bf16.mxu0 %v8413_v22 }
  0x1b   : > { %7878 = vmatpush3.bf16.msra.mxu0 %v8559_v26 }
  0x1e   : > { %7432 = vmatmul.mubr.msk.bf16.gmra.mrb[4].mxu0 %vm564_vm0, %v8084_v7 }
  0x1f   : > { %7435 = vmatprep.mubr.msk.bf16.mxu0 %vm564_vm0, %v8085_v8 }
  0x26   : > { %7436 = vmatmul.mubr.msk.bf16.gmra.mrb[8].mxu0 %vm564_vm0, %v8086_v9 }
  0x27   : > { %7439 = vmatprep.mubr.msk.bf16.mxu0 %vm564_vm0, %v8087_v10 }
  0x2e   : > { %7440 = vmatmul.mubr.msk.bf16.gmra.mrb[12].mxu0 %vm564_vm0, %v8088_v11 }
  0x2f   : > { %7443 = vmatprep.mubr.msk.bf16.mxu0 %vm564_vm0, %v8089_v12 }
  0x36   : > { %7444 = vmatmul.mubr.msk.bf16.gmra.mrb[16].mxu0 %vm564_vm0, %v8090_v13 }
  0x37   : > { %7447 = vmatprep.mubr.msk.bf16.mxu0 %vm564_vm0, %v8091_v14 }
  0x3e   : > { %7448 = vmatmul.mubr.msk.bf16.gmra.mrb[20].mxu0 %vm564_vm0, %v8092_v15 }
  0x3f   : > { %7451 = vmatprep.mubr.msk.bf16.mxu0 %vm564_vm0, %v8093_v16 }
  0x46   : > { %7452 = vmatmul.mubr.msk.bf16.gmra.mrb[24].mxu0 %vm564_vm0, %v8094_v17 }
  0x47   : > { %7455 = vmatprep.mubr.msk.bf16.mxu0 %vm564_vm0, %v8095_v18 }
  0x4e   : > { %7456 = vmatmul.mubr.msk.bf16.gmra.mrb[28].mxu0 %vm564_vm0, %v8096_v19 }
  0x4f   : > { %7467 = vmatprep.mubr.msk.f32.mxu0 %vm8414_vm1, %v8415_v27 }
  0xe9   : > { %v7429_v33 = vpop.f32.mrb[0].mxu0 }
  0xea   : > { %v647_v34 = vpop.f32.mrb[1].mxu0  ;;  %v8578_v35 = vadd.f32 %v7429_v33, %v8575_v32 }
  0xeb   : > { %v8581_v36 = vadd.f32 %v647_v34, %v8575_v32  ;;  %v7430_v37 = vpop.f32.mrb[2].mxu0 }
  0xec   : > { %v650_v38 = vpop.f32.mrb[3].mxu0  ;;  %v8586_v40 = vadd.f32 %v7430_v37, %v8575_v32  ;;  %v846_v42 = vmul.f32 %v8578_v35, %v8578_v35  ;;  %v778_v47 = vsel %vm774_vm2, %v8578_v35, 0.0 }
  0xed   : > { %v844_v39 = vmul.f32 %v8581_v36, %v8581_v36  ;;  %v8589_v41 = vadd.f32 %v650_v38, %v8575_v32  ;;  %v775_v43 = vsel %vm774_vm2, %v8581_v36, 0.0 }
  0xee   : > { %v847_v49 = vmul.f32 %v8586_v40, %v8586_v40  ;;  %v879_v55 = vsel %vm774_vm2, %v846_v42, 0.0  ;;  %v780_v56 = vsel %vm774_vm2, %v8586_v40, 0.0 }
  0xef   : > { %v776_v44 = vsel %vm774_vm2, %v8589_v41, 0.0  ;;  %v845_v45 = vmul.f32 %v8589_v41, %v8589_v41  ;;  %v876_v48 = vsel %vm774_vm2, %v844_v39, 0.0 }
  0xf0   : > { %v777_v46 = vadd.f32 %v776_v44, %v775_v43  ;;  %v881_v63 = vsel %vm774_vm2, %v847_v49, 0.0 }
  0xf1   : > { %v877_v50 = vsel %vm774_vm2, %v845_v45, 0.0  ;;  %v7433_v51 = vpop.f32.mrb[4].mxu0 }
  0xf2   : > { %v779_v52 = vadd.f32 %v778_v47, %v777_v46  ;;  %v878_v53 = vadd.f32 %v877_v50, %v876_v48  ;;  %v663_v54 = vpop.f32.mrb[5].mxu0  ;;  %v8612_v60 = vadd.f32 %v7433_v51, %v8575_v32 }
  0xf3   : > { %v8609_v57 = vadd.f32 %v663_v54, %v8575_v32  ;;  %v7434_v58 = vpop.f32.mrb[6].mxu0 }
  0xf4   : > { %v880_v59 = vadd.f32 %v879_v55, %v878_v53  ;;  %v781_v61 = vadd.f32 %v780_v56, %v779_v52  ;;  %v666_v62 = vpop.f32.mrb[7].mxu0  ;;  %v8623_v5 = vadd.f32 %v7434_v58, %v8575_v32  ;;  %v850_v8 = vmul.f32 %v8612_v60, %v8612_v60 }
  0xf5   : > { %v782_v0 = vsel %vm774_vm2, %v8609_v57, 0.0  ;;  %v848_v1 = vmul.f32 %v8609_v57, %v8609_v57  ;;  %v8620_v2 = vadd.f32 %v666_v62, %v8575_v32  ;;  %v786_v12 = vsel %vm774_vm2, %v8612_v60, 0.0 }
  0xf6   : > { %v783_v3 = vadd.f32 %v782_v0, %v781_v61  ;;  %v882_v4 = vadd.f32 %v881_v63, %v880_v59  ;;  %v851_v14 = vmul.f32 %v8623_v5, %v8623_v5  ;;  %v788_v18 = vsel %vm774_vm2, %v8623_v5, 0.0 }
  0xf7   : > { %v883_v6 = vsel %vm774_vm2, %v848_v1, 0.0  ;;  %v784_v7 = vsel %vm774_vm2, %v8620_v2, 0.0  ;;  %v849_v11 = vmul.f32 %v8620_v2, %v8620_v2  ;;  %v887_v24 = vsel %vm774_vm2, %v850_v8, 0.0 }
  0xf8   : > { %v884_v9 = vadd.f32 %v883_v6, %v882_v4  ;;  %v785_v10 = vadd.f32 %v784_v7, %v783_v3  ;;  %v889_v42 = vsel %vm774_vm2, %v851_v14, 0.0 }
  0xf9   : > { %v7437_v13 = vpop.f32.mrb[8].mxu0  ;;  %v885_v16 = vsel %vm774_vm2, %v849_v11, 0.0 }
  0xfa   : > { %v787_v15 = vadd.f32 %v786_v12, %v785_v10  ;;  %v679_v17 = vpop.f32.mrb[9].mxu0  ;;  %v886_v19 = vadd.f32 %v885_v16, %v884_v9  ;;  %v8644_v25 = vadd.f32 %v7437_v13, %v8575_v32 }
  0xfb   : > { %v8640_v20 = vadd.f32 %v679_v17, %v8575_v32  ;;  %v7438_v21 = vpop.f32.mrb[10].mxu0 }
  0xfc   : > { %v789_v28 = vadd.f32 %v788_v18, %v787_v15  ;;  %v682_v33 = vpop.f32.mrb[11].mxu0  ;;  %v888_v34 = vadd.f32 %v887_v24, %v886_v19  ;;  %v8655_v44 = vadd.f32 %v7438_v21, %v8575_v32  ;;  %v854_v49 = vmul.f32 %v8644_v25, %v8644_v25 }
  0xfd   : > { %v790_v37 = vsel %vm774_vm2, %v8640_v20, 0.0  ;;  %v852_v38 = vmul.f32 %v8640_v20, %v8640_v20  ;;  %v8651_v39 = vadd.f32 %v682_v33, %v8575_v32  ;;  %v794_v51 = vsel %vm774_vm2, %v8644_v25, 0.0 }
  0xfe   : > { %v791_v43 = vadd.f32 %v790_v37, %v789_v28  ;;  %v890_v45 = vadd.f32 %v889_v42, %v888_v34  ;;  %v855_v55 = vmul.f32 %v8655_v44, %v8655_v44  ;;  %v796_v59 = vsel %vm774_vm2, %v8655_v44, 0.0 }
  0xff   : > { %v891_v46 = vsel %vm774_vm2, %v852_v38, 0.0  ;;  %v792_v47 = vsel %vm774_vm2, %v8651_v39, 0.0  ;;  %v853_v48 = vmul.f32 %v8651_v39, %v8651_v39  ;;  %v895_v0 = vsel %vm774_vm2, %v854_v49, 0.0 }
 0x100   : > { %v793_v50 = vadd.f32 %v792_v47, %v791_v43  ;;  %v892_v52 = vadd.f32 %v891_v46, %v890_v45  ;;  %v897_v10 = vsel %vm774_vm2, %v855_v55, 0.0 }
 0x101   : > { %v893_v53 = vsel %vm774_vm2, %v853_v48, 0.0  ;;  %v7441_v54 = vpop.f32.mrb[12].mxu0 }
 0x102   : > { %v795_v56 = vadd.f32 %v794_v51, %v793_v50  ;;  %v695_v58 = vpop.f32.mrb[13].mxu0  ;;  %v894_v61 = vadd.f32 %v893_v53, %v892_v52  ;;  %v8676_v1 = vadd.f32 %v7441_v54, %v8575_v32 }
 0x103   : > { %v8672_v62 = vadd.f32 %v695_v58, %v8575_v32  ;;  %v7442_v63 = vpop.f32.mrb[14].mxu0 }
 0x104   : > { %v797_v3 = vadd.f32 %v796_v59, %v795_v56  ;;  %v698_v4 = vpop.f32.mrb[15].mxu0  ;;  %v896_v6 = vadd.f32 %v895_v0, %v894_v61  ;;  %v8687_v12 = vadd.f32 %v7442_v63, %v8575_v32  ;;  %v858_v17 = vmul.f32 %v8676_v1, %v8676_v1 }
 0x105   : > { %v798_v7 = vsel %vm774_vm2, %v8672_v62, 0.0  ;;  %v856_v8 = vmul.f32 %v8672_v62, %v8672_v62  ;;  %v8683_v9 = vadd.f32 %v698_v4, %v8575_v32  ;;  %v802_v19 = vsel %vm774_vm2, %v8676_v1, 0.0 }
 0x106   : > { %v799_v11 = vadd.f32 %v798_v7, %v797_v3  ;;  %v898_v13 = vadd.f32 %v897_v10, %v896_v6  ;;  %v859_v33 = vmul.f32 %v8687_v12, %v8687_v12  ;;  %v804_v38 = vsel %vm774_vm2, %v8687_v12, 0.0 }
 0x107   : > { %v899_v14 = vsel %vm774_vm2, %v856_v8, 0.0  ;;  %v800_v15 = vsel %vm774_vm2, %v8683_v9, 0.0  ;;  %v857_v16 = vmul.f32 %v8683_v9, %v8683_v9  ;;  %v903_v46 = vsel %vm774_vm2, %v858_v17, 0.0 }
 0x108   : > { %v801_v18 = vadd.f32 %v800_v15, %v799_v11  ;;  %v900_v21 = vadd.f32 %v899_v14, %v898_v13  ;;  %v905_v54 = vsel %vm774_vm2, %v859_v33, 0.0 }
 0x109   : > { %v901_v24 = vsel %vm774_vm2, %v857_v16, 0.0  ;;  %v7445_v28 = vpop.f32.mrb[16].mxu0 }
 0x10a   : > { %v803_v34 = vadd.f32 %v802_v19, %v801_v18  ;;  %v711_v37 = vpop.f32.mrb[17].mxu0  ;;  %v902_v42 = vadd.f32 %v901_v24, %v900_v21  ;;  %v8708_v47 = vadd.f32 %v7445_v28, %v8575_v32 }
 0x10b   : > { %v8704_v43 = vadd.f32 %v711_v37, %v8575_v32  ;;  %v7446_v45 = vpop.f32.mrb[18].mxu0 }
 0x10c   : > { %v805_v48 = vadd.f32 %v804_v38, %v803_v34  ;;  %v714_v49 = vpop.f32.mrb[19].mxu0  ;;  %v904_v50 = vadd.f32 %v903_v46, %v902_v42  ;;  %v8719_v56 = vadd.f32 %v7446_v45, %v8575_v32  ;;  %v862_v0 = vmul.f32 %v8708_v47, %v8708_v47 }
 0x10d   : > { %v806_v51 = vsel %vm774_vm2, %v8704_v43, 0.0  ;;  %v860_v52 = vmul.f32 %v8704_v43, %v8704_v43  ;;  %v8715_v53 = vadd.f32 %v714_v49, %v8575_v32  ;;  %v810_v4 = vsel %vm774_vm2, %v8708_v47, 0.0 }
 0x10e   : > { %v807_v55 = vadd.f32 %v806_v51, %v805_v48  ;;  %v906_v58 = vadd.f32 %v905_v54, %v904_v50  ;;  %v863_v10 = vmul.f32 %v8719_v56, %v8719_v56  ;;  %v812_v14 = vsel %vm774_vm2, %v8719_v56, 0.0 }
 0x10f   : > { %v907_v59 = vsel %vm774_vm2, %v860_v52, 0.0  ;;  %v808_v61 = vsel %vm774_vm2, %v8715_v53, 0.0  ;;  %v861_v63 = vmul.f32 %v8715_v53, %v8715_v53  ;;  %v911_v18 = vsel %vm774_vm2, %v862_v0, 0.0 }
 0x110   : > { %v809_v3 = vadd.f32 %v808_v61, %v807_v55  ;;  %v908_v6 = vadd.f32 %v907_v59, %v906_v58  ;;  %v913_v38 = vsel %vm774_vm2, %v863_v10, 0.0 }
 0x111   : > { %v909_v7 = vsel %vm774_vm2, %v861_v63, 0.0  ;;  %v7449_v8 = vpop.f32.mrb[20].mxu0 }
 0x112   : > { %v811_v11 = vadd.f32 %v810_v4, %v809_v3  ;;  %v727_v13 = vpop.f32.mrb[21].mxu0  ;;  %v910_v15 = vadd.f32 %v909_v7, %v908_v6  ;;  %v8740_v19 = vadd.f32 %v7449_v8, %v8575_v32 }
 0x113   : > { %v8736_v16 = vadd.f32 %v727_v13, %v8575_v32  ;;  %v7450_v17 = vpop.f32.mrb[22].mxu0 }
 0x114   : > { %v813_v21 = vadd.f32 %v812_v14, %v811_v11  ;;  %v730_v24 = vpop.f32.mrb[23].mxu0  ;;  %v912_v28 = vadd.f32 %v911_v18, %v910_v15  ;;  %v8751_v45 = vadd.f32 %v7450_v17, %v8575_v32  ;;  %v866_v51 = vmul.f32 %v8740_v19, %v8740_v19 }
 0x115   : > { %v814_v33 = vsel %vm774_vm2, %v8736_v16, 0.0  ;;  %v864_v34 = vmul.f32 %v8736_v16, %v8736_v16  ;;  %v8747_v37 = vadd.f32 %v730_v24, %v8575_v32  ;;  %v818_v54 = vsel %vm774_vm2, %v8740_v19, 0.0 }
 0x116   : > { %v815_v42 = vadd.f32 %v814_v33, %v813_v21  ;;  %v914_v46 = vadd.f32 %v913_v38, %v912_v28  ;;  %v867_v61 = vmul.f32 %v8751_v45, %v8751_v45  ;;  %v820_v3 = vsel %vm774_vm2, %v8751_v45, 0.0 }
 0x117   : > { %v915_v48 = vsel %vm774_vm2, %v864_v34, 0.0  ;;  %v816_v49 = vsel %vm774_vm2, %v8747_v37, 0.0  ;;  %v865_v50 = vmul.f32 %v8747_v37, %v8747_v37  ;;  %v919_v8 = vsel %vm774_vm2, %v866_v51, 0.0 }
 0x118   : > { %v817_v52 = vadd.f32 %v816_v49, %v815_v42  ;;  %v916_v55 = vadd.f32 %v915_v48, %v914_v46  ;;  %v921_v21 = vsel %vm774_vm2, %v867_v61, 0.0 }
 0x119   : > { %v917_v58 = vsel %vm774_vm2, %v865_v50, 0.0  ;;  %v7453_v59 = vpop.f32.mrb[24].mxu0 }
 0x11a   : > { %v819_v63 = vadd.f32 %v818_v54, %v817_v52  ;;  %v743_v0 = vpop.f32.mrb[25].mxu0  ;;  %v918_v4 = vadd.f32 %v917_v58, %v916_v55  ;;  %v8772_v10 = vadd.f32 %v7453_v59, %v8575_v32 }
 0x11b   : > { %v8768_v6 = vadd.f32 %v743_v0, %v8575_v32  ;;  %v7454_v7 = vpop.f32.mrb[26].mxu0 }
 0x11c   : > { %v821_v11 = vadd.f32 %v820_v3, %v819_v63  ;;  %v746_v13 = vpop.f32.mrb[27].mxu0  ;;  %v920_v14 = vadd.f32 %v919_v8, %v918_v4  ;;  %v8783_v28 = vadd.f32 %v7454_v7, %v8575_v32  ;;  %v870_v46 = vmul.f32 %v8772_v10, %v8772_v10 }
 0x11d   : > { %v822_v15 = vsel %vm774_vm2, %v8768_v6, 0.0  ;;  %v868_v17 = vmul.f32 %v8768_v6, %v8768_v6  ;;  %v8779_v18 = vadd.f32 %v746_v13, %v8575_v32  ;;  %v826_v49 = vsel %vm774_vm2, %v8772_v10, 0.0 }
 0x11e   : > { %v823_v24 = vadd.f32 %v822_v15, %v821_v11  ;;  %v922_v33 = vadd.f32 %v921_v21, %v920_v14  ;;  %v871_v54 = vmul.f32 %v8783_v28, %v8783_v28  ;;  %v828_v59 = vsel %vm774_vm2, %v8783_v28, 0.0 }
 0x11f   : > { %v923_v34 = vsel %vm774_vm2, %v868_v17, 0.0  ;;  %v824_v38 = vsel %vm774_vm2, %v8779_v18, 0.0  ;;  %v869_v42 = vmul.f32 %v8779_v18, %v8779_v18  ;;  %v927_v3 = vsel %vm774_vm2, %v870_v46, 0.0 }
 0x120   : > { %v825_v48 = vadd.f32 %v824_v38, %v823_v24  ;;  %v924_v50 = vadd.f32 %v923_v34, %v922_v33  ;;  %v929_v17 = vsel %vm774_vm2, %v871_v54, 0.0 }
 0x121   : > { %v925_v51 = vsel %vm774_vm2, %v869_v42, 0.0  ;;  %v7457_v52 = vpop.f32.mrb[28].mxu0 }
 0x122   : > { %v827_v55 = vadd.f32 %v826_v49, %v825_v48  ;;  %v759_v58 = vpop.f32.mrb[29].mxu0  ;;  %v926_v61 = vadd.f32 %v925_v51, %v924_v50  ;;  %v8804_v4 = vadd.f32 %v7457_v52, %v8575_v32 }
 0x123   : > { %v8800_v63 = vadd.f32 %v759_v58, %v8575_v32  ;;  %v7458_v0 = vpop.f32.mrb[30].mxu0 }
 0x124   : > { %v829_v7 = vadd.f32 %v828_v59, %v827_v55  ;;  %v762_v8 = vpop.f32.mrb[31].mxu0  ;;  %v928_v11 = vadd.f32 %v927_v3, %v926_v61  ;;  %v8815_v24 = vadd.f32 %v7458_v0, %v8575_v32  ;;  %v874_v46 = vmul.f32 %v8804_v4, %v8804_v4 }
 0x125   : > { %v830_v13 = vsel %vm774_vm2, %v8800_v63, 0.0  ;;  %v872_v14 = vmul.f32 %v8800_v63, %v8800_v63  ;;  %v8811_v15 = vadd.f32 %v762_v8, %v8575_v32  ;;  %v834_v49 = vsel %vm774_vm2, %v8804_v4, 0.0 }
 0x126   : > { %v831_v21 = vadd.f32 %v830_v13, %v829_v7  ;;  %v930_v33 = vadd.f32 %v929_v17, %v928_v11  ;;  %v875_v51 = vmul.f32 %v8815_v24, %v8815_v24  ;;  %v836_v54 = vsel %vm774_vm2, %v8815_v24, 0.0 }
 0x127   : > { %v931_v34 = vsel %vm774_vm2, %v872_v14, 0.0  ;;  %v832_v38 = vsel %vm774_vm2, %v8811_v15, 0.0  ;;  %v873_v42 = vmul.f32 %v8811_v15, %v8811_v15  ;;  %v935_v58 = vsel %vm774_vm2, %v874_v46, 0.0 }
 0x128   : > { %v833_v48 = vadd.f32 %v832_v38, %v831_v21  ;;  %v932_v50 = vadd.f32 %v931_v34, %v930_v33  ;;  %v937_v0 = vsel %vm774_vm2, %v875_v51, 0.0 }
 0x129   : > { %v933_v32 = vsel %vm774_vm2, %v873_v42, 0.0 }
 0x12a   : > { %v835_v52 = vadd.f32 %v834_v49, %v833_v48  ;;  %v934_v55 = vadd.f32 %v933_v32, %v932_v50  ;;  %v8416_v49 = vmov 0   ;;  %v8099_v50 = vld [vmem:[%s10008_s4 + $0x4] ss:$8 sps:$4 sm:$0xff]  }
 0x12b   : > { %1991 = vmatprep.subr.bf16.mxu1 %v8416_v49  ;;  %2023 = vmatprep.mubr.bf16.mxu1 %v8099_v50 }
 0x12c   : > { %v837_v59 = vadd.f32 %v836_v54, %v835_v52  ;;  %v936_v61 = vadd.f32 %v935_v58, %v934_v55 }
 0x12e   : > { %v838_v3 = vrot.slane %v837_v59, 4  ;;  %v938_v7 = vadd.f32 %v937_v0, %v936_v61 }
 0x130   : > { %v839_v8 = vadd.f32 %v838_v3, %v837_v59  ;;  %v939_v11 = vrot.slane %v938_v7, 4 }
 0x132   : > { %v840_v13 = vrot.slane %v839_v8, 2  ;;  %v940_v14 = vadd.f32 %v939_v11, %v938_v7 }
 0x134   : > { %v841_v17 = vadd.f32 %v840_v13, %v839_v8  ;;  %v941_v21 = vrot.slane %v940_v14, 2  ;;  %v1041_v13 = vsub.s32 1, %v8564_v29 }
 0x136   : > { %v842_v33 = vrot.slane %v841_v17, 1  ;;  %v942_v34 = vadd.f32 %v941_v21, %v940_v14 }
 0x138   : > { %v943_v38 = vrot.slane %v942_v34, 1  ;;  %v843_v42 = vadd.f32 %v842_v33, %v841_v17  ;;  %v1077_v17 = vsub.s32 2, %v8564_v29 }
 0x13a   : > { %v944_v48 = vadd.f32 %v943_v38, %v942_v34 }
 0x13c   : > { %v946_v46 = vsel %vm945_vm3, %v843_v42, %v944_v48 }
 0x13d   : > { %7468 = vmatmul.mubr.msk.f32.vlgmr.msra.gmra.mrb[32].mxu0 %vm774_vm2, %v946_v46 }
 0x210   : > { %v1016_v32 = vpop.f32.mrb[32].mxu0 }
 0x211   : > { %v1021_v51 = vmul.f32 0.001953125, %v1016_v32  ;;  %v7469_v52 = vpop.f32.mrb[33].mxu0 }
 0x213   : > { %v1022_v54 = vmul.f32 %v1021_v51, %v1021_v51 }
 0x215   : > { %v1024_v55 = vrot.slane %v1022_v54, 7 }
 0x217   : > { %v1026_v58 = vsub.f32 %v1021_v51, %v1024_v55 }
 0x219   : > { %v1027_v59 = vmax.f32 %v1026_v58, 0.0 }
 0x21b   : > { %v1028_v61 = vadd.f32 1e-05, %v1027_v59 }
 0x21d   : > { %8401 = vrsqrt.f32 %v1028_v61 }
 0x227   : > { %v8402_v0 = vpop.eup %8401 }
 0x228   : > { %v1030_v3 = vmul.f32 %v8402_v0, %v8570_v31 }
 0x22a   : > { %v1032_v7 = vrot.slane %v1030_v3, 1  ;;  %v8845_v21 = vrot.slane %v1030_v3, %v1041_v13 }
 0x22c   : > { %v1034_v8 = vmul.f32 %v1032_v7, %v1021_v51  ;;  %v1045_v34 = vmul.f32 %v8845_v21, %v8578_v35  ;;  %v1046_v38 = vmul.f32 %v8845_v21, %v8586_v40  ;;  %v1043_v48 = vmul.f32 %v8845_v21, %v8581_v36 }
 0x22d   : > { %v1044_v46 = vmul.f32 %v8845_v21, %v8589_v41  ;;  %v1047_v50 = vmul.f32 %v8845_v21, %v8609_v57  ;;  %v1048_v32 = vmul.f32 %v8845_v21, %v8620_v2  ;;  %v1049_v57 = vmul.f32 %v8845_v21, %v8612_v60 }
 0x22e   : > { %v1036_v11 = vrot.slane %v1034_v8, 6  ;;  %v1050_v2 = vmul.f32 %v8845_v21, %v8623_v5  ;;  %v1052_v60 = vmul.f32 %v8845_v21, %v8651_v39  ;;  %v1054_v39 = vmul.f32 %v8845_v21, %v8655_v44 }
 0x22f   : > { %v1056_v44 = vmul.f32 %v8845_v21, %v8683_v9  ;;  %v1058_v9 = vmul.f32 %v8845_v21, %v8687_v12  ;;  %v1060_v12 = vmul.f32 %v8845_v21, %v8715_v53  ;;  %v1062_v53 = vmul.f32 %v8845_v21, %v8719_v56 }
 0x230   : > { %v1038_v14 = vsub.f32 %v8570_v31, %v1036_v11  ;;  %v1064_v56 = vmul.f32 %v8845_v21, %v8747_v37  ;;  %v1066_v37 = vmul.f32 %v8845_v21, %v8751_v45  ;;  %v1068_v45 = vmul.f32 %v8845_v21, %v8779_v18 }
 0x231   : > { %v1070_v18 = vmul.f32 %v8845_v21, %v8783_v28  ;;  %v1072_v28 = vmul.f32 %v8845_v21, %v8811_v15  ;;  %v1074_v15 = vmul.f32 %v8845_v21, %v8815_v24 }
 0x232   : > { %v8849_v33 = vrot.slane %v1038_v14, %v1077_v17 }
 0x234   : > { %v1081_v42 = vadd.f32 %v8849_v33, %v1045_v34  ;;  %v1082_v31 = vadd.f32 %v8849_v33, %v1046_v38  ;;  %v1079_v35 = vadd.f32 %v8849_v33, %v1043_v48  ;;  %v1080_v40 = vadd.f32 %v8849_v33, %v1044_v46 }
 0x235   : > { %v1083_v51 = vadd.f32 %v8849_v33, %v1047_v50  ;;  %v1084_v52 = vadd.f32 %v8849_v33, %v1048_v32  ;;  %v1085_v61 = vadd.f32 %v8849_v33, %v1049_v57  ;;  %v1086_v0 = vadd.f32 %v8849_v33, %v1050_v2 }
 0x236   : > { %v1145_v54 = vmul.f32 0.2, %v1081_v42  ;;  %v1146_v55 = vmul.f32 0.2, %v1082_v31  ;;  %vm1111_vm4 = vcmp.ge.f32.partialorder %v1079_v35, 0.0  ;;  %vm1112_vm5 = vcmp.ge.f32.partialorder %v1080_v40, 0.0 }
 0x237   : > { %v1143_v36 = vmul.f32 0.2, %v1079_v35  ;;  %v1144_v41 = vmul.f32 0.2, %v1080_v40  ;;  %vm1113_vm6 = vcmp.ge.f32.partialorder %v1081_v42, 0.0  ;;  %vm1114_vm7 = vcmp.ge.f32.partialorder %v1082_v31, 0.0 }
 0x238   : > { %v1177_v7 = vsel %vm1113_vm6, %v1081_v42, %v1145_v54  ;;  %v1178_v8 = vsel %vm1114_vm7, %v1082_v31, %v1146_v55  ;;  %v1147_v11 = vmul.f32 0.2, %v1083_v51  ;;  %v1148_v14 = vmul.f32 0.2, %v1084_v52 }
 0x239   : > { %v1175_v58 = vsel %vm1111_vm4, %v1079_v35, %v1143_v36  ;;  %v1176_v59 = vsel %vm1112_vm5, %v1080_v40, %v1144_v41  ;;  %v1051_v34 = vmul.f32 %v8845_v21, %v8640_v20  ;;  %vm1115_vm8 = vcmp.ge.f32.partialorder %v1083_v51, 0.0 }
 0x23a   : > { %v1207_v3 = vpack.c.bf16 %v1176_v59, %v1175_v58  ;;  %vm1116_vm9 = vcmp.ge.f32.partialorder %v1084_v52, 0.0  ;;  %v1088_v38 = vadd.f32 %v8849_v33, %v1052_v60  ;;  %v1208_v48 = vpack.c.bf16 %v1178_v8, %v1177_v7 }
 0x23b   : > { %v1087_v5 = vadd.f32 %v8849_v33, %v1051_v34  ;;  %v1179_v42 = vsel %vm1115_vm8, %v1083_v51, %v1147_v11  ;;  %v1180_v31 = vsel %vm1116_vm9, %v1084_v52, %v1148_v14  ;;  %v1149_v46 = vmul.f32 0.2, %v1085_v61 }
 0x23c   : > { %1992 = vmatpush1.bf16.msra.mxu1 %v1207_v3  ;;  %v1150_v50 = vmul.f32 0.2, %v1086_v0  ;;  %v1053_v20 = vmul.f32 %v8845_v21, %v8644_v25  ;;  %vm1117_vm10 = vcmp.ge.f32.partialorder %v1085_v61, 0.0  ;;  %vm1118_vm11 = vcmp.ge.f32.partialorder %v1086_v0, 0.0 }
 0x23d   : > { %1993 = vmatprep.subr.bf16.mxu1 %v8416_v49  ;;  %v1090_v35 = vadd.f32 %v8849_v33, %v1054_v39  ;;  %v1209_v40 = vpack.c.bf16 %v1180_v31, %v1179_v42  ;;  %v1181_v51 = vsel %vm1117_vm10, %v1085_v61, %v1149_v46  ;;  %v1151_v54 = vmul.f32 0.2, %v1087_v5 }
 0x23e   : > { %v1089_v32 = vadd.f32 %v8849_v33, %v1053_v20  ;;  %v1182_v52 = vsel %vm1118_vm11, %v1086_v0, %v1150_v50  ;;  %v1152_v55 = vmul.f32 0.2, %v1088_v38  ;;  %v1055_v25 = vmul.f32 %v8845_v21, %v8672_v62 }
 0x23f   : > { %vm1119_vm12 = vcmp.ge.f32.partialorder %v1087_v5, 0.0  ;;  %vm1120_vm13 = vcmp.ge.f32.partialorder %v1088_v38, 0.0  ;;  %v1092_v41 = vadd.f32 %v8849_v33, %v1056_v44  ;;  %v1210_v57 = vpack.c.bf16 %v1182_v52, %v1181_v51 }
 0x240   : > { %1994 = vmatpush1.bf16.msra.mxu1 %v1208_v48  ;;  %v1091_v36 = vadd.f32 %v8849_v33, %v1055_v25  ;;  %v1183_v2 = vsel %vm1119_vm12, %v1087_v5, %v1151_v54  ;;  %v1184_v58 = vsel %vm1120_vm13, %v1088_v38, %v1152_v55  ;;  %v1153_v59 = vmul.f32 0.2, %v1089_v32 }
 0x241   : > { %1995 = vmatprep.subr.bf16.mxu1 %v8416_v49  ;;  %v1154_v61 = vmul.f32 0.2, %v1090_v35  ;;  %v1057_v62 = vmul.f32 %v8845_v21, %v8676_v1  ;;  %vm1121_vm14 = vcmp.ge.f32.partialorder %v1089_v32, 0.0  ;;  %vm1122_vm15 = vcmp.ge.f32.partialorder %v1090_v35, 0.0 }
 0x242   : > { %v1094_v3 = vadd.f32 %v8849_v33, %v1058_v9  ;;  %v1211_v7 = vpack.c.bf16 %v1184_v58, %v1183_v2  ;;  %v1185_v8 = vsel %vm1121_vm14, %v1089_v32, %v1153_v59  ;;  %v1155_v14 = vmul.f32 0.2, %v1091_v36 }
 0x243   : > { %v1093_v0 = vadd.f32 %v8849_v33, %v1057_v62  ;;  %v1186_v11 = vsel %vm1122_vm15, %v1090_v35, %v1154_v61  ;;  %v1156_v34 = vmul.f32 0.2, %v1092_v41  ;;  %v1059_v1 = vmul.f32 %v8845_v21, %v8704_v43 }
 0x244   : > { %1996 = vmatpush1.bf16.msra.mxu1 %v1209_v40  ;;  %vm1123_vm4 = vcmp.ge.f32.partialorder %v1091_v36, 0.0  ;;  %vm1124_vm5 = vcmp.ge.f32.partialorder %v1092_v41, 0.0  ;;  %v1096_v5 = vadd.f32 %v8849_v33, %v1060_v12  ;;  %v1212_v38 = vpack.c.bf16 %v1186_v11, %v1185_v8 }
 0x245   : > { %1997 = vmatprep.subr.bf16.mxu1 %v8416_v49  ;;  %v1095_v60 = vadd.f32 %v8849_v33, %v1059_v1  ;;  %v1187_v48 = vsel %vm1123_vm4, %v1091_v36, %v1155_v14  ;;  %v1188_v42 = vsel %vm1124_vm5, %v1092_v41, %v1156_v34  ;;  %v1157_v31 = vmul.f32 0.2, %v1093_v0 }
 0x246   : > { %v1158_v46 = vmul.f32 0.2, %v1094_v3  ;;  %v1061_v43 = vmul.f32 %v8845_v21, %v8708_v47  ;;  %vm1125_vm6 = vcmp.ge.f32.partialorder %v1093_v0, 0.0  ;;  %vm1126_vm7 = vcmp.ge.f32.partialorder %v1094_v3, 0.0 }
 0x247   : > { %v1098_v20 = vadd.f32 %v8849_v33, %v1062_v53  ;;  %v1213_v39 = vpack.c.bf16 %v1188_v42, %v1187_v48  ;;  %v1189_v32 = vsel %vm1125_vm6, %v1093_v0, %v1157_v31  ;;  %v1159_v40 = vmul.f32 0.2, %v1095_v60 }
 0x248   : > { %1998 = vmatpush1.bf16.msra.mxu1 %v1210_v57  ;;  %v1097_v50 = vadd.f32 %v8849_v33, %v1061_v43  ;;  %v1190_v35 = vsel %vm1126_vm7, %v1094_v3, %v1158_v46  ;;  %v1160_v51 = vmul.f32 0.2, %v1096_v5  ;;  %v1063_v47 = vmul.f32 %v8845_v21, %v8736_v16 }
 0x249   : > { %1999 = vmatprep.subr.bf16.mxu1 %v8416_v49  ;;  %vm1127_vm8 = vcmp.ge.f32.partialorder %v1095_v60, 0.0  ;;  %vm1128_vm9 = vcmp.ge.f32.partialorder %v1096_v5, 0.0  ;;  %v1100_v54 = vadd.f32 %v8849_v33, %v1064_v56  ;;  %v1214_v55 = vpack.c.bf16 %v1190_v35, %v1189_v32 }
 0x24a   : > { %v1099_v52 = vadd.f32 %v8849_v33, %v1063_v47  ;;  %v1191_v25 = vsel %vm1127_vm8, %v1095_v60, %v1159_v40  ;;  %v1192_v44 = vsel %vm1128_vm9, %v1096_v5, %v1160_v51  ;;  %v1161_v36 = vmul.f32 0.2, %v1097_v50 }
 0x24b   : > { %v1162_v41 = vmul.f32 0.2, %v1098_v20  ;;  %v1065_v16 = vmul.f32 %v8845_v21, %v8740_v19  ;;  %vm1129_vm10 = vcmp.ge.f32.partialorder %v1097_v50, 0.0  ;;  %vm1130_vm11 = vcmp.ge.f32.partialorder %v1098_v20, 0.0 }
 0x24c   : > { %2000 = vmatpush1.bf16.msra.mxu1 %v1211_v7  ;;  %v1102_v2 = vadd.f32 %v8849_v33, %v1066_v37  ;;  %v1215_v58 = vpack.c.bf16 %v1192_v44, %v1191_v25  ;;  %v1193_v59 = vsel %vm1129_vm10, %v1097_v50, %v1161_v36  ;;  %v1163_v62 = vmul.f32 0.2, %v1099_v52  ;;  %v8102_v37 = vld [vmem:[%s10008_s4 + $0x10] ss:$8 sps:$4 sm:$0xff]  }
 0x24d   : > { %2001 = vmatprep.subr.bf16.mxu1 %v8416_v49  ;;  %v1101_v57 = vadd.f32 %v8849_v33, %v1065_v16  ;;  %v1194_v61 = vsel %vm1130_vm11, %v1098_v20, %v1162_v41  ;;  %v1164_v9 = vmul.f32 0.2, %v1100_v54  ;;  %v1067_v19 = vmul.f32 %v8845_v21, %v8768_v6  ;;  %v8097_v41 = vld [vmem:[%s10008_s4] ss:$8 sps:$4 sm:$0xff]   ;;  %v8100_v16 = vld [vmem:[%s10008_s4 + $0x14] ss:$8 sps:$4 sm:$0xff]  }
 0x24e   : > { %vm1131_vm12 = vcmp.ge.f32.partialorder %v1099_v52, 0.0  ;;  %vm1132_vm13 = vcmp.ge.f32.partialorder %v1100_v54, 0.0  ;;  %v1104_v3 = vadd.f32 %v8849_v33, %v1068_v45  ;;  %v1216_v7 = vpack.c.bf16 %v1194_v61, %v1193_v59  ;;  %v8109_v59 = vld [vmem:[%s10008_s4 + $0x44] ss:$8 sps:$4 sm:$0xff]   ;;  %v8111_v61 = vld [vmem:[%s10008_s4 + $0x40] ss:$8 sps:$4 sm:$0xff]  }
 0x24f   : > { %v1103_v0 = vadd.f32 %v8849_v33, %v1067_v19  ;;  %v1195_v8 = vsel %vm1131_vm12, %v1099_v52, %v1163_v62  ;;  %v1196_v11 = vsel %vm1132_vm13, %v1100_v54, %v1164_v9  ;;  %v1165_v14 = vmul.f32 0.2, %v1101_v57  ;;  %v8112_v62 = vld [vmem:[%s10008_s4 + $0x54] ss:$8 sps:$4 sm:$0xff]   ;;  %v8114_v9 = vld [vmem:[%s10008_s4 + $0x50] ss:$8 sps:$4 sm:$0xff]  }
 0x250   : > { %2002 = vmatpush1.bf16.msra.mxu1 %v1212_v38  ;;  %v1166_v34 = vmul.f32 0.2, %v1102_v2  ;;  %v1069_v6 = vmul.f32 %v8845_v21, %v8772_v10  ;;  %vm1133_vm14 = vcmp.ge.f32.partialorder %v1101_v57, 0.0  ;;  %vm1134_vm15 = vcmp.ge.f32.partialorder %v1102_v2, 0.0  ;;  %v8115_v19 = vld [vmem:[%s10008_s4 + $0x64] ss:$8 sps:$4 sm:$0xff]  }
 0x251   : > { %2003 = vmatprep.subr.bf16.mxu1 %v8416_v49  ;;  %v1106_v12 = vadd.f32 %v8849_v33, %v1070_v18  ;;  %v1217_v60 = vpack.c.bf16 %v1196_v11, %v1195_v8  ;;  %v1197_v5 = vsel %vm1133_vm14, %v1101_v57, %v1165_v14  ;;  %v1167_v48 = vmul.f32 0.2, %v1103_v0  ;;  %v8105_v57 = vld [vmem:[%s10008_s4 + $0x20] ss:$8 sps:$4 sm:$0xff]   ;;  %v8124_v11 = vld [vmem:[%s10008_s4 + $0x94] ss:$8 sps:$4 sm:$0xff]  }
 0x252   : > { %v1105_v1 = vadd.f32 %v8849_v33, %v1069_v6  ;;  %v1198_v38 = vsel %vm1134_vm15, %v1102_v2, %v1166_v34  ;;  %v1168_v42 = vmul.f32 0.2, %v1104_v3  ;;  %v1071_v10 = vmul.f32 %v8845_v21, %v8800_v63  ;;  %v8106_v2 = vld [vmem:[%s10008_s4 + $0x34] ss:$8 sps:$4 sm:$0xff]   ;;  %v8117_v45 = vld [vmem:[%s10008_s4 + $0x60] ss:$8 sps:$4 sm:$0xff]  }
 0x253   : > { %vm1135_vm4 = vcmp.ge.f32.partialorder %v1103_v0, 0.0  ;;  %vm1136_vm5 = vcmp.ge.f32.partialorder %v1104_v3, 0.0  ;;  %v1108_v46 = vadd.f32 %v8849_v33, %v1072_v28  ;;  %v1218_v43 = vpack.c.bf16 %v1198_v38, %v1197_v5  ;;  %v8123_v8 = vld [vmem:[%s10008_s4 + $0x80] ss:$8 sps:$4 sm:$0xff]   ;;  %v8126_v14 = vld [vmem:[%s10008_s4 + $0x90] ss:$8 sps:$4 sm:$0xff]  }
 0x254   : > { %2004 = vmatpush1.bf16.msra.mxu1 %v1213_v39  ;;  %v1107_v31 = vadd.f32 %v8849_v33, %v1071_v10  ;;  %v1199_v53 = vsel %vm1135_vm4, %v1103_v0, %v1167_v48  ;;  %v1200_v50 = vsel %vm1136_vm5, %v1104_v3, %v1168_v42  ;;  %v1169_v20 = vmul.f32 0.2, %v1105_v1  ;;  %v8118_v0 = vld [vmem:[%s10008_s4 + $0x74] ss:$8 sps:$4 sm:$0xff]   ;;  %v8120_v3 = vld [vmem:[%s10008_s4 + $0x70] ss:$8 sps:$4 sm:$0xff]  }
 0x255   : > { %2005 = vmatprep.subr.bf16.mxu1 %v8416_v49  ;;  %v1170_v39 = vmul.f32 0.2, %v1106_v12  ;;  %v1073_v63 = vmul.f32 %v8845_v21, %v8804_v4  ;;  %vm1137_vm6 = vcmp.ge.f32.partialorder %v1105_v1, 0.0  ;;  %vm1138_vm7 = vcmp.ge.f32.partialorder %v1106_v12, 0.0  ;;  %v8127_v34 = vld [vmem:[%s10008_s4 + $0xa4] ss:$8 sps:$4 sm:$0xff]  }
 0x256   : > { %v1110_v35 = vadd.f32 %v8849_v33, %v1074_v15  ;;  %v1219_v40 = vpack.c.bf16 %v1200_v50, %v1199_v53  ;;  %v1201_v51 = vsel %vm1137_vm6, %v1105_v1, %v1169_v20  ;;  %v1171_v56 = vmul.f32 0.2, %v1107_v31  ;;  %v8129_v6 = vld [vmem:[%s10008_s4 + $0xa0] ss:$8 sps:$4 sm:$0xff]   ;;  %v8130_v18 = vld [vmem:[%s10008_s4 + $0xb4] ss:$8 sps:$4 sm:$0xff]  }
 0x257   : > { %v1109_v32 = vadd.f32 %v8849_v33, %v1073_v63  ;;  %v1202_v47 = vsel %vm1138_vm7, %v1106_v12, %v1170_v39  ;;  %v1172_v52 = vmul.f32 0.2, %v1108_v46  ;;  %vm1139_vm8 = vcmp.ge.f32.partialorder %v1107_v31, 0.0  ;;  %v8132_v1 = vld [vmem:[%s10008_s4 + $0xb0] ss:$8 sps:$4 sm:$0xff]  }
 0x258   : > { %2006 = vmatpush1.bf16.msra.mxu1 %v1214_v55  ;;  %vm1140_vm9 = vcmp.ge.f32.partialorder %v1108_v46, 0.0  ;;  %v1220_v4 = vpack.c.bf16 %v1202_v47, %v1201_v51  ;;  %v1203_v24 = vsel %vm1139_vm8, %v1107_v31, %v1171_v56  ;;  %v1174_v55 = vmul.f32 0.2, %v1110_v35  ;;  %v8133_v12 = vld [vmem:[%s10008_s4 + $0xc4] ss:$8 sps:$4 sm:$0xff]   ;;  %v8194_v53 = vld [vmem:[%s10009_s5 + $0x18] sm:$0xff]  }
 0x259   : > { %2007 = vmatprep.subr.bf16.mxu1 %v8416_v49  ;;  %v1204_v21 = vsel %vm1140_vm9, %v1108_v46, %v1172_v52  ;;  %v1173_v54 = vmul.f32 0.2, %v1109_v32  ;;  %vm1141_vm10 = vcmp.ge.f32.partialorder %v1109_v32, 0.0  ;;  %vm1142_vm11 = vcmp.ge.f32.partialorder %v1110_v35, 0.0  ;;  %v8136_v5 = vld [vmem:[%s10008_s4 + $0xd4] ss:$8 sps:$4 sm:$0xff]  }
 0x25a   : > { %v1221_v33 = vpack.c.bf16 %v1204_v21, %v1203_v24  ;;  %v1206_v44 = vsel %vm1142_vm11, %v1110_v35, %v1174_v55  ;;  %v8138_v38 = vld [vmem:[%s10008_s4 + $0xd0] ss:$8 sps:$4 sm:$0xff]   ;;  %v8139_v48 = vld [vmem:[%s10008_s4 + $0xe4] ss:$8 sps:$4 sm:$0xff]   ;;  %v8141_v42 = vld [vmem:[%s10008_s4 + $0xe0] ss:$8 sps:$4 sm:$0xff]  }
 0x25b   : > { %v1205_v25 = vsel %vm1141_vm10, %v1109_v32, %v1173_v54  ;;  %v8142_v10 = vld [vmem:[%s10008_s4 + $0xf4] ss:$8 sps:$4 sm:$0xff]   ;;  %v8144_v28 = vld [vmem:[%s10008_s4 + $0xf0] ss:$8 sps:$4 sm:$0xff]   ;;  %v8145_v31 = vld [vmem:[%s10008_s4 + $0x104] ss:$8 sps:$4 sm:$0xff]  }
 0x25c   : > { %2008 = vmatpush1.bf16.msra.mxu1 %v1215_v58  ;;  %v1222_v36 = vpack.c.bf16 %v1206_v44, %v1205_v25  ;;  %v8108_v58 = vld [vmem:[%s10008_s4 + $0x30] ss:$8 sps:$4 sm:$0xff]   ;;  %v8148_v50 = vld [vmem:[%s10008_s4 + $0x114] ss:$8 sps:$4 sm:$0xff]   ;;  %v8151_v39 = vld [vmem:[%s10008_s4 + $0x124] ss:$8 sps:$4 sm:$0xff]  }
 0x25d   : > { %2009 = vmatprep.subr.bf16.mxu1 %v8416_v49  ;;  %v8193_v46 = vld [vmem:[%s10009_s5 + $0x10] sm:$0xff]   ;;  %v8153_v63 = vld [vmem:[%s10008_s4 + $0x120] ss:$8 sps:$4 sm:$0xff]   ;;  %v8163_v52 = vld [vmem:[%s10008_s4 + $0x164] ss:$8 sps:$4 sm:$0xff]  }
 0x25e   : > { %7470 = vmatprep.subr.bf16.mxu0 %v8193_v46  ;;  %v8150_v20 = vld [vmem:[%s10008_s4 + $0x110] ss:$8 sps:$4 sm:$0xff]   ;;  %v8154_v15 = vld [vmem:[%s10008_s4 + $0x134] ss:$8 sps:$4 sm:$0xff]   ;;  %v9085_v32 = vld [vmem:[%s10009_s5] sm:$0xff]  }
 0x25f   : > { %7471 = vmatpush3.bf16.msra.mxu0 %v8193_v46  ;;  %v8156_v35 = vld [vmem:[%s10008_s4 + $0x130] ss:$8 sps:$4 sm:$0xff]   ;;  %v8159_v51 = vld [vmem:[%s10008_s4 + $0x140] ss:$8 sps:$4 sm:$0xff]   ;;  %v8160_v47 = vld [vmem:[%s10008_s4 + $0x154] ss:$8 sps:$4 sm:$0xff]  }
 0x260   : > { %2010 = vmatpush1.bf16.msra.mxu1 %v1216_v7  ;;  %v8121_v7 = vld [vmem:[%s10008_s4 + $0x84] ss:$8 sps:$4 sm:$0xff]   ;;  %7472 = vmatprep.subr.bf16.mxu0 %v8194_v53  ;;  %v8162_v56 = vld [vmem:[%s10008_s4 + $0x150] ss:$8 sps:$4 sm:$0xff]   ;;  %v8166_v24 = vld [vmem:[%s10008_s4 + $0x174] ss:$8 sps:$4 sm:$0xff]  }
 0x261   : > { %2011 = vmatprep.subr.bf16.mxu1 %v8416_v49  ;;  %v8168_v21 = vld [vmem:[%s10008_s4 + $0x170] ss:$8 sps:$4 sm:$0xff]   ;;  %v8169_v54 = vld [vmem:[%s10008_s4 + $0x184] ss:$8 sps:$4 sm:$0xff]   ;;  %v8171_v55 = vld [vmem:[%s10008_s4 + $0x180] ss:$8 sps:$4 sm:$0xff]  }
 0x262   : > { %v8174_v25 = vld [vmem:[%s10008_s4 + $0x190] ss:$8 sps:$4 sm:$0xff]   ;;  %v8175_v44 = vld [vmem:[%s10008_s4 + $0x1a4] ss:$8 sps:$4 sm:$0xff]  }
 0x263   : > { %7473 = vmatpush3.bf16.msra.mxu0 %v8194_v53 }
 0x264   : > { %2012 = vmatpush1.bf16.msra.mxu1 %v1217_v60  ;;  %v8135_v60 = vld [vmem:[%s10008_s4 + $0xc0] ss:$8 sps:$4 sm:$0xff]   ;;  %7482 = vmatprep.subr.bf16.mxu0 %v9085_v32 }
 0x265   : > { %2013 = vmatprep.subr.bf16.mxu1 %v8416_v49 }
 0x268   : > { %2014 = vmatpush1.bf16.msra.mxu1 %v1218_v43  ;;  %v8147_v43 = vld [vmem:[%s10008_s4 + $0x100] ss:$8 sps:$4 sm:$0xff]  }
 0x269   : > { %2015 = vmatprep.subr.bf16.mxu1 %v8416_v49 }
 0x26c   : > { %2016 = vmatpush1.bf16.msra.mxu1 %v1219_v40  ;;  %v8157_v40 = vld [vmem:[%s10008_s4 + $0x144] ss:$8 sps:$4 sm:$0xff]  }
 0x26d   : > { %2017 = vmatprep.subr.bf16.mxu1 %v8416_v49 }
 0x270   : > { %2018 = vmatpush1.bf16.msra.mxu1 %v1220_v4  ;;  %v8165_v4 = vld [vmem:[%s10008_s4 + $0x160] ss:$8 sps:$4 sm:$0xff]  }
 0x271   : > { %2019 = vmatprep.subr.bf16.mxu1 %v8416_v49 }
 0x274   : > { %2020 = vmatpush1.bf16.msra.mxu1 %v1221_v33  ;;  %v8172_v33 = vld [vmem:[%s10008_s4 + $0x194] ss:$8 sps:$4 sm:$0xff]  }
 0x275   : > { %2021 = vmatprep.subr.bf16.mxu1 %v8416_v49  ;;  %v8103_v49 = vld [vmem:[%s10008_s4 + $0x24] ss:$8 sps:$4 sm:$0xff]  }
 0x278   : > { %2022 = vmatpush1.bf16.msra.mxu1 %v1222_v36  ;;  %v8177_v36 = vld [vmem:[%s10008_s4 + $0x1a0] ss:$8 sps:$4 sm:$0xff]  }
 0x27b   : > { %2024 = vmatmul.mubr.bf16.vlgmr.msra.gmra.mrb[0].mxu1 %v8097_v41  ;;  %v8178_v41 = vld [vmem:[%s10008_s4 + $0x1b4] ss:$8 sps:$4 sm:$0xff]  }
 0x27c   : > { %2031 = vmatprep.mubr.bf16.mxu1 %v8100_v16 }
 0x283   : > { %2032 = vmatmul.mubr.bf16.gmra.mrb[4].mxu1 %v8102_v37 }
 0x284   : > { %2039 = vmatprep.mubr.bf16.mxu1 %v8103_v49  ;;  %v8180_v49 = vld [vmem:[%s10008_s4 + $0x1b0] ss:$8 sps:$4 sm:$0xff]  }
 0x28b   : > { %2040 = vmatmul.mubr.bf16.gmra.mrb[8].mxu1 %v8105_v57 }
 0x28c   : > { %2047 = vmatprep.mubr.bf16.mxu1 %v8106_v2  ;;  %v8181_v2 = vld [vmem:[%s10008_s4 + $0x1c4] ss:$8 sps:$4 sm:$0xff]  }
 0x293   : > { %2048 = vmatmul.mubr.bf16.gmra.mrb[12].mxu1 %v8108_v58 }
 0x294   : > { %2055 = vmatprep.mubr.bf16.mxu1 %v8109_v59 }
 0x29b   : > { %2056 = vmatmul.mubr.bf16.gmra.mrb[16].mxu1 %v8111_v61 }
 0x29c   : > { %2063 = vmatprep.mubr.bf16.mxu1 %v8112_v62 }
 0x2a3   : > { %2064 = vmatmul.mubr.bf16.gmra.mrb[20].mxu1 %v8114_v9  ;;  %v8183_v9 = vld [vmem:[%s10008_s4 + $0x1c0] ss:$8 sps:$4 sm:$0xff]  }
 0x2a4   : > { %2071 = vmatprep.mubr.bf16.mxu1 %v8115_v19 }
 0x2ab   : > { %2072 = vmatmul.mubr.bf16.gmra.mrb[24].mxu1 %v8117_v45  ;;  %v8184_v45 = vld [vmem:[%s10008_s4 + $0x1d4] ss:$8 sps:$4 sm:$0xff]  }
 0x2ac   : > { %2079 = vmatprep.mubr.bf16.mxu1 %v8118_v0 }
 0x2b3   : > { %2080 = vmatmul.mubr.bf16.gmra.mrb[28].mxu1 %v8120_v3 }
 0x2b4   : > { %2087 = vmatprep.mubr.bf16.mxu1 %v8121_v7 }
 0x2bb   : > { %2088 = vmatmul.mubr.bf16.gmra.mrb[32].mxu1 %v8123_v8 }
 0x2bc   : > { %2095 = vmatprep.mubr.bf16.mxu1 %v8124_v11  ;;  %v8186_v11 = vld [vmem:[%s10008_s4 + $0x1d0] ss:$8 sps:$4 sm:$0xff]  }
 0x2c3   : > { %2096 = vmatmul.mubr.bf16.gmra.mrb[36].mxu1 %v8126_v14 }
 0x2c4   : > { %2103 = vmatprep.mubr.bf16.mxu1 %v8127_v34  ;;  %v8187_v34 = vld [vmem:[%s10008_s4 + $0x1e4] ss:$8 sps:$4 sm:$0xff]  }
 0x2cb   : > { %2104 = vmatmul.mubr.bf16.gmra.mrb[40].mxu1 %v8129_v6 }
 0x2cc   : > { %2111 = vmatprep.mubr.bf16.mxu1 %v8130_v18 }
 0x2d3   : > { %2112 = vmatmul.mubr.bf16.gmra.mrb[44].mxu1 %v8132_v1 }
 0x2d4   : > { %2119 = vmatprep.mubr.bf16.mxu1 %v8133_v12 }
 0x2db   : > { %2120 = vmatmul.mubr.bf16.gmra.mrb[48].mxu1 %v8135_v60  ;;  %v8189_v60 = vld [vmem:[%s10008_s4 + $0x1e0] ss:$8 sps:$4 sm:$0xff]  }
 0x2dc   : > { %2127 = vmatprep.mubr.bf16.mxu1 %v8136_v5 }
 0x2e3   : > { %2128 = vmatmul.mubr.bf16.gmra.mrb[52].mxu1 %v8138_v38  ;;  %v8190_v38 = vld [vmem:[%s10008_s4 + $0x1f4] ss:$8 sps:$4 sm:$0xff]  }
 0x2e4   : > { %2135 = vmatprep.mubr.bf16.mxu1 %v8139_v48 }
 0x2eb   : > { %2136 = vmatmul.mubr.bf16.gmra.mrb[56].mxu1 %v8141_v42 }
 0x2ec   : > { %2143 = vmatprep.mubr.bf16.mxu1 %v8142_v10 }
 0x2f3   : > { %2144 = vmatmul.mubr.bf16.gmra.mrb[60].mxu1 %v8144_v28 }
 0x2f4   : > { %2151 = vmatprep.mubr.bf16.mxu1 %v8145_v31  ;;  %v8192_v31 = vld [vmem:[%s10008_s4 + $0x1f0] ss:$8 sps:$4 sm:$0xff]  }
 0x2fb   : > { %2152 = vmatmul.mubr.bf16.gmra.mrb[64].mxu1 %v8147_v43  ;;  %v8195_v43 = vld [vmem:[%s10008_s4 + $0x204] ss:$8 sps:$4 sm:$0xff]  }
 0x2fc   : > { %2159 = vmatprep.mubr.bf16.mxu1 %v8148_v50 }
 0x303   : > { %2160 = vmatmul.mubr.bf16.gmra.mrb[68].mxu1 %v8150_v20 }
 0x304   : > { %2167 = vmatprep.mubr.bf16.mxu1 %v8151_v39 }
 0x30b   : > { %2168 = vmatmul.mubr.bf16.gmra.mrb[72].mxu1 %v8153_v63  ;;  %v8197_v63 = vld [vmem:[%s10008_s4 + $0x200] ss:$8 sps:$4 sm:$0xff]  }
 0x30c   : > { %2175 = vmatprep.mubr.bf16.mxu1 %v8154_v15 }
 0x313   : > { %2176 = vmatmul.mubr.bf16.gmra.mrb[76].mxu1 %v8156_v35  ;;  %v8198_v35 = vld [vmem:[%s10008_s4 + $0x214] ss:$8 sps:$4 sm:$0xff]  }
 0x314   : > { %2183 = vmatprep.mubr.bf16.mxu1 %v8157_v40 }
 0x31b   : > { %2184 = vmatmul.mubr.bf16.gmra.mrb[80].mxu1 %v8159_v51 }
 0x31c   : > { %2191 = vmatprep.mubr.bf16.mxu1 %v8160_v47  ;;  %v8205_v47 = vld [vmem:[%s10009_s5 + $0x8] sm:$0xff]  }
 0x323   : > { %2192 = vmatmul.mubr.bf16.gmra.mrb[84].mxu1 %v8162_v56  ;;  %v8212_v56 = vld [vmem:[%s10009_s5 + $0x20] sm:$0xff]  }
 0x324   : > { %2199 = vmatprep.mubr.bf16.mxu1 %v8163_v52 }
 0x32b   : > { %2200 = vmatmul.mubr.bf16.gmra.mrb[88].mxu1 %v8165_v4 }
 0x32c   : > { %2207 = vmatprep.mubr.bf16.mxu1 %v8166_v24  ;;  %v8200_v24 = vld [vmem:[%s10008_s4 + $0x210] ss:$8 sps:$4 sm:$0xff]  }
 0x333   : > { %2208 = vmatmul.mubr.bf16.gmra.mrb[92].mxu1 %v8168_v21 }
 0x334   : > { %2215 = vmatprep.mubr.bf16.mxu1 %v8169_v54  ;;  %v8201_v54 = vld [vmem:[%s10008_s4 + $0x224] ss:$8 sps:$4 sm:$0xff]  }
 0x33b   : > { %2216 = vmatmul.mubr.bf16.gmra.mrb[96].mxu1 %v8171_v55 }
 0x33c   : > { %2223 = vmatprep.mubr.bf16.mxu1 %v8172_v33 }
 0x343   : > { %2224 = vmatmul.mubr.bf16.gmra.mrb[100].mxu1 %v8174_v25 }
 0x344   : > { %2231 = vmatprep.mubr.bf16.mxu1 %v8175_v44  ;;  %v8203_v44 = vld [vmem:[%s10008_s4 + $0x220] ss:$8 sps:$4 sm:$0xff]  }
 0x34b   : > { %2232 = vmatmul.mubr.bf16.gmra.mrb[104].mxu1 %v8177_v36 }
 0x34c   : > { %2239 = vmatprep.mubr.bf16.mxu1 %v8178_v41  ;;  %v8206_v41 = vld [vmem:[%s10008_s4 + $0x234] ss:$8 sps:$4 sm:$0xff]  }
 0x34e   : > { %v9136_v16 = vpop.f32.mrb[0].mxu1 }
 0x34f   : > { %v2027_v37 = vpop.f32.mrb[1].mxu1 }
 0x350   : > { %v9141_v57 = vpop.f32.mrb[2].mxu1 }
 0x351   : > { %v2536_v58 = vpack.c.bf16 %v9141_v57, %v9136_v16  ;;  %v2030_v59 = vpop.f32.mrb[3].mxu1  ;;  %v8213_v16 = vld [vmem:[%s10009_s5 + $0x28] sm:$0xff]  }
 0x353   : > { %2240 = vmatmul.mubr.bf16.gmra.mrb[108].mxu1 %v8180_v49 }
 0x354   : > { %2247 = vmatprep.mubr.bf16.mxu1 %v8181_v2 }
 0x356   : > { %v9148_v61 = vpop.f32.mrb[4].mxu1 }
 0x357   : > { %v2035_v62 = vpop.f32.mrb[5].mxu1 }
 0x358   : > { %v9153_v19 = vpop.f32.mrb[6].mxu1  ;;  %v8208_v62 = vld [vmem:[%s10008_s4 + $0x230] ss:$8 sps:$4 sm:$0xff]  }
 0x359   : > { %v2537_v0 = vpack.c.bf16 %v9153_v19, %v9148_v61  ;;  %v2038_v3 = vpop.f32.mrb[7].mxu1  ;;  %v8211_v61 = vld [vmem:[%s10008_s4 + $0x240] ss:$8 sps:$4 sm:$0xff]  }
 0x35b   : > { %2248 = vmatmul.mubr.bf16.gmra.mrb[112].mxu1 %v8183_v9 }
 0x35c   : > { %2255 = vmatprep.mubr.bf16.mxu1 %v8184_v45  ;;  %v8209_v45 = vld [vmem:[%s10008_s4 + $0x244] ss:$8 sps:$4 sm:$0xff]  }
 0x35e   : > { %v9160_v7 = vpop.f32.mrb[8].mxu1 }
 0x35f   : > { %v2043_v8 = vpop.f32.mrb[9].mxu1 }
 0x360   : > { %v9165_v14 = vpop.f32.mrb[10].mxu1 }
 0x361   : > { %v2538_v6 = vpack.c.bf16 %v9165_v14, %v9160_v7  ;;  %v2046_v18 = vpop.f32.mrb[11].mxu1 }
 0x362   : > { %v8216_v18 = vld [vmem:[%s10008_s4 + $0x250] ss:$8 sps:$4 sm:$0xff]  }
 0x363   : > { %2256 = vmatmul.mubr.bf16.gmra.mrb[116].mxu1 %v8186_v11 }
 0x364   : > { %2263 = vmatprep.mubr.bf16.mxu1 %v8187_v34 }
 0x366   : > { %v9172_v1 = vpop.f32.mrb[12].mxu1 }
 0x367   : > { %v2051_v12 = vpop.f32.mrb[13].mxu1 }
 0x368   : > { %v9177_v5 = vpop.f32.mrb[14].mxu1 }
 0x369   : > { %v2539_v48 = vpack.c.bf16 %v9177_v5, %v9172_v1  ;;  %v2054_v42 = vpop.f32.mrb[15].mxu1  ;;  %v8224_v1 = vld [vmem:[%s10009_s5 + $0x38] sm:$0xff]  }
 0x36b   : > { %2264 = vmatmul.mubr.bf16.gmra.mrb[120].mxu1 %v8189_v60  ;;  %v8217_v60 = vld [vmem:[%s10008_s4 + $0x264] ss:$8 sps:$4 sm:$0xff]  }
 0x36c   : > { %2271 = vmatprep.mubr.bf16.mxu1 %v8190_v38 }
 0x36e   : > { %v2057_v10 = vpop.f32.mrb[16].mxu1 }
 0x36f   : > { %v2059_v28 = vpop.f32.mrb[17].mxu1 }
 0x370   : > { %v2060_v46 = vpop.f32.mrb[18].mxu1  ;;  %v8219_v28 = vld [vmem:[%s10008_s4 + $0x260] ss:$8 sps:$4 sm:$0xff]  }
 0x371   : > { %v2540_v53 = vpack.c.bf16 %v2060_v46, %v2057_v10  ;;  %v2062_v50 = vpop.f32.mrb[19].mxu1  ;;  %v8220_v46 = vld [vmem:[%s10008_s4 + $0x274] ss:$8 sps:$4 sm:$0xff]  }
 0x373   : > { %2272 = vmatmul.mubr.bf16.gmra.mrb[124].mxu1 %v8192_v31  ;;  %7474 = vmatprep.mubr.msk.bf16.mxu0 %vm774_vm2, %v2540_v53 }
 0x374   : > { %2279 = vmatprep.mubr.bf16.mxu1 %v8195_v43 }
 0x376   : > { %v2065_v20 = vpop.f32.mrb[20].mxu1 }
 0x377   : > { %v2067_v39 = vpop.f32.mrb[21].mxu1 }
 0x378   : > { %v2068_v15 = vpop.f32.mrb[22].mxu1  ;;  %v8222_v39 = vld [vmem:[%s10008_s4 + $0x270] ss:$8 sps:$4 sm:$0xff]  }
 0x379   : > { %v2541_v40 = vpack.c.bf16 %v2068_v15, %v2065_v20  ;;  %v2070_v51 = vpop.f32.mrb[23].mxu1  ;;  %v8225_v15 = vld [vmem:[%s10008_s4 + $0x284] ss:$8 sps:$4 sm:$0xff]  }
 0x37b   : > { %2280 = vmatmul.mubr.bf16.gmra.mrb[128].mxu1 %v8197_v63  ;;  %7475 = vmatmul.mubr.msk.bf16.vlgmr.msra.gmra.mrb[36].mxu0 %vm774_vm2, %v2541_v40 }
 0x37c   : > { %2287 = vmatprep.mubr.bf16.mxu1 %v8198_v35  ;;  %7483 = vmatpush3.bf16.msra.mxu0 %v9085_v32 }
 0x37d   : > { %7484 = vmatprep.subr.bf16.mxu0 %v8205_v47 }
 0x37e   : > { %v2073_v52 = vpop.f32.mrb[24].mxu1 }
 0x37f   : > { %v2075_v4 = vpop.f32.mrb[25].mxu1 }
 0x380   : > { %v2076_v21 = vpop.f32.mrb[26].mxu1  ;;  %7485 = vmatpush3.bf16.msra.mxu0 %v8205_v47  ;;  %v8228_v4 = vld [vmem:[%s10008_s4 + $0x294] ss:$8 sps:$4 sm:$0xff]  }
 0x381   : > { %v2542_v55 = vpack.c.bf16 %v2076_v21, %v2073_v52  ;;  %v2078_v33 = vpop.f32.mrb[27].mxu1  ;;  %7494 = vmatprep.subr.bf16.mxu0 %v8212_v56 }
 0x383   : > { %2288 = vmatmul.mubr.bf16.gmra.mrb[132].mxu1 %v8200_v24  ;;  %7478 = vmatprep.mubr.msk.bf16.mxu0 %vm774_vm2, %v2542_v55  ;;  %v8251_v55 = vld [vmem:[%s10009_s5 + $0x50] sm:$0xff]  }
 0x384   : > { %2295 = vmatprep.mubr.bf16.mxu1 %v8201_v54  ;;  %v8238_v54 = vld [vmem:[%s10009_s5 + $0x48] sm:$0xff]  }
 0x386   : > { %v2081_v32 = vpop.f32.mrb[28].mxu1 }
 0x387   : > { %v2083_v25 = vpop.f32.mrb[29].mxu1 }
 0x388   : > { %v2084_v36 = vpop.f32.mrb[30].mxu1  ;;  %v8230_v25 = vld [vmem:[%s10008_s4 + $0x290] ss:$8 sps:$4 sm:$0xff]  }
 0x389   : > { %v2543_v37 = vpack.c.bf16 %v2084_v36, %v2081_v32  ;;  %v2086_v49 = vpop.f32.mrb[31].mxu1  ;;  %v8231_v36 = vld [vmem:[%s10008_s4 + $0x2a4] ss:$8 sps:$4 sm:$0xff]  }
 0x38b   : > { %2296 = vmatmul.mubr.bf16.gmra.mrb[136].mxu1 %v8203_v44  ;;  %7479 = vmatmul.mubr.msk.bf16.gmra.mrb[40].mxu0 %vm774_vm2, %v2543_v37 }
 0x38c   : > { %7486 = vmatprep.mubr.msk.bf16.mxu0 %vm774_vm2, %v2536_v58  ;;  %2303 = vmatprep.mubr.bf16.mxu1 %v8206_v41  ;;  %v8223_v58 = vld [vmem:[%s10009_s5 + $0x30] sm:$0xff]  }
 0x38e   : > { %v2089_v2 = vpop.f32.mrb[32].mxu1 }
 0x38f   : > { %v2091_v59 = vpop.f32.mrb[33].mxu1 }
 0x390   : > { %v2092_v9 = vpop.f32.mrb[34].mxu1  ;;  %v8233_v59 = vld [vmem:[%s10008_s4 + $0x2a0] ss:$8 sps:$4 sm:$0xff]  }
 0x391   : > { %v2544_v3 = vpack.c.bf16 %v2092_v9, %v2089_v2  ;;  %v2094_v8 = vpop.f32.mrb[35].mxu1  ;;  %v8234_v9 = vld [vmem:[%s10008_s4 + $0x2b4] ss:$8 sps:$4 sm:$0xff]  }
 0x393   : > { %2304 = vmatmul.mubr.bf16.gmra.mrb[140].mxu1 %v8208_v62  ;;  %7487 = vmatmul.mubr.msk.bf16.vlgmr.msra.gmra.mrb[36].mxu0 %vm774_vm2, %v2537_v0  ;;  %v8214_v0 = vld [vmem:[%s10008_s4 + $0x254] ss:$8 sps:$4 sm:$0xff]  }
 0x394   : > { %7490 = vmatprep.mubr.msk.bf16.mxu0 %vm774_vm2, %v2538_v6  ;;  %2311 = vmatprep.mubr.bf16.mxu1 %v8209_v45 }
 0x395   : > { %7495 = vmatpush3.bf16.msra.mxu0 %v8212_v56  ;;  %v8227_v56 = vld [vmem:[%s10008_s4 + $0x280] ss:$8 sps:$4 sm:$0xff]  }
 0x396   : > { %v2097_v57 = vpop.f32.mrb[36].mxu1  ;;  %7496 = vmatprep.subr.bf16.mxu0 %v8213_v16 }
 0x397   : > { %v2099_v11 = vpop.f32.mrb[37].mxu1 }
 0x398   : > { %v2100_v19 = vpop.f32.mrb[38].mxu1  ;;  %v8239_v11 = vld [vmem:[%s10008_s4 + $0x2c4] ss:$8 sps:$4 sm:$0xff]  }
 0x399   : > { %v2545_v7 = vpack.c.bf16 %v2100_v19, %v2097_v57  ;;  %v2102_v14 = vpop.f32.mrb[39].mxu1  ;;  %7497 = vmatpush3.bf16.msra.mxu0 %v8213_v16  ;;  %v8236_v57 = vld [vmem:[%s10008_s4 + $0x2b0] ss:$8 sps:$4 sm:$0xff]  }
 0x39a   : > { %7506 = vmatprep.subr.bf16.mxu0 %v8223_v58  ;;  %v8241_v14 = vld [vmem:[%s10008_s4 + $0x2c0] ss:$8 sps:$4 sm:$0xff]  }
 0x39b   : > { %2312 = vmatmul.mubr.bf16.gmra.mrb[144].mxu1 %v8211_v61  ;;  %7491 = vmatmul.mubr.msk.bf16.gmra.mrb[40].mxu0 %vm774_vm2, %v2539_v48  ;;  %v8237_v48 = vld [vmem:[%s10009_s5 + $0x40] sm:$0xff]  }
 0x39c   : > { %7498 = vmatprep.mubr.msk.bf16.mxu0 %vm774_vm2, %v2544_v3  ;;  %2319 = vmatprep.mubr.bf16.mxu1 %v8214_v0 }
 0x39e   : > { %v2105_v34 = vpop.f32.mrb[40].mxu1 }
 0x39f   : > { %v2107_v6 = vpop.f32.mrb[41].mxu1 }
 0x3a0   : > { %v2108_v12 = vpop.f32.mrb[42].mxu1  ;;  %v8242_v6 = vld [vmem:[%s10008_s4 + $0x2d4] ss:$8 sps:$4 sm:$0xff]  }
 0x3a1   : > { %v2546_v38 = vpack.c.bf16 %v2108_v12, %v2105_v34  ;;  %v2110_v42 = vpop.f32.mrb[43].mxu1 }
 0x3a3   : > { %2320 = vmatmul.mubr.bf16.gmra.mrb[148].mxu1 %v8216_v18  ;;  %7499 = vmatmul.mubr.msk.bf16.vlgmr.msra.gmra.mrb[36].mxu0 %vm774_vm2, %v2545_v7 }
 0x3a4   : > { %7502 = vmatprep.mubr.msk.bf16.mxu0 %vm774_vm2, %v2546_v38  ;;  %2327 = vmatprep.mubr.bf16.mxu1 %v8217_v60  ;;  %v8252_v60 = vld [vmem:[%s10009_s5 + $0x58] sm:$0xff]   ;;  %v8265_v38 = vld [vmem:[%s10009_s5 + $0x60] sm:$0xff]  }
 0x3a5   : > { %7507 = vmatpush3.bf16.msra.mxu0 %v8223_v58 }
 0x3a6   : > { %v2113_v5 = vpop.f32.mrb[44].mxu1  ;;  %7508 = vmatprep.subr.bf16.mxu0 %v8224_v1 }
 0x3a7   : > { %v2115_v10 = vpop.f32.mrb[45].mxu1 }
 0x3a8   : > { %v2116_v31 = vpop.f32.mrb[46].mxu1  ;;  %v8245_v10 = vld [vmem:[%s10008_s4 + $0x2e4] ss:$8 sps:$4 sm:$0xff]  }
 0x3a9   : > { %v2547_v43 = vpack.c.bf16 %v2116_v31, %v2113_v5  ;;  %v2118_v53 = vpop.f32.mrb[47].mxu1  ;;  %7509 = vmatpush3.bf16.msra.mxu0 %v8224_v1  ;;  %v8244_v5 = vld [vmem:[%s10008_s4 + $0x2d0] ss:$8 sps:$4 sm:$0xff]  }
 0x3aa   : > { %7518 = vmatprep.subr.bf16.mxu0 %v8237_v48  ;;  %v8247_v53 = vld [vmem:[%s10008_s4 + $0x2e0] ss:$8 sps:$4 sm:$0xff]  }
 0x3ab   : > { %2328 = vmatmul.mubr.bf16.gmra.mrb[152].mxu1 %v8219_v28  ;;  %7503 = vmatmul.mubr.msk.bf16.gmra.mrb[40].mxu0 %vm774_vm2, %v2547_v43 }
 0x3ac   : > { %2335 = vmatprep.mubr.bf16.mxu1 %v8220_v46 }
 0x3ae   : > { %v2121_v50 = vpop.f32.mrb[48].mxu1 }
 0x3af   : > { %v2123_v20 = vpop.f32.mrb[49].mxu1 }
 0x3b0   : > { %v2124_v63 = vpop.f32.mrb[50].mxu1  ;;  %v8248_v20 = vld [vmem:[%s10008_s4 + $0x2f4] ss:$8 sps:$4 sm:$0xff]  }
 0x3b1   : > { %v2548_v35 = vpack.c.bf16 %v2124_v63, %v2121_v50  ;;  %v2126_v40 = vpop.f32.mrb[51].mxu1 }
 0x3b2   : > { %v8250_v40 = vld [vmem:[%s10008_s4 + $0x2f0] ss:$8 sps:$4 sm:$0xff]  }
 0x3b3   : > { %2336 = vmatmul.mubr.bf16.gmra.mrb[156].mxu1 %v8222_v39  ;;  %7510 = vmatprep.mubr.msk.bf16.mxu0 %vm774_vm2, %v2548_v35 }
 0x3b4   : > { %2343 = vmatprep.mubr.bf16.mxu1 %v8225_v15 }
 0x3b6   : > { %v2129_v51 = vpop.f32.mrb[52].mxu1 }
 0x3b7   : > { %v2131_v47 = vpop.f32.mrb[53].mxu1 }
 0x3b8   : > { %v2132_v52 = vpop.f32.mrb[54].mxu1  ;;  %v8253_v47 = vld [vmem:[%s10008_s4 + $0x304] ss:$8 sps:$4 sm:$0xff]  }
 0x3b9   : > { %v2549_v24 = vpack.c.bf16 %v2132_v52, %v2129_v51  ;;  %v2134_v21 = vpop.f32.mrb[55].mxu1 }
 0x3ba   : > { %v8255_v21 = vld [vmem:[%s10008_s4 + $0x300] ss:$8 sps:$4 sm:$0xff]  }
 0x3bb   : > { %2344 = vmatmul.mubr.bf16.gmra.mrb[160].mxu1 %v8227_v56  ;;  %7511 = vmatmul.mubr.msk.bf16.vlgmr.msra.gmra.mrb[36].mxu0 %vm774_vm2, %v2549_v24 }
 0x3bc   : > { %2351 = vmatprep.mubr.bf16.mxu1 %v8228_v4  ;;  %7519 = vmatpush3.bf16.msra.mxu0 %v8237_v48 }
 0x3bd   : > { %7520 = vmatprep.subr.bf16.mxu0 %v8238_v54 }
 0x3be   : > { %v2137_v33 = vpop.f32.mrb[56].mxu1 }
 0x3bf   : > { %v2139_v32 = vpop.f32.mrb[57].mxu1 }
 0x3c0   : > { %v2140_v44 = vpop.f32.mrb[58].mxu1  ;;  %7521 = vmatpush3.bf16.msra.mxu0 %v8238_v54 }
 0x3c1   : > { %v2550_v41 = vpack.c.bf16 %v2140_v44, %v2137_v33  ;;  %v2142_v37 = vpop.f32.mrb[59].mxu1  ;;  %7530 = vmatprep.subr.bf16.mxu0 %v8251_v55  ;;  %v8279_v44 = vld [vmem:[%s10009_s5 + $0x70] sm:$0xff]  }
 0x3c2   : > { %v8258_v37 = vld [vmem:[%s10008_s4 + $0x310] ss:$8 sps:$4 sm:$0xff]  }
 0x3c3   : > { %2352 = vmatmul.mubr.bf16.gmra.mrb[164].mxu1 %v8230_v25  ;;  %7514 = vmatprep.mubr.msk.bf16.mxu0 %vm774_vm2, %v2550_v41  ;;  %v8266_v25 = vld [vmem:[%s10009_s5 + $0x68] sm:$0xff]  }
 0x3c4   : > { %2359 = vmatprep.mubr.bf16.mxu1 %v8231_v36 }
 0x3c6   : > { %v2145_v49 = vpop.f32.mrb[60].mxu1 }
 0x3c7   : > { %v2147_v2 = vpop.f32.mrb[61].mxu1 }
 0x3c8   : > { %v2148_v62 = vpop.f32.mrb[62].mxu1  ;;  %v8259_v2 = vld [vmem:[%s10008_s4 + $0x324] ss:$8 sps:$4 sm:$0xff]  }
 0x3c9   : > { %v2551_v45 = vpack.c.bf16 %v2148_v62, %v2145_v49  ;;  %v2150_v3 = vpop.f32.mrb[63].mxu1 }
 0x3ca   : > { %v8261_v3 = vld [vmem:[%s10008_s4 + $0x320] ss:$8 sps:$4 sm:$0xff]  }
 0x3cb   : > { %2360 = vmatmul.mubr.bf16.gmra.mrb[168].mxu1 %v8233_v59  ;;  %7515 = vmatmul.mubr.msk.bf16.gmra.mrb[40].mxu0 %vm774_vm2, %v2551_v45 }
 0x3cc   : > { %2367 = vmatprep.mubr.bf16.mxu1 %v8234_v9 }
 0x3ce   : > { %v2153_v8 = vpop.f32.mrb[64].mxu1 }
 0x3cf   : > { %v2155_v16 = vpop.f32.mrb[65].mxu1 }
 0x3d0   : > { %v2156_v58 = vpop.f32.mrb[66].mxu1  ;;  %v8262_v16 = vld [vmem:[%s10008_s4 + $0x334] ss:$8 sps:$4 sm:$0xff]  }
 0x3d1   : > { %v2552_v61 = vpack.c.bf16 %v2156_v58, %v2153_v8  ;;  %v2158_v19 = vpop.f32.mrb[67].mxu1 }
 0x3d2   : > { %v8264_v19 = vld [vmem:[%s10008_s4 + $0x330] ss:$8 sps:$4 sm:$0xff]  }
 0x3d3   : > { %2368 = vmatmul.mubr.bf16.gmra.mrb[172].mxu1 %v8236_v57  ;;  %7522 = vmatprep.mubr.msk.bf16.mxu0 %vm774_vm2, %v2552_v61 }
 0x3d4   : > { %2375 = vmatprep.mubr.bf16.mxu1 %v8239_v11 }
 0x3d6   : > { %v2161_v0 = vpop.f32.mrb[68].mxu1 }
 0x3d7   : > { %v2163_v7 = vpop.f32.mrb[69].mxu1 }
 0x3d8   : > { %v2164_v34 = vpop.f32.mrb[70].mxu1  ;;  %v8267_v7 = vld [vmem:[%s10008_s4 + $0x344] ss:$8 sps:$4 sm:$0xff]  }
 0x3d9   : > { %v2553_v18 = vpack.c.bf16 %v2164_v34, %v2161_v0  ;;  %v2166_v12 = vpop.f32.mrb[71].mxu1 }
 0x3da   : > { %v8269_v12 = vld [vmem:[%s10008_s4 + $0x340] ss:$8 sps:$4 sm:$0xff]  }
 0x3db   : > { %2376 = vmatmul.mubr.bf16.gmra.mrb[176].mxu1 %v8241_v14  ;;  %7523 = vmatmul.mubr.msk.bf16.vlgmr.msra.gmra.mrb[36].mxu0 %vm774_vm2, %v2553_v18 }
 0x3dc   : > { %2383 = vmatprep.mubr.bf16.mxu1 %v8242_v6  ;;  %7531 = vmatpush3.bf16.msra.mxu0 %v8251_v55  ;;  %v8256_v55 = vld [vmem:[%s10008_s4 + $0x314] ss:$8 sps:$4 sm:$0xff]  }
 0x3dd   : > { %7532 = vmatprep.subr.bf16.mxu0 %v8252_v60 }
 0x3de   : > { %v2169_v42 = vpop.f32.mrb[72].mxu1 }
 0x3df   : > { %v2171_v1 = vpop.f32.mrb[73].mxu1 }
 0x3e0   : > { %v2172_v48 = vpop.f32.mrb[74].mxu1  ;;  %7533 = vmatpush3.bf16.msra.mxu0 %v8252_v60 }
 0x3e1   : > { %v2554_v28 = vpack.c.bf16 %v2172_v48, %v2169_v42  ;;  %v2174_v31 = vpop.f32.mrb[75].mxu1  ;;  %7542 = vmatprep.subr.bf16.mxu0 %v8265_v38  ;;  %v8293_v48 = vld [vmem:[%s10009_s5 + $0x80] sm:$0xff]  }
 0x3e2   : > { %v8272_v31 = vld [vmem:[%s10008_s4 + $0x350] ss:$8 sps:$4 sm:$0xff]  }
 0x3e3   : > { %2384 = vmatmul.mubr.bf16.gmra.mrb[180].mxu1 %v8244_v5  ;;  %7526 = vmatprep.mubr.msk.bf16.mxu0 %vm774_vm2, %v2554_v28  ;;  %v8280_v5 = vld [vmem:[%s10009_s5 + $0x78] sm:$0xff]  }
 0x3e4   : > { %2391 = vmatprep.mubr.bf16.mxu1 %v8245_v10 }
 0x3e6   : > { %v2177_v46 = vpop.f32.mrb[76].mxu1 }
 0x3e7   : > { %v2179_v43 = vpop.f32.mrb[77].mxu1 }
 0x3e8   : > { %v2180_v50 = vpop.f32.mrb[78].mxu1  ;;  %v8273_v43 = vld [vmem:[%s10008_s4 + $0x364] ss:$8 sps:$4 sm:$0xff]  }
 0x3e9   : > { %v2555_v39 = vpack.c.bf16 %v2180_v50, %v2177_v46  ;;  %v2182_v63 = vpop.f32.mrb[79].mxu1 }
 0x3ea   : > { %v8275_v63 = vld [vmem:[%s10008_s4 + $0x360] ss:$8 sps:$4 sm:$0xff]  }
 0x3eb   : > { %2392 = vmatmul.mubr.bf16.gmra.mrb[184].mxu1 %v8247_v53  ;;  %7527 = vmatmul.mubr.msk.bf16.gmra.mrb[40].mxu0 %vm774_vm2, %v2555_v39 }
 0x3ec   : > { %2399 = vmatprep.mubr.bf16.mxu1 %v8248_v20 }
 0x3ee   : > { %v2185_v15 = vpop.f32.mrb[80].mxu1 }
 0x3ef   : > { %v2187_v35 = vpop.f32.mrb[81].mxu1 }
 0x3f0   : > { %v2188_v51 = vpop.f32.mrb[82].mxu1  ;;  %v8276_v35 = vld [vmem:[%s10008_s4 + $0x374] ss:$8 sps:$4 sm:$0xff]  }
 0x3f1   : > { %v2556_v56 = vpack.c.bf16 %v2188_v51, %v2185_v15  ;;  %v2190_v52 = vpop.f32.mrb[83].mxu1 }
 0x3f2   : > { %v8278_v52 = vld [vmem:[%s10008_s4 + $0x370] ss:$8 sps:$4 sm:$0xff]  }
 0x3f3   : > { %2400 = vmatmul.mubr.bf16.gmra.mrb[188].mxu1 %v8250_v40  ;;  %7534 = vmatprep.mubr.msk.bf16.mxu0 %vm774_vm2, %v2556_v56 }
 0x3f4   : > { %2407 = vmatprep.mubr.bf16.mxu1 %v8253_v47 }
 0x3f6   : > { %v2193_v4 = vpop.f32.mrb[84].mxu1 }
 0x3f7   : > { %v2195_v24 = vpop.f32.mrb[85].mxu1 }
 0x3f8   : > { %v2196_v54 = vpop.f32.mrb[86].mxu1  ;;  %v8281_v24 = vld [vmem:[%s10008_s4 + $0x384] ss:$8 sps:$4 sm:$0xff]  }
 0x3f9   : > { %v2557_v33 = vpack.c.bf16 %v2196_v54, %v2193_v4  ;;  %v2198_v32 = vpop.f32.mrb[87].mxu1 }
 0x3fa   : > { %v8283_v32 = vld [vmem:[%s10008_s4 + $0x380] ss:$8 sps:$4 sm:$0xff]  }
 0x3fb   : > { %2408 = vmatmul.mubr.bf16.gmra.mrb[192].mxu1 %v8255_v21  ;;  %7535 = vmatmul.mubr.msk.bf16.vlgmr.msra.gmra.mrb[36].mxu0 %vm774_vm2, %v2557_v33 }
 0x3fc   : > { %2415 = vmatprep.mubr.bf16.mxu1 %v8256_v55  ;;  %7543 = vmatpush3.bf16.msra.mxu0 %v8265_v38  ;;  %v8270_v38 = vld [vmem:[%s10008_s4 + $0x354] ss:$8 sps:$4 sm:$0xff]  }
 0x3fd   : > { %7544 = vmatprep.subr.bf16.mxu0 %v8266_v25 }
 0x3fe   : > { %v2201_v36 = vpop.f32.mrb[88].mxu1 }
 0x3ff   : > { %v2203_v41 = vpop.f32.mrb[89].mxu1 }
 0x400   : > { %v2204_v49 = vpop.f32.mrb[90].mxu1  ;;  %7545 = vmatpush3.bf16.msra.mxu0 %v8266_v25 }
 0x401   : > { %v2558_v59 = vpack.c.bf16 %v2204_v49, %v2201_v36  ;;  %v2206_v62 = vpop.f32.mrb[91].mxu1  ;;  %7554 = vmatprep.subr.bf16.mxu0 %v8279_v44  ;;  %v8307_v49 = vld [vmem:[%s10009_s5 + $0x90] sm:$0xff]  }
 0x402   : > { %v8286_v62 = vld [vmem:[%s10008_s4 + $0x390] ss:$8 sps:$4 sm:$0xff]  }
 0x403   : > { %2416 = vmatmul.mubr.bf16.gmra.mrb[196].mxu1 %v8258_v37  ;;  %7538 = vmatprep.mubr.msk.bf16.mxu0 %vm774_vm2, %v2558_v59  ;;  %v8294_v37 = vld [vmem:[%s10009_s5 + $0x88] sm:$0xff]  }
 0x404   : > { %2423 = vmatprep.mubr.bf16.mxu1 %v8259_v2 }
 0x406   : > { %v2209_v9 = vpop.f32.mrb[92].mxu1 }
 0x407   : > { %v2211_v45 = vpop.f32.mrb[93].mxu1 }
 0x408   : > { %v2212_v8 = vpop.f32.mrb[94].mxu1  ;;  %v8287_v45 = vld [vmem:[%s10008_s4 + $0x3a4] ss:$8 sps:$4 sm:$0xff]  }
 0x409   : > { %v2559_v57 = vpack.c.bf16 %v2212_v8, %v2209_v9  ;;  %v2214_v58 = vpop.f32.mrb[95].mxu1 }
 0x40a   : > { %v8289_v58 = vld [vmem:[%s10008_s4 + $0x3a0] ss:$8 sps:$4 sm:$0xff]  }
 0x40b   : > { %2424 = vmatmul.mubr.bf16.gmra.mrb[200].mxu1 %v8261_v3  ;;  %7539 = vmatmul.mubr.msk.bf16.gmra.mrb[40].mxu0 %vm774_vm2, %v2559_v57 }
 0x40c   : > { %2431 = vmatprep.mubr.bf16.mxu1 %v8262_v16 }
 0x40e   : > { %v2217_v11 = vpop.f32.mrb[96].mxu1 }
 0x40f   : > { %v2219_v61 = vpop.f32.mrb[97].mxu1 }
 0x410   : > { %v2220_v0 = vpop.f32.mrb[98].mxu1  ;;  %v8290_v61 = vld [vmem:[%s10008_s4 + $0x3b4] ss:$8 sps:$4 sm:$0xff]  }
 0x411   : > { %v2560_v14 = vpack.c.bf16 %v2220_v0, %v2217_v11  ;;  %v2222_v34 = vpop.f32.mrb[99].mxu1 }
 0x412   : > { %v8292_v34 = vld [vmem:[%s10008_s4 + $0x3b0] ss:$8 sps:$4 sm:$0xff]  }
 0x413   : > { %2432 = vmatmul.mubr.bf16.gmra.mrb[204].mxu1 %v8264_v19  ;;  %7546 = vmatprep.mubr.msk.bf16.mxu0 %vm774_vm2, %v2560_v14 }
 0x414   : > { %2439 = vmatprep.mubr.bf16.mxu1 %v8267_v7 }
 0x416   : > { %v2225_v6 = vpop.f32.mrb[100].mxu1 }
 0x417   : > { %v2227_v18 = vpop.f32.mrb[101].mxu1 }
 0x418   : > { %v2228_v60 = vpop.f32.mrb[102].mxu1  ;;  %v8295_v18 = vld [vmem:[%s10008_s4 + $0x3c4] ss:$8 sps:$4 sm:$0xff]  }
 0x419   : > { %v2561_v42 = vpack.c.bf16 %v2228_v60, %v2225_v6  ;;  %v2230_v1 = vpop.f32.mrb[103].mxu1 }
 0x41a   : > { %v8297_v1 = vld [vmem:[%s10008_s4 + $0x3c0] ss:$8 sps:$4 sm:$0xff]  }
 0x41b   : > { %2440 = vmatmul.mubr.bf16.gmra.mrb[208].mxu1 %v8269_v12  ;;  %7547 = vmatmul.mubr.msk.bf16.vlgmr.msra.gmra.mrb[36].mxu0 %vm774_vm2, %v2561_v42 }
 0x41c   : > { %2447 = vmatprep.mubr.bf16.mxu1 %v8270_v38  ;;  %7555 = vmatpush3.bf16.msra.mxu0 %v8279_v44  ;;  %v8284_v44 = vld [vmem:[%s10008_s4 + $0x394] ss:$8 sps:$4 sm:$0xff]  }
 0x41d   : > { %7556 = vmatprep.subr.bf16.mxu0 %v8280_v5 }
 0x41e   : > { %v2233_v10 = vpop.f32.mrb[104].mxu1 }
 0x41f   : > { %v2235_v28 = vpop.f32.mrb[105].mxu1 }
 0x420   : > { %v2236_v46 = vpop.f32.mrb[106].mxu1  ;;  %7557 = vmatpush3.bf16.msra.mxu0 %v8280_v5 }
 0x421   : > { %v2562_v53 = vpack.c.bf16 %v2236_v46, %v2233_v10  ;;  %v2238_v50 = vpop.f32.mrb[107].mxu1  ;;  %7566 = vmatprep.subr.bf16.mxu0 %v8293_v48  ;;  %v8309_v46 = vld [vmem:[%s10009_s5 + $0xa0] sm:$0xff]  }
 0x422   : > { %v8300_v50 = vld [vmem:[%s10008_s4 + $0x3d0] ss:$8 sps:$4 sm:$0xff]  }
 0x423   : > { %2448 = vmatmul.mubr.bf16.gmra.mrb[212].mxu1 %v8272_v31  ;;  %7550 = vmatprep.mubr.msk.bf16.mxu0 %vm774_vm2, %v2562_v53  ;;  %v8308_v31 = vld [vmem:[%s10009_s5 + $0x98] sm:$0xff]  }
 0x424   : > { %2455 = vmatprep.mubr.bf16.mxu1 %v8273_v43 }
 0x426   : > { %v2241_v20 = vpop.f32.mrb[108].mxu1 }
 0x427   : > { %v2243_v39 = vpop.f32.mrb[109].mxu1 }
 0x428   : > { %v2244_v15 = vpop.f32.mrb[110].mxu1  ;;  %v8301_v39 = vld [vmem:[%s10008_s4 + $0x3e4] ss:$8 sps:$4 sm:$0xff]  }
 0x429   : > { %v2563_v40 = vpack.c.bf16 %v2244_v15, %v2241_v20  ;;  %v2246_v51 = vpop.f32.mrb[111].mxu1 }
 0x42a   : > { %v8303_v51 = vld [vmem:[%s10008_s4 + $0x3e0] ss:$8 sps:$4 sm:$0xff]  }
 0x42b   : > { %2456 = vmatmul.mubr.bf16.gmra.mrb[216].mxu1 %v8275_v63  ;;  %7551 = vmatmul.mubr.msk.bf16.gmra.mrb[40].mxu0 %vm774_vm2, %v2563_v40 }
 0x42c   : > { %2463 = vmatprep.mubr.bf16.mxu1 %v8276_v35 }
 0x42e   : > { %v2249_v47 = vpop.f32.mrb[112].mxu1 }
 0x42f   : > { %v2251_v56 = vpop.f32.mrb[113].mxu1 }
 0x430   : > { %v2252_v4 = vpop.f32.mrb[114].mxu1  ;;  %v8304_v56 = vld [vmem:[%s10008_s4 + $0x3f4] ss:$8 sps:$4 sm:$0xff]  }
 0x431   : > { %v2564_v21 = vpack.c.bf16 %v2252_v4, %v2249_v47  ;;  %v2254_v54 = vpop.f32.mrb[115].mxu1 }
 0x432   : > { %v8306_v54 = vld [vmem:[%s10008_s4 + $0x3f0] ss:$8 sps:$4 sm:$0xff]  }
 0x433   : > { %2464 = vmatmul.mubr.bf16.gmra.mrb[220].mxu1 %v8278_v52  ;;  %7558 = vmatprep.mubr.msk.bf16.mxu0 %vm774_vm2, %v2564_v21 }
 0x434   : > { %2471 = vmatprep.mubr.bf16.mxu1 %v8281_v24 }
 0x436   : > { %v2257_v55 = vpop.f32.mrb[116].mxu1 }
 0x437   : > { %v2259_v33 = vpop.f32.mrb[117].mxu1 }
 0x438   : > { %v2260_v25 = vpop.f32.mrb[118].mxu1 }
 0x439   : > { %v2565_v36 = vpack.c.bf16 %v2260_v25, %v2257_v55  ;;  %v2262_v41 = vpop.f32.mrb[119].mxu1 }
 0x43b   : > { %2472 = vmatmul.mubr.bf16.gmra.mrb[224].mxu1 %v8283_v32  ;;  %7559 = vmatmul.mubr.msk.bf16.vlgmr.msra.gmra.mrb[36].mxu0 %vm774_vm2, %v2565_v36 }
 0x43c   : > { %2479 = vmatprep.mubr.bf16.mxu1 %v8284_v44  ;;  %7567 = vmatpush3.bf16.msra.mxu0 %v8293_v48  ;;  %v8298_v48 = vld [vmem:[%s10008_s4 + $0x3d4] ss:$8 sps:$4 sm:$0xff]  }
 0x43d   : > { %7568 = vmatprep.subr.bf16.mxu0 %v8294_v37 }
 0x43e   : > { %v2265_v2 = vpop.f32.mrb[120].mxu1 }
 0x43f   : > { %v2267_v59 = vpop.f32.mrb[121].mxu1 }
 0x440   : > { %v2268_v9 = vpop.f32.mrb[122].mxu1  ;;  %7569 = vmatpush3.bf16.msra.mxu0 %v8294_v37 }
 0x441   : > { %v2566_v3 = vpack.c.bf16 %v2268_v9, %v2265_v2  ;;  %v2270_v8 = vpop.f32.mrb[123].mxu1  ;;  %7578 = vmatprep.subr.bf16.mxu0 %v8307_v49  ;;  %v8311_v2 = vld [vmem:[%s10009_s5 + $0xb0] sm:$0xff]  }
 0x443   : > { %2480 = vmatmul.mubr.bf16.gmra.mrb[228].mxu1 %v8286_v62  ;;  %7562 = vmatprep.mubr.msk.bf16.mxu0 %vm774_vm2, %v2566_v3 }
 0x444   : > { %2487 = vmatprep.mubr.bf16.mxu1 %v8287_v45 }
 0x446   : > { %v2273_v16 = vpop.f32.mrb[124].mxu1 }
 0x447   : > { %v2275_v57 = vpop.f32.mrb[125].mxu1 }
 0x448   : > { %v2276_v11 = vpop.f32.mrb[126].mxu1 }
 0x449   : > { %v2567_v19 = vpack.c.bf16 %v2276_v11, %v2273_v16  ;;  %v2278_v0 = vpop.f32.mrb[127].mxu1 }
 0x44b   : > { %2488 = vmatmul.mubr.bf16.gmra.mrb[232].mxu1 %v8289_v58  ;;  %7563 = vmatmul.mubr.msk.bf16.gmra.mrb[40].mxu0 %vm774_vm2, %v2567_v19 }
 0x44c   : > { %2495 = vmatprep.mubr.bf16.mxu1 %v8290_v61 }
 0x44e   : > { %v2281_v7 = vpop.f32.mrb[128].mxu1 }
 0x44f   : > { %v2283_v14 = vpop.f32.mrb[129].mxu1 }
 0x450   : > { %v2284_v6 = vpop.f32.mrb[130].mxu1 }
 0x451   : > { %v2568_v12 = vpack.c.bf16 %v2284_v6, %v2281_v7  ;;  %v2286_v60 = vpop.f32.mrb[131].mxu1 }
 0x453   : > { %2496 = vmatmul.mubr.bf16.gmra.mrb[236].mxu1 %v8292_v34  ;;  %7570 = vmatprep.mubr.msk.bf16.mxu0 %vm774_vm2, %v2568_v12 }
 0x454   : > { %2503 = vmatprep.mubr.bf16.mxu1 %v8295_v18 }
 0x456   : > { %v2289_v38 = vpop.f32.mrb[132].mxu1 }
 0x457   : > { %v2291_v42 = vpop.f32.mrb[133].mxu1 }
 0x458   : > { %v2292_v5 = vpop.f32.mrb[134].mxu1  ;;  %v8313_v42 = vld [vmem:[%s10009_s5 + $0xc0] sm:$0xff]  }
 0x459   : > { %v2569_v10 = vpack.c.bf16 %v2292_v5, %v2289_v38  ;;  %v2294_v28 = vpop.f32.mrb[135].mxu1  ;;  %v8312_v38 = vld [vmem:[%s10009_s5 + $0xb8] sm:$0xff]  }
 0x45b   : > { %2504 = vmatmul.mubr.bf16.gmra.mrb[240].mxu1 %v8297_v1  ;;  %7571 = vmatmul.mubr.msk.bf16.vlgmr.msra.gmra.mrb[36].mxu0 %vm774_vm2, %v2569_v10 }
 0x45c   : > { %2511 = vmatprep.mubr.bf16.mxu1 %v8298_v48  ;;  %7579 = vmatpush3.bf16.msra.mxu0 %v8307_v49  ;;  %v8310_v49 = vld [vmem:[%s10009_s5 + $0xa8] sm:$0xff]  }
 0x45d   : > { %7580 = vmatprep.subr.bf16.mxu0 %v8308_v31 }
 0x45e   : > { %v2297_v43 = vpop.f32.mrb[136].mxu1 }
 0x45f   : > { %v2299_v53 = vpop.f32.mrb[137].mxu1 }
 0x460   : > { %v2300_v20 = vpop.f32.mrb[138].mxu1  ;;  %7581 = vmatpush3.bf16.msra.mxu0 %v8308_v31 }
 0x461   : > { %v2570_v63 = vpack.c.bf16 %v2300_v20, %v2297_v43  ;;  %v2302_v15 = vpop.f32.mrb[139].mxu1  ;;  %7590 = vmatprep.subr.bf16.mxu0 %v8309_v46 }
 0x463   : > { %2512 = vmatmul.mubr.bf16.gmra.mrb[244].mxu1 %v8300_v50  ;;  %7574 = vmatprep.mubr.msk.bf16.mxu0 %vm774_vm2, %v2570_v63 }
 0x464   : > { %2519 = vmatprep.mubr.bf16.mxu1 %v8301_v39 }
 0x466   : > { %v2305_v35 = vpop.f32.mrb[140].mxu1 }
 0x467   : > { %v2307_v40 = vpop.f32.mrb[141].mxu1 }
 0x468   : > { %v2308_v47 = vpop.f32.mrb[142].mxu1 }
 0x469   : > { %v2571_v52 = vpack.c.bf16 %v2308_v47, %v2305_v35  ;;  %v2310_v4 = vpop.f32.mrb[143].mxu1 }
 0x46a   : > { %v8314_v4 = vld [vmem:[%s10009_s5 + $0xc8] sm:$0xff]  }
 0x46b   : > { %2520 = vmatmul.mubr.bf16.gmra.mrb[248].mxu1 %v8303_v51  ;;  %7575 = vmatmul.mubr.msk.bf16.gmra.mrb[40].mxu0 %vm774_vm2, %v2571_v52 }
 0x46c   : > { %2527 = vmatprep.mubr.bf16.mxu1 %v8304_v56 }
 0x46e   : > { %v2313_v24 = vpop.f32.mrb[144].mxu1 }
 0x46f   : > { %v2315_v21 = vpop.f32.mrb[145].mxu1 }
 0x470   : > { %v2316_v55 = vpop.f32.mrb[146].mxu1 }
 0x471   : > { %v2572_v33 = vpack.c.bf16 %v2316_v55, %v2313_v24  ;;  %v2318_v32 = vpop.f32.mrb[147].mxu1  ;;  %v8315_v24 = vld [vmem:[%s10009_s5 + $0xd0] sm:$0xff]  }
 0x473   : > { %2528 = vmatmul.mubr.bf16.gmra.mrb[252].mxu1 %v8306_v54  ;;  %7582 = vmatprep.mubr.msk.bf16.mxu0 %vm774_vm2, %v2572_v33 }
 0x474   : > { %6351 = vmatprep.mubr.f32.mxu1 %v8415_v27 }
 0x476   : > { %v2321_v25 = vpop.f32.mrb[148].mxu1 }
 0x477   : > { %v2323_v44 = vpop.f32.mrb[149].mxu1 }
 0x478   : > { %v2324_v36 = vpop.f32.mrb[150].mxu1 }
 0x479   : > { %v2573_v41 = vpack.c.bf16 %v2324_v36, %v2321_v25  ;;  %v2326_v37 = vpop.f32.mrb[151].mxu1 }
 0x47b   : > { %7583 = vmatmul.mubr.msk.bf16.vlgmr.msra.gmra.mrb[36].mxu0 %vm774_vm2, %v2573_v41 }
 0x47c   : > { %7591 = vmatpush3.bf16.msra.mxu0 %v8309_v46 }
 0x47d   : > { %7592 = vmatprep.subr.bf16.mxu0 %v8310_v49 }
 0x47e   : > { %v2329_v59 = vpop.f32.mrb[152].mxu1 }
 0x47f   : > { %v2331_v62 = vpop.f32.mrb[153].mxu1 }
 0x480   : > { %v2332_v9 = vpop.f32.mrb[154].mxu1  ;;  %7593 = vmatpush3.bf16.msra.mxu0 %v8310_v49 }
 0x481   : > { %v2574_v45 = vpack.c.bf16 %v2332_v9, %v2329_v59  ;;  %v2334_v3 = vpop.f32.mrb[155].mxu1  ;;  %7602 = vmatprep.subr.bf16.mxu0 %v8311_v2 }
 0x483   : > { %7586 = vmatprep.mubr.msk.bf16.mxu0 %vm774_vm2, %v2574_v45 }
 0x486   : > { %v2337_v8 = vpop.f32.mrb[156].mxu1 }
 0x487   : > { %v2339_v16 = vpop.f32.mrb[157].mxu1 }
 0x488   : > { %v2340_v57 = vpop.f32.mrb[158].mxu1 }
 0x489   : > { %v2575_v58 = vpack.c.bf16 %v2340_v57, %v2337_v8  ;;  %v2342_v11 = vpop.f32.mrb[159].mxu1 }
 0x48a   : > { %v8317_v11 = vld [vmem:[%s10009_s5 + $0xe0] sm:$0xff]  }
 0x48b   : > { %7587 = vmatmul.mubr.msk.bf16.gmra.mrb[40].mxu0 %vm774_vm2, %v2575_v58  ;;  %v8316_v58 = vld [vmem:[%s10009_s5 + $0xd8] sm:$0xff]  }
 0x48e   : > { %v2345_v61 = vpop.f32.mrb[160].mxu1 }
 0x48f   : > { %v2347_v19 = vpop.f32.mrb[161].mxu1 }
 0x490   : > { %v2348_v0 = vpop.f32.mrb[162].mxu1 }
 0x491   : > { %v2576_v7 = vpack.c.bf16 %v2348_v0, %v2345_v61  ;;  %v2350_v14 = vpop.f32.mrb[163].mxu1 }
 0x493   : > { %7594 = vmatprep.mubr.msk.bf16.mxu0 %vm774_vm2, %v2576_v7 }
 0x496   : > { %v2353_v34 = vpop.f32.mrb[164].mxu1 }
 0x497   : > { %v2355_v6 = vpop.f32.mrb[165].mxu1 }
 0x498   : > { %v2356_v18 = vpop.f32.mrb[166].mxu1 }
 0x499   : > { %v2577_v12 = vpack.c.bf16 %v2356_v18, %v2353_v34  ;;  %v2358_v60 = vpop.f32.mrb[167].mxu1 }
 0x49b   : > { %7595 = vmatmul.mubr.msk.bf16.vlgmr.msra.gmra.mrb[36].mxu0 %vm774_vm2, %v2577_v12 }
 0x49c   : > { %7603 = vmatpush3.bf16.msra.mxu0 %v8311_v2 }
 0x49d   : > { %7604 = vmatprep.subr.bf16.mxu0 %v8312_v38 }
 0x49e   : > { %v2361_v1 = vpop.f32.mrb[168].mxu1 }
 0x49f   : > { %v2363_v5 = vpop.f32.mrb[169].mxu1 }
 0x4a0   : > { %v2364_v48 = vpop.f32.mrb[170].mxu1  ;;  %7605 = vmatpush3.bf16.msra.mxu0 %v8312_v38 }
 0x4a1   : > { %v2578_v10 = vpack.c.bf16 %v2364_v48, %v2361_v1  ;;  %v2366_v28 = vpop.f32.mrb[171].mxu1  ;;  %7614 = vmatprep.subr.bf16.mxu0 %v8313_v42 }
 0x4a3   : > { %7598 = vmatprep.mubr.msk.bf16.mxu0 %vm774_vm2, %v2578_v10 }
 0x4a6   : > { %v2369_v31 = vpop.f32.mrb[172].mxu1 }
 0x4a7   : > { %v2371_v46 = vpop.f32.mrb[173].mxu1 }
 0x4a8   : > { %v2372_v43 = vpop.f32.mrb[174].mxu1 }
 0x4a9   : > { %v2579_v53 = vpack.c.bf16 %v2372_v43, %v2369_v31  ;;  %v2374_v50 = vpop.f32.mrb[175].mxu1 }
 0x4aa   : > { %v8319_v50 = vld [vmem:[%s10009_s5 + $0xf0] sm:$0xff]  }
 0x4ab   : > { %7599 = vmatmul.mubr.msk.bf16.gmra.mrb[40].mxu0 %vm774_vm2, %v2579_v53  ;;  %v8318_v53 = vld [vmem:[%s10009_s5 + $0xe8] sm:$0xff]  }
 0x4ae   : > { %v2377_v20 = vpop.f32.mrb[176].mxu1 }
 0x4af   : > { %v2379_v39 = vpop.f32.mrb[177].mxu1 }
 0x4b0   : > { %v2380_v63 = vpop.f32.mrb[178].mxu1 }
 0x4b1   : > { %v2580_v15 = vpack.c.bf16 %v2380_v63, %v2377_v20  ;;  %v2382_v35 = vpop.f32.mrb[179].mxu1 }
 0x4b3   : > { %7606 = vmatprep.mubr.msk.bf16.mxu0 %vm774_vm2, %v2580_v15 }
 0x4b6   : > { %v2385_v40 = vpop.f32.mrb[180].mxu1 }
 0x4b7   : > { %v2387_v51 = vpop.f32.mrb[181].mxu1 }
 0x4b8   : > { %v2388_v47 = vpop.f32.mrb[182].mxu1 }
 0x4b9   : > { %v2581_v56 = vpack.c.bf16 %v2388_v47, %v2385_v40  ;;  %v2390_v52 = vpop.f32.mrb[183].mxu1 }
 0x4bb   : > { %7607 = vmatmul.mubr.msk.bf16.vlgmr.msra.gmra.mrb[36].mxu0 %vm774_vm2, %v2581_v56 }
 0x4bc   : > { %7615 = vmatpush3.bf16.msra.mxu0 %v8313_v42 }
 0x4bd   : > { %7616 = vmatprep.subr.bf16.mxu0 %v8314_v4 }
 0x4be   : > { %v2393_v21 = vpop.f32.mrb[184].mxu1 }
 0x4bf   : > { %v2395_v54 = vpop.f32.mrb[185].mxu1 }
 0x4c0   : > { %v2396_v55 = vpop.f32.mrb[186].mxu1  ;;  %7617 = vmatpush3.bf16.msra.mxu0 %v8314_v4 }
 0x4c1   : > { %v2582_v33 = vpack.c.bf16 %v2396_v55, %v2393_v21  ;;  %v2398_v32 = vpop.f32.mrb[187].mxu1  ;;  %7626 = vmatprep.subr.bf16.mxu0 %v8315_v24 }
 0x4c3   : > { %7610 = vmatprep.mubr.msk.bf16.mxu0 %vm774_vm2, %v2582_v33 }
 0x4c6   : > { %v2401_v25 = vpop.f32.mrb[188].mxu1 }
 0x4c7   : > { %v2403_v44 = vpop.f32.mrb[189].mxu1 }
 0x4c8   : > { %v2404_v36 = vpop.f32.mrb[190].mxu1 }
 0x4c9   : > { %v2583_v41 = vpack.c.bf16 %v2404_v36, %v2401_v25  ;;  %v2406_v37 = vpop.f32.mrb[191].mxu1 }
 0x4cb   : > { %7611 = vmatmul.mubr.msk.bf16.gmra.mrb[40].mxu0 %vm774_vm2, %v2583_v41  ;;  %v8320_v41 = vld [vmem:[%s10009_s5 + $0xf8] sm:$0xff]  }
 0x4ce   : > { %v2409_v49 = vpop.f32.mrb[192].mxu1 }
 0x4cf   : > { %v2411_v2 = vpop.f32.mrb[193].mxu1 }
 0x4d0   : > { %v2412_v59 = vpop.f32.mrb[194].mxu1 }
 0x4d1   : > { %v2584_v62 = vpack.c.bf16 %v2412_v59, %v2409_v49  ;;  %v2414_v9 = vpop.f32.mrb[195].mxu1 }
 0x4d3   : > { %7618 = vmatprep.mubr.msk.bf16.mxu0 %vm774_vm2, %v2584_v62 }
 0x4d6   : > { %v2417_v45 = vpop.f32.mrb[196].mxu1 }
 0x4d7   : > { %v2419_v3 = vpop.f32.mrb[197].mxu1 }
 0x4d8   : > { %v2420_v8 = vpop.f32.mrb[198].mxu1 }
 0x4d9   : > { %v2585_v16 = vpack.c.bf16 %v2420_v8, %v2417_v45  ;;  %v2422_v57 = vpop.f32.mrb[199].mxu1 }
 0x4db   : > { %7619 = vmatmul.mubr.msk.bf16.vlgmr.msra.gmra.mrb[36].mxu0 %vm774_vm2, %v2585_v16 }
 0x4dc   : > { %7627 = vmatpush3.bf16.msra.mxu0 %v8315_v24 }
 0x4dd   : > { %7628 = vmatprep.subr.bf16.mxu0 %v8316_v58 }
 0x4de   : > { %v2425_v61 = vpop.f32.mrb[200].mxu1 }
 0x4df   : > { %v2427_v19 = vpop.f32.mrb[201].mxu1 }
 0x4e0   : > { %v2428_v0 = vpop.f32.mrb[202].mxu1  ;;  %7629 = vmatpush3.bf16.msra.mxu0 %v8316_v58 }
 0x4e1   : > { %v2586_v7 = vpack.c.bf16 %v2428_v0, %v2425_v61  ;;  %v2430_v14 = vpop.f32.mrb[203].mxu1  ;;  %7638 = vmatprep.subr.bf16.mxu0 %v8317_v11 }
 0x4e3   : > { %7622 = vmatprep.mubr.msk.bf16.mxu0 %vm774_vm2, %v2586_v7 }
 0x4e6   : > { %v2433_v34 = vpop.f32.mrb[204].mxu1 }
 0x4e7   : > { %v2435_v6 = vpop.f32.mrb[205].mxu1 }
 0x4e8   : > { %v2436_v18 = vpop.f32.mrb[206].mxu1 }
 0x4e9   : > { %v2587_v12 = vpack.c.bf16 %v2436_v18, %v2433_v34  ;;  %v2438_v60 = vpop.f32.mrb[207].mxu1 }
 0x4eb   : > { %7623 = vmatmul.mubr.msk.bf16.gmra.mrb[40].mxu0 %vm774_vm2, %v2587_v12 }
 0x4ee   : > { %v2441_v38 = vpop.f32.mrb[208].mxu1 }
 0x4ef   : > { %v2443_v42 = vpop.f32.mrb[209].mxu1 }
 0x4f0   : > { %v2444_v1 = vpop.f32.mrb[210].mxu1 }
 0x4f1   : > { %v2588_v5 = vpack.c.bf16 %v2444_v1, %v2441_v38  ;;  %v2446_v48 = vpop.f32.mrb[211].mxu1 }
 0x4f3   : > { %7630 = vmatprep.mubr.msk.bf16.mxu0 %vm774_vm2, %v2588_v5 }
 0x4f6   : > { %v2449_v10 = vpop.f32.mrb[212].mxu1 }
 0x4f7   : > { %v2451_v28 = vpop.f32.mrb[213].mxu1 }
 0x4f8   : > { %v2452_v31 = vpop.f32.mrb[214].mxu1 }
 0x4f9   : > { %v2589_v46 = vpack.c.bf16 %v2452_v31, %v2449_v10  ;;  %v2454_v43 = vpop.f32.mrb[215].mxu1 }
 0x4fb   : > { %7631 = vmatmul.mubr.msk.bf16.vlgmr.msra.gmra.mrb[36].mxu0 %vm774_vm2, %v2589_v46 }
 0x4fc   : > { %7639 = vmatpush3.bf16.msra.mxu0 %v8317_v11 }
 0x4fd   : > { %7640 = vmatprep.subr.bf16.mxu0 %v8318_v53 }
 0x4fe   : > { %v2457_v20 = vpop.f32.mrb[216].mxu1 }
 0x4ff   : > { %v2459_v39 = vpop.f32.mrb[217].mxu1 }
 0x500   : > { %v2460_v63 = vpop.f32.mrb[218].mxu1  ;;  %7641 = vmatpush3.bf16.msra.mxu0 %v8318_v53 }
 0x501   : > { %v2590_v15 = vpack.c.bf16 %v2460_v63, %v2457_v20  ;;  %v2462_v35 = vpop.f32.mrb[219].mxu1  ;;  %7650 = vmatprep.subr.bf16.mxu0 %v8319_v50 }
 0x503   : > { %7634 = vmatprep.mubr.msk.bf16.mxu0 %vm774_vm2, %v2590_v15 }
 0x506   : > { %v2465_v40 = vpop.f32.mrb[220].mxu1 }
 0x507   : > { %v2467_v51 = vpop.f32.mrb[221].mxu1 }
 0x508   : > { %v2468_v47 = vpop.f32.mrb[222].mxu1 }
 0x509   : > { %v2591_v56 = vpack.c.bf16 %v2468_v47, %v2465_v40  ;;  %v2470_v52 = vpop.f32.mrb[223].mxu1 }
 0x50b   : > { %7635 = vmatmul.mubr.msk.bf16.gmra.mrb[40].mxu0 %vm774_vm2, %v2591_v56 }
 0x50e   : > { %v2473_v4 = vpop.f32.mrb[224].mxu1 }
 0x50f   : > { %v2475_v24 = vpop.f32.mrb[225].mxu1 }
 0x510   : > { %v2476_v21 = vpop.f32.mrb[226].mxu1 }
 0x511   : > { %v2592_v54 = vpack.c.bf16 %v2476_v21, %v2473_v4  ;;  %v2478_v55 = vpop.f32.mrb[227].mxu1 }
 0x513   : > { %7642 = vmatprep.mubr.msk.bf16.mxu0 %vm774_vm2, %v2592_v54 }
 0x516   : > { %v2481_v33 = vpop.f32.mrb[228].mxu1 }
 0x517   : > { %v2483_v32 = vpop.f32.mrb[229].mxu1 }
 0x518   : > { %v2484_v25 = vpop.f32.mrb[230].mxu1 }
 0x519   : > { %v2593_v44 = vpack.c.bf16 %v2484_v25, %v2481_v33  ;;  %v2486_v36 = vpop.f32.mrb[231].mxu1 }
 0x51b   : > { %7643 = vmatmul.mubr.msk.bf16.vlgmr.msra.gmra.mrb[36].mxu0 %vm774_vm2, %v2593_v44 }
 0x51c   : > { %7651 = vmatpush3.bf16.msra.mxu0 %v8319_v50 }
 0x51d   : > { %7652 = vmatprep.subr.bf16.mxu0 %v8320_v41 }
 0x51e   : > { %v2489_v37 = vpop.f32.mrb[232].mxu1 }
 0x51f   : > { %v2491_v49 = vpop.f32.mrb[233].mxu1 }
 0x520   : > { %v2492_v2 = vpop.f32.mrb[234].mxu1  ;;  %7653 = vmatpush3.bf16.msra.mxu0 %v8320_v41 }
 0x521   : > { %v2594_v59 = vpack.c.bf16 %v2492_v2, %v2489_v37  ;;  %v2494_v62 = vpop.f32.mrb[235].mxu1  ;;  %7879 = vmatprep.subr.bf16.mxu0 %v8413_v22 }
 0x523   : > { %7646 = vmatprep.mubr.msk.bf16.mxu0 %vm774_vm2, %v2594_v59 }
 0x526   : > { %v2497_v9 = vpop.f32.mrb[236].mxu1 }
 0x527   : > { %v2499_v45 = vpop.f32.mrb[237].mxu1 }
 0x528   : > { %v2500_v3 = vpop.f32.mrb[238].mxu1 }
 0x529   : > { %v2595_v8 = vpack.c.bf16 %v2500_v3, %v2497_v9  ;;  %v2502_v16 = vpop.f32.mrb[239].mxu1 }
 0x52b   : > { %7647 = vmatmul.mubr.msk.bf16.gmra.mrb[40].mxu0 %vm774_vm2, %v2595_v8 }
 0x52e   : > { %v2505_v57 = vpop.f32.mrb[240].mxu1 }
 0x52f   : > { %v2507_v58 = vpop.f32.mrb[241].mxu1 }
 0x530   : > { %v2508_v11 = vpop.f32.mrb[242].mxu1 }
 0x531   : > { %v2596_v61 = vpack.c.bf16 %v2508_v11, %v2505_v57  ;;  %v2510_v19 = vpop.f32.mrb[243].mxu1 }
 0x533   : > { %7654 = vmatprep.mubr.msk.bf16.mxu0 %vm774_vm2, %v2596_v61 }
 0x536   : > { %v2513_v0 = vpop.f32.mrb[244].mxu1 }
 0x537   : > { %v2515_v7 = vpop.f32.mrb[245].mxu1 }
 0x538   : > { %v2516_v14 = vpop.f32.mrb[246].mxu1 }
 0x539   : > { %v2597_v34 = vpack.c.bf16 %v2516_v14, %v2513_v0  ;;  %v2518_v6 = vpop.f32.mrb[247].mxu1 }
 0x53b   : > { %7655 = vmatmul.mubr.msk.bf16.vlgmr.msra.gmra.mrb[36].mxu0 %vm774_vm2, %v2597_v34 }
 0x53c   : > { %7881 = vmatpush3.bf16.msra.mxu0 %v8549_v23 }
 0x53d   : > { %7882 = vmatprep.subr.bf16.mxu0 %v8413_v22  ;;  %v9553_v22 = vld [vmem:[%s10006_s2 + $0x4] sm:$0x7] }
 0x53e   : > { %v2521_v18 = vpop.f32.mrb[248].mxu1 }
 0x53f   : > { %v2523_v12 = vpop.f32.mrb[249].mxu1 }
 0x540   : > { %v2524_v60 = vpop.f32.mrb[250].mxu1  ;;  %7884 = vmatpush3.bf16.msra.mxu0 %v8559_v26  ;;  %v4220_v26 = vrot.slane %v9553_v22, %v458_v30 }
 0x541   : > { %v2598_v38 = vpack.c.bf16 %v2524_v60, %v2521_v18  ;;  %v2526_v42 = vpop.f32.mrb[251].mxu1 }
 0x543   : > { %7658 = vmatprep.mubr.msk.bf16.mxu0 %vm774_vm2, %v2598_v38 }
 0x546   : > { %v2529_v1 = vpop.f32.mrb[252].mxu1 }
 0x547   : > { %v2531_v5 = vpop.f32.mrb[253].mxu1 }
 0x548   : > { %v2532_v48 = vpop.f32.mrb[254].mxu1 }
 0x549   : > { %v2599_v10 = vpack.c.bf16 %v2532_v48, %v2529_v1  ;;  %v2534_v28 = vpop.f32.mrb[255].mxu1 }
 0x54b   : > { %7659 = vmatmul.mubr.msk.bf16.gmra.mrb[40].mxu0 %vm774_vm2, %v2599_v10 }
 0x54c   : > { %7670 = vmatprep.mubr.msk.f32.mxu0 %vm8414_vm1, %v8415_v27 }
 0x60e   : > { %v7656_v23 = vpop.f32.mrb[36].mxu0 }
 0x60f   : > { %v4176_v31 = vpop.f32.mrb[37].mxu0  ;;  %v9564_v39 = vadd.f32 %v7656_v23, %v4220_v26 }
 0x610   : > { %v7657_v46 = vpop.f32.mrb[38].mxu0  ;;  %v9558_v53 = vadd.f32 %v4220_v26, %v4176_v31 }
 0x611   : > { %v4179_v43 = vpop.f32.mrb[39].mxu0  ;;  %v9573_v40 = vadd.f32 %v7657_v46, %v4220_v26  ;;  %v4252_v47 = vmul.f32 %v9564_v39, %v9564_v39  ;;  %v4232_v4 = vsel %vm774_vm2, %v9564_v39, 0.0 }
 0x612   : > { %v9560_v50 = vadd.f32 %v4220_v26, %v4179_v43  ;;  %v4250_v63 = vmul.f32 %v9558_v53, %v9558_v53  ;;  %v4229_v30 = vsel %vm774_vm2, %v9558_v53, 0.0 }
 0x613   : > { %v4253_v24 = vmul.f32 %v9573_v40, %v9573_v40  ;;  %v4261_v54 = vsel %vm774_vm2, %v4252_v47, 0.0  ;;  %v4234_v25 = vsel %vm774_vm2, %v9573_v40, 0.0  ;;  %v6272_v47 = vld [vmem:[%s10012_s8] sm:$0xff] }
 0x614   : > { %v4251_v20 = vmul.f32 %v9560_v50, %v9560_v50  ;;  %v4230_v15 = vsel %vm774_vm2, %v9560_v50, 0.0  ;;  %v4258_v56 = vsel %vm774_vm2, %v4250_v63, 0.0 }
 0x615   : > { %v4231_v51 = vadd.f32 %v4230_v15, %v4229_v30  ;;  %v4263_v37 = vsel %vm774_vm2, %v4253_v24, 0.0 }
 0x616   : > { %v4259_v35 = vsel %vm774_vm2, %v4251_v20, 0.0 }
 0x617   : > { %v4260_v52 = vadd.f32 %v4259_v35, %v4258_v56  ;;  %v4233_v21 = vadd.f32 %v4232_v4, %v4231_v51  ;;  %v8321_v35 = vld [vmem:[%s10010_s6] sm:$0xff]   ;;  %v6273_v51 = vld [vmem:[%s10012_s8 + $0x8] sm:$0xff] }
 0x618   : > { %6287 = vmatprep.subr.mxu1 %v6273_v51  ;;  %v8329_v51 = vld [vmem:[%s10010_s6 + $0x40] sm:$0xff]  }
 0x619   : > { %v4262_v33 = vadd.f32 %v4261_v54, %v4260_v52  ;;  %v4235_v49 = vadd.f32 %v4234_v25, %v4233_v21  ;;  %6288 = vmatpush1.msra.mxu1 %v6272_v47  ;;  %v8330_v47 = vld [vmem:[%s10010_s6 + $0x48] sm:$0xff]  }
 0x61b   : > { %v4264_v8 = vadd.f32 %v4263_v37, %v4262_v33 }
 0x61e   : > { %v7660_v55 = vpop.f32.mrb[40].mxu0 }
 0x61f   : > { %v4192_v32 = vpop.f32.mrb[41].mxu0  ;;  %v9585_v44 = vadd.f32 %v7660_v55, %v4220_v26 }
 0x620   : > { %v9587_v36 = vadd.f32 %v4220_v26, %v4192_v32  ;;  %v7661_v41 = vpop.f32.mrb[42].mxu0 }
 0x621   : > { %v4195_v2 = vpop.f32.mrb[43].mxu0  ;;  %v9594_v9 = vadd.f32 %v7661_v41, %v4220_v26  ;;  %v4256_v16 = vmul.f32 %v9585_v44, %v9585_v44  ;;  %v4240_v0 = vsel %vm774_vm2, %v9585_v44, 0.0 }
 0x622   : > { %v4236_v59 = vsel %vm774_vm2, %v9587_v36, 0.0  ;;  %v4254_v62 = vmul.f32 %v9587_v36, %v9587_v36  ;;  %v4226_v45 = vadd.f32 %v4220_v26, %v4195_v2 }
 0x623   : > { %v4237_v3 = vadd.f32 %v4236_v59, %v4235_v49  ;;  %v4257_v7 = vmul.f32 %v9594_v9, %v9594_v9  ;;  %v4269_v18 = vsel %vm774_vm2, %v4256_v16, 0.0  ;;  %v4242_v12 = vsel %vm774_vm2, %v9594_v9, 0.0 }
 0x624   : > { %v4265_v57 = vsel %vm774_vm2, %v4254_v62, 0.0  ;;  %v4238_v58 = vsel %vm774_vm2, %v4226_v45, 0.0  ;;  %v4255_v11 = vmul.f32 %v4226_v45, %v4226_v45 }
 0x625   : > { %v4266_v61 = vadd.f32 %v4265_v57, %v4264_v8  ;;  %v4239_v19 = vadd.f32 %v4238_v58, %v4237_v3  ;;  %v4271_v42 = vsel %vm774_vm2, %v4257_v7, 0.0 }
 0x626   : > { %v4267_v14 = vsel %vm774_vm2, %v4255_v11, 0.0 }
 0x627   : > { %v4241_v34 = vadd.f32 %v4240_v0, %v4239_v19  ;;  %v4268_v6 = vadd.f32 %v4267_v14, %v4266_v61 }
 0x629   : > { %v4243_v60 = vadd.f32 %v4242_v12, %v4241_v34  ;;  %v4270_v38 = vadd.f32 %v4269_v18, %v4268_v6 }
 0x62b   : > { %v4244_v1 = vrot.slane %v4243_v60, 4  ;;  %v4272_v5 = vadd.f32 %v4271_v42, %v4270_v38 }
 0x62d   : > { %v4245_v48 = vadd.f32 %v4244_v1, %v4243_v60  ;;  %v4273_v10 = vrot.slane %v4272_v5, 4 }
 0x62f   : > { %v4246_v28 = vrot.slane %v4245_v48, 2  ;;  %v4274_v23 = vadd.f32 %v4273_v10, %v4272_v5 }
 0x631   : > { %v4247_v26 = vadd.f32 %v4246_v28, %v4245_v48  ;;  %v4275_v31 = vrot.slane %v4274_v23, 2 }
 0x633   : > { %v4248_v46 = vrot.slane %v4247_v26, 1  ;;  %v4276_v43 = vadd.f32 %v4275_v31, %v4274_v23  ;;  %v8322_v31 = vld [vmem:[%s10010_s6 + $0x8] sm:$0xff]  }
 0x635   : > { %v4277_v20 = vrot.slane %v4276_v43, 1  ;;  %v4249_v63 = vadd.f32 %v4248_v46, %v4247_v26  ;;  %v8337_v26 = vld [vmem:[%s10011_s7 + $0x10] sm:$0xff]  }
 0x636   : > { %v8323_v46 = vld [vmem:[%s10010_s6 + $0x10] sm:$0xff]  }
 0x637   : > { %v4278_v15 = vadd.f32 %v4277_v20, %v4276_v43  ;;  %v8350_v43 = vld [vmem:[%s10011_s7 + $0x18] sm:$0xff]  }
 0x638   : > { %v8324_v20 = vld [vmem:[%s10010_s6 + $0x18] sm:$0xff]  }
 0x639   : > { %v4279_v30 = vsel %vm945_vm3, %v4249_v63, %v4278_v15  ;;  %v8325_v63 = vld [vmem:[%s10010_s6 + $0x20] sm:$0xff]   ;;  %v8326_v15 = vld [vmem:[%s10010_s6 + $0x28] sm:$0xff]  }
 0x63a   : > { %7671 = vmatmul.mubr.msk.f32.vlgmr.msra.gmra.mrb[34].mxu0 %vm774_vm2, %v4279_v30  ;;  %v8327_v30 = vld [vmem:[%s10010_s6 + $0x30] sm:$0xff]  }
 0x63b   : > { %7681 = vmatprep.mubr.msk.bf16.mxu0 %vm564_vm0, %v8321_v35  ;;  %v8328_v35 = vld [vmem:[%s10010_s6 + $0x38] sm:$0xff]  }
 0x70d   : > { %v4349_v56 = vpop.f32.mrb[34].mxu0 }
 0x70e   : > { %v4354_v52 = vmul.f32 0.0078125, %v4349_v56  ;;  %v7672_v4 = vpop.f32.mrb[35].mxu0  ;;  %v8331_v56 = vld [vmem:[%s10010_s6 + $0x50] sm:$0xff]  }
 0x70f   : > { %v8333_v4 = vld [vmem:[%s10010_s6 + $0x60] sm:$0xff]  }
 0x710   : > { %v4355_v24 = vmul.f32 %v4354_v52, %v4354_v52 }
 0x712   : > { %v4357_v21 = vrot.slane %v4355_v24, 7  ;;  %v8334_v24 = vld [vmem:[%s10010_s6 + $0x68] sm:$0xff]  }
 0x714   : > { %v4359_v54 = vsub.f32 %v4354_v52, %v4357_v21  ;;  %v8335_v21 = vld [vmem:[%s10010_s6 + $0x70] sm:$0xff]  }
 0x716   : > { %v4360_v55 = vmax.f32 %v4359_v54, 0.0  ;;  %v8336_v54 = vld [vmem:[%s10010_s6 + $0x78] sm:$0xff]  }
 0x718   : > { %v4361_v33 = vadd.f32 1e-05, %v4360_v55  ;;  %v8338_v55 = vld [vmem:[%s10010_s6 + $0x80] sm:$0xff]  }
 0x71a   : > { %8403 = vrsqrt.f32 %v4361_v33  ;;  %v8339_v33 = vld [vmem:[%s10010_s6 + $0x88] sm:$0xff]  }
 0x724   : > { %v8404_v32 = vpop.eup %8403 }
 0x725   : > { %v4363_v25 = vmul.f32 %v8404_v32, %v9553_v22  ;;  %v8340_v32 = vld [vmem:[%s10010_s6 + $0x90] sm:$0xff]  }
 0x727   : > { %v4365_v41 = vrot.slane %v4363_v25, 1  ;;  %v4375_v49 = vrot.slane %v4363_v25, %v1041_v13  ;;  %v8341_v25 = vld [vmem:[%s10010_s6 + $0x98] sm:$0xff]  }
 0x729   : > { %v4367_v37 = vmul.f32 %v4365_v41, %v4354_v52  ;;  %v4376_v62 = vmul.f32 %v4375_v49, %v9558_v53  ;;  %v4377_v8 = vmul.f32 %v4375_v49, %v9560_v50  ;;  %v4378_v16 = vmul.f32 %v4375_v49, %v9564_v39  ;;  %v8332_v52 = vld [vmem:[%s10010_s6 + $0x58] sm:$0xff]   ;;  %v8342_v41 = vld [vmem:[%s10010_s6 + $0xa0] sm:$0xff]  }
 0x72a   : > { %v4379_v57 = vmul.f32 %v4375_v49, %v9573_v40  ;;  %v4380_v58 = vmul.f32 %v4375_v49, %v9587_v36  ;;  %v4381_v11 = vmul.f32 %v4375_v49, %v4226_v45  ;;  %v4382_v61 = vmul.f32 %v4375_v49, %v9585_v44 }
 0x72b   : > { %v4369_v2 = vrot.slane %v4367_v37, 6  ;;  %v4383_v13 = vmul.f32 %v4375_v49, %v9594_v9  ;;  %v8343_v37 = vld [vmem:[%s10010_s6 + $0xa8] sm:$0xff]   ;;  %v8344_v49 = vld [vmem:[%s10010_s6 + $0xb0] sm:$0xff]  }
 0x72d   : > { %v4371_v59 = vsub.f32 %v9553_v22, %v4369_v2  ;;  %v8345_v2 = vld [vmem:[%s10010_s6 + $0xb8] sm:$0xff]  }
 0x72f   : > { %v4387_v3 = vrot.slane %v4371_v59, %v1077_v17  ;;  %v8346_v59 = vld [vmem:[%s10010_s6 + $0xc0] sm:$0xff]  }
 0x731   : > { %v4388_v19 = vadd.f32 %v4387_v3, %v4376_v62  ;;  %v4389_v22 = vadd.f32 %v4387_v3, %v4377_v8  ;;  %v4390_v0 = vadd.f32 %v4387_v3, %v4378_v16  ;;  %v4391_v53 = vadd.f32 %v4387_v3, %v4379_v57  ;;  %v8347_v62 = vld [vmem:[%s10010_s6 + $0xc8] sm:$0xff]   ;;  %v8355_v8 = vld [vmem:[%s10011_s7] sm:$0xff]   ;;  %v8349_v16 = vld [vmem:[%s10010_s6 + $0xd8] sm:$0xff]  }
 0x732   : > { %v4392_v7 = vadd.f32 %v4387_v3, %v4380_v58  ;;  %v4393_v29 = vadd.f32 %v4387_v3, %v4381_v11  ;;  %v4394_v17 = vadd.f32 %v4387_v3, %v4382_v61  ;;  %v4395_v14 = vadd.f32 %v4387_v3, %v4383_v13  ;;  %v8348_v3 = vld [vmem:[%s10010_s6 + $0xd0] sm:$0xff]   ;;  %v8351_v57 = vld [vmem:[%s10010_s6 + $0xe0] sm:$0xff]   ;;  %v8352_v58 = vld [vmem:[%s10010_s6 + $0xe8] sm:$0xff]  }
 0x733   : > { %vm4396_vm1 = vcmp.ge.f32.partialorder %v4388_v19, 0.0  ;;  %vm4397_vm3 = vcmp.ge.f32.partialorder %v4389_v22, 0.0  ;;  %v4404_v50 = vmul.f32 0.2, %v4388_v19  ;;  %v4405_v39 = vmul.f32 0.2, %v4389_v22 }
 0x734   : > { %vm4398_vm12 = vcmp.ge.f32.partialorder %v4390_v0, 0.0  ;;  %vm4399_vm13 = vcmp.ge.f32.partialorder %v4391_v53, 0.0  ;;  %v4406_v40 = vmul.f32 0.2, %v4390_v0  ;;  %v4407_v36 = vmul.f32 0.2, %v4391_v53 }
 0x735   : > { %v4412_v45 = vsel %vm4396_vm1, %v4388_v19, %v4404_v50  ;;  %v4413_v44 = vsel %vm4397_vm3, %v4389_v22, %v4405_v39  ;;  %vm4400_vm14 = vcmp.ge.f32.partialorder %v4392_v7, 0.0  ;;  %vm4401_vm15 = vcmp.ge.f32.partialorder %v4393_v29, 0.0  ;;  %v8353_v11 = vld [vmem:[%s10010_s6 + $0xf0] sm:$0xff]   ;;  %v8354_v61 = vld [vmem:[%s10010_s6 + $0xf8] sm:$0xff]  }
 0x736   : > { %v4420_v9 = vpack.c.bf16 %v4413_v44, %v4412_v45  ;;  %v4414_v34 = vsel %vm4398_vm12, %v4390_v0, %v4406_v40  ;;  %v4415_v6 = vsel %vm4399_vm13, %v4391_v53, %v4407_v36  ;;  %v4408_v18 = vmul.f32 0.2, %v4392_v7  ;;  %v8356_v36 = vld [vmem:[%s10011_s7 + $0x8] sm:$0xff]   ;;  %v8357_v44 = vld [vmem:[%s10011_s7 + $0x20] sm:$0xff]  }
 0x737   : > { %v4409_v12 = vmul.f32 0.2, %v4393_v29  ;;  %v4421_v60 = vpack.c.bf16 %v4415_v6, %v4414_v34  ;;  %v4410_v1 = vmul.f32 0.2, %v4394_v17  ;;  %v4411_v5 = vmul.f32 0.2, %v4395_v14 }
 0x738   : > { %7673 = vmatprep.subr.bf16.mxu0 %v4420_v9  ;;  %v4416_v38 = vsel %vm4400_vm14, %v4392_v7, %v4408_v18  ;;  %vm4402_vm4 = vcmp.ge.f32.partialorder %v4394_v17, 0.0  ;;  %vm4403_vm5 = vcmp.ge.f32.partialorder %v4395_v14, 0.0 }
 0x739   : > { %7674 = vmatpush3.bf16.msra.mxu0 %v4420_v9  ;;  %v4417_v42 = vsel %vm4401_vm15, %v4393_v29, %v4409_v12  ;;  %v4418_v10 = vsel %vm4402_vm4, %v4394_v17, %v4410_v1  ;;  %v4419_v28 = vsel %vm4403_vm5, %v4395_v14, %v4411_v5 }
 0x73a   : > { %7675 = vmatprep.subr.bf16.mxu0 %v4421_v60  ;;  %v4422_v48 = vpack.c.bf16 %v4417_v42, %v4416_v38  ;;  %v4423_v23 = vpack.c.bf16 %v4419_v28, %v4418_v10  ;;  %v8358_v38 = vld [vmem:[%s10011_s7 + $0x28] sm:$0xff]   ;;  %v8359_v28 = vld [vmem:[%s10011_s7 + $0x30] sm:$0xff]  }
 0x73d   : > { %7676 = vmatpush3.bf16.msra.mxu0 %v4421_v60 }
 0x73e   : > { %7677 = vmatprep.subr.bf16.mxu0 %v4422_v48 }
 0x741   : > { %7678 = vmatpush3.bf16.msra.mxu0 %v4422_v48 }
 0x742   : > { %7679 = vmatprep.subr.bf16.mxu0 %v4423_v23 }
 0x745   : > { %7680 = vmatpush3.bf16.msra.mxu0 %v4423_v23 }
 0x746   : > { %7745 = vmatprep.subr.bf16.mxu0 %v8337_v26 }
 0x748   : > { %7682 = vmatmul.mubr.msk.bf16.vlgmr.msra.gmra.mrb[44].mxu0 %vm564_vm0, %v8322_v31 }
 0x749   : > { %7685 = vmatprep.mubr.msk.bf16.mxu0 %vm564_vm0, %v8323_v46  ;;  %7746 = vmatpush3.bf16.msra.mxu0 %v8337_v26 }
 0x74a   : > { %7747 = vmatprep.subr.bf16.mxu0 %v8350_v43 }
 0x74d   : > { %7748 = vmatpush3.bf16.msra.mxu0 %v8350_v43 }
 0x74e   : > { %7753 = vmatprep.subr.bf16.mxu0 %v8355_v8 }
 0x750   : > { %7686 = vmatmul.mubr.msk.bf16.gmra.mrb[48].mxu0 %vm564_vm0, %v8324_v20 }
 0x751   : > { %7689 = vmatprep.mubr.msk.bf16.mxu0 %vm564_vm0, %v8325_v63  ;;  %v8360_v63 = vld [vmem:[%s10011_s7 + $0x38] sm:$0xff]  }
 0x758   : > { %7690 = vmatmul.mubr.msk.bf16.gmra.mrb[52].mxu0 %vm564_vm0, %v8326_v15 }
 0x759   : > { %7693 = vmatprep.mubr.msk.bf16.mxu0 %vm564_vm0, %v8327_v30  ;;  %v8361_v30 = vld [vmem:[%s10011_s7 + $0x40] sm:$0xff]  }
 0x760   : > { %7694 = vmatmul.mubr.msk.bf16.gmra.mrb[56].mxu0 %vm564_vm0, %v8328_v35 }
 0x761   : > { %7697 = vmatprep.mubr.msk.bf16.mxu0 %vm564_vm0, %v8329_v51 }
 0x768   : > { %7698 = vmatmul.mubr.msk.bf16.gmra.mrb[60].mxu0 %vm564_vm0, %v8330_v47 }
 0x769   : > { %7701 = vmatprep.mubr.msk.bf16.mxu0 %vm564_vm0, %v8331_v56 }
 0x770   : > { %7702 = vmatmul.mubr.msk.bf16.gmra.mrb[64].mxu0 %vm564_vm0, %v8332_v52 }
 0x771   : > { %7705 = vmatprep.mubr.msk.bf16.mxu0 %vm564_vm0, %v8333_v4 }
 0x778   : > { %7706 = vmatmul.mubr.msk.bf16.gmra.mrb[68].mxu0 %vm564_vm0, %v8334_v24  ;;  %v8362_v24 = vld [vmem:[%s10011_s7 + $0x48] sm:$0xff]  }
 0x779   : > { %7709 = vmatprep.mubr.msk.bf16.mxu0 %vm564_vm0, %v8335_v21 }
 0x780   : > { %7710 = vmatmul.mubr.msk.bf16.gmra.mrb[72].mxu0 %vm564_vm0, %v8336_v54 }
 0x781   : > { %7713 = vmatprep.mubr.msk.bf16.mxu0 %vm564_vm0, %v8338_v55 }
 0x788   : > { %7714 = vmatmul.mubr.msk.bf16.gmra.mrb[76].mxu0 %vm564_vm0, %v8339_v33 }
 0x789   : > { %7717 = vmatprep.mubr.msk.bf16.mxu0 %vm564_vm0, %v8340_v32 }
 0x790   : > { %7718 = vmatmul.mubr.msk.bf16.gmra.mrb[80].mxu0 %vm564_vm0, %v8341_v25  ;;  %v8363_v25 = vld [vmem:[%s10011_s7 + $0x50] sm:$0xff]  }
 0x791   : > { %7721 = vmatprep.mubr.msk.bf16.mxu0 %vm564_vm0, %v8342_v41 }
 0x798   : > { %7722 = vmatmul.mubr.msk.bf16.gmra.mrb[84].mxu0 %vm564_vm0, %v8343_v37 }
 0x799   : > { %7725 = vmatprep.mubr.msk.bf16.mxu0 %vm564_vm0, %v8344_v49 }
 0x7a0   : > { %7726 = vmatmul.mubr.msk.bf16.gmra.mrb[88].mxu0 %vm564_vm0, %v8345_v2 }
 0x7a1   : > { %7729 = vmatprep.mubr.msk.bf16.mxu0 %vm564_vm0, %v8346_v59 }
 0x7a8   : > { %7730 = vmatmul.mubr.msk.bf16.gmra.mrb[92].mxu0 %vm564_vm0, %v8347_v62 }
 0x7a9   : > { %7733 = vmatprep.mubr.msk.bf16.mxu0 %vm564_vm0, %v8348_v3  ;;  %v8364_v3 = vld [vmem:[%s10011_s7 + $0x58] sm:$0xff]  }
 0x7b0   : > { %7734 = vmatmul.mubr.msk.bf16.gmra.mrb[96].mxu0 %vm564_vm0, %v8349_v16  ;;  %v8365_v16 = vld [vmem:[%s10011_s7 + $0x60] sm:$0xff]  }
 0x7b1   : > { %7737 = vmatprep.mubr.msk.bf16.mxu0 %vm564_vm0, %v8351_v57 }
 0x7b8   : > { %7738 = vmatmul.mubr.msk.bf16.gmra.mrb[100].mxu0 %vm564_vm0, %v8352_v58 }
 0x7b9   : > { %7741 = vmatprep.mubr.msk.bf16.mxu0 %vm564_vm0, %v8353_v11 }
 0x7c0   : > { %7742 = vmatmul.mubr.msk.bf16.gmra.mrb[104].mxu0 %vm564_vm0, %v8354_v61  ;;  %vm6274_vm0 = vcmask 64512  }
 0x81b   : > { %v7683_v13 = vpop.f32.mrb[44].mxu0 }
 0x81c   : > { %v4778_v19 = vpop.f32.mrb[45].mxu0 }
 0x81d   : > { %v7684_v22 = vpop.f32.mrb[46].mxu0 }
 0x81e   : > { %v5034_v0 = vpack.c.bf16 %v7684_v22, %v7683_v13  ;;  %v4781_v53 = vpop.f32.mrb[47].mxu0  ;;  %v8366_v22 = vld [vmem:[%s10011_s7 + $0x68] sm:$0xff]  }
 0x81f   : > { %v5033_v7 = vpack.c.bf16 %v4781_v53, %v4778_v19 }
 0x823   : > { %v7687_v29 = vpop.f32.mrb[48].mxu0 }
 0x824   : > { %v4794_v17 = vpop.f32.mrb[49].mxu0 }
 0x825   : > { %v7688_v14 = vpop.f32.mrb[50].mxu0 }
 0x826   : > { %v5036_v50 = vpack.c.bf16 %v7688_v14, %v7687_v29  ;;  %v4797_v39 = vpop.f32.mrb[51].mxu0  ;;  %v8367_v14 = vld [vmem:[%s10011_s7 + $0x70] sm:$0xff]  }
 0x827   : > { %v5035_v40 = vpack.c.bf16 %v4797_v39, %v4794_v17 }
 0x829   : > { %7749 = vmatprep.mubr.msk.bf16.mxu0 %vm774_vm2, %v5035_v40 }
 0x82a   : > { %7750 = vmatmul.mubr.msk.bf16.vlgmr.msra.gmra.mrb[108].mxu0 %vm774_vm2, %v5036_v50 }
 0x82b   : > { %7754 = vmatpush3.bf16.msra.mxu0 %v8355_v8  ;;  %7757 = vmatprep.mubr.msk.bf16.mxu0 %vm774_vm2, %v5033_v7  ;;  %v7691_v45 = vpop.f32.mrb[52].mxu0 }
 0x82c   : > { %7755 = vmatprep.subr.bf16.mxu0 %v8356_v36  ;;  %v4810_v9 = vpop.f32.mrb[53].mxu0 }
 0x82d   : > { %v7692_v34 = vpop.f32.mrb[54].mxu0 }
 0x82e   : > { %v5038_v6 = vpack.c.bf16 %v7692_v34, %v7691_v45  ;;  %v4813_v18 = vpop.f32.mrb[55].mxu0 }
 0x82f   : > { %7756 = vmatpush3.bf16.msra.mxu0 %v8356_v36  ;;  %v5037_v12 = vpack.c.bf16 %v4813_v18, %v4810_v9  ;;  %v8368_v9 = vld [vmem:[%s10011_s7 + $0x78] sm:$0xff]  }
 0x830   : > { %7761 = vmatprep.subr.bf16.mxu0 %v8357_v44 }
 0x833   : > { %v7695_v60 = vpop.f32.mrb[56].mxu0 }
 0x834   : > { %v4826_v42 = vpop.f32.mrb[57].mxu0 }
 0x835   : > { %v7696_v1 = vpop.f32.mrb[58].mxu0 }
 0x836   : > { %7758 = vmatmul.mubr.msk.bf16.vlgmr.msra.gmra.mrb[108].mxu0 %vm774_vm2, %v5034_v0  ;;  %v5040_v5 = vpack.c.bf16 %v7696_v1, %v7695_v60  ;;  %v4829_v48 = vpop.f32.mrb[59].mxu0 }
 0x837   : > { %7762 = vmatpush3.bf16.msra.mxu0 %v8357_v44  ;;  %7765 = vmatprep.mubr.msk.bf16.mxu0 %vm774_vm2, %v5037_v12  ;;  %v5039_v10 = vpack.c.bf16 %v4829_v48, %v4826_v42 }
 0x838   : > { %7763 = vmatprep.subr.bf16.mxu0 %v8358_v38 }
 0x83b   : > { %7764 = vmatpush3.bf16.msra.mxu0 %v8358_v38  ;;  %v7699_v23 = vpop.f32.mrb[60].mxu0 }
 0x83c   : > { %7769 = vmatprep.subr.bf16.mxu0 %v8359_v28  ;;  %v4842_v26 = vpop.f32.mrb[61].mxu0 }
 0x83d   : > { %v7700_v31 = vpop.f32.mrb[62].mxu0 }
 0x83e   : > { %v5042_v46 = vpack.c.bf16 %v7700_v31, %v7699_v23  ;;  %v4845_v43 = vpop.f32.mrb[63].mxu0  ;;  %v8371_v31 = vld [vmem:[%s10011_s7 + $0x90] sm:$0xff]  }
 0x83f   : > { %v5041_v20 = vpack.c.bf16 %v4845_v43, %v4842_v26 }
 0x842   : > { %7766 = vmatmul.mubr.msk.bf16.vlgmr.msra.gmra.mrb[108].mxu0 %vm774_vm2, %v5038_v6  ;;  %v8369_v6 = vld [vmem:[%s10011_s7 + $0x80] sm:$0xff]  }
 0x843   : > { %7770 = vmatpush3.bf16.msra.mxu0 %v8359_v28  ;;  %7773 = vmatprep.mubr.msk.bf16.mxu0 %vm774_vm2, %v5039_v10  ;;  %v7703_v15 = vpop.f32.mrb[64].mxu0 }
 0x844   : > { %7771 = vmatprep.subr.bf16.mxu0 %v8360_v63  ;;  %v4858_v35 = vpop.f32.mrb[65].mxu0 }
 0x845   : > { %v7704_v51 = vpop.f32.mrb[66].mxu0 }
 0x846   : > { %v5044_v47 = vpack.c.bf16 %v7704_v51, %v7703_v15  ;;  %v4861_v56 = vpop.f32.mrb[67].mxu0 }
 0x847   : > { %7772 = vmatpush3.bf16.msra.mxu0 %v8360_v63  ;;  %v5043_v52 = vpack.c.bf16 %v4861_v56, %v4858_v35  ;;  %v8372_v35 = vld [vmem:[%s10011_s7 + $0x98] sm:$0xff]  }
 0x848   : > { %7777 = vmatprep.subr.bf16.mxu0 %v8361_v30 }
 0x84b   : > { %v7707_v4 = vpop.f32.mrb[68].mxu0 }
 0x84c   : > { %v4874_v21 = vpop.f32.mrb[69].mxu0 }
 0x84d   : > { %v7708_v54 = vpop.f32.mrb[70].mxu0 }
 0x84e   : > { %7774 = vmatmul.mubr.msk.bf16.vlgmr.msra.gmra.mrb[108].mxu0 %vm774_vm2, %v5040_v5  ;;  %v5046_v55 = vpack.c.bf16 %v7708_v54, %v7707_v4  ;;  %v4877_v33 = vpop.f32.mrb[71].mxu0  ;;  %v8370_v5 = vld [vmem:[%s10011_s7 + $0x88] sm:$0xff]  }
 0x84f   : > { %7778 = vmatpush3.bf16.msra.mxu0 %v8361_v30  ;;  %7781 = vmatprep.mubr.msk.bf16.mxu0 %vm774_vm2, %v5041_v20  ;;  %v5045_v32 = vpack.c.bf16 %v4877_v33, %v4874_v21 }
 0x850   : > { %7779 = vmatprep.subr.bf16.mxu0 %v8362_v24 }
 0x853   : > { %7780 = vmatpush3.bf16.msra.mxu0 %v8362_v24  ;;  %v7711_v41 = vpop.f32.mrb[72].mxu0 }
 0x854   : > { %7785 = vmatprep.subr.bf16.mxu0 %v8363_v25  ;;  %v4890_v37 = vpop.f32.mrb[73].mxu0 }
 0x855   : > { %v7712_v49 = vpop.f32.mrb[74].mxu0 }
 0x856   : > { %v5048_v2 = vpack.c.bf16 %v7712_v49, %v7711_v41  ;;  %v4893_v59 = vpop.f32.mrb[75].mxu0  ;;  %v8375_v49 = vld [vmem:[%s10011_s7 + $0xb0] sm:$0xff]  }
 0x857   : > { %v5047_v62 = vpack.c.bf16 %v4893_v59, %v4890_v37  ;;  %v8377_v59 = vld [vmem:[%s10011_s7 + $0xc0] sm:$0xff]  }
 0x85a   : > { %7782 = vmatmul.mubr.msk.bf16.vlgmr.msra.gmra.mrb[108].mxu0 %vm774_vm2, %v5042_v46 }
 0x85b   : > { %7786 = vmatpush3.bf16.msra.mxu0 %v8363_v25  ;;  %7789 = vmatprep.mubr.msk.bf16.mxu0 %vm774_vm2, %v5043_v52  ;;  %v9805_v8 = vpop.f32.mrb[76].mxu0 }
 0x85c   : > { %7787 = vmatprep.subr.bf16.mxu0 %v8364_v3  ;;  %v4906_v57 = vpop.f32.mrb[77].mxu0 }
 0x85d   : > { %v7716_v58 = vpop.f32.mrb[78].mxu0 }
 0x85e   : > { %v5050_v11 = vpack.c.bf16 %v7716_v58, %v9805_v8  ;;  %v4909_v61 = vpop.f32.mrb[79].mxu0  ;;  %v8380_v8 = vld [vmem:[%s10011_s7 + $0xd8] sm:$0xff]   ;;  %v8383_v58 = vld [vmem:[%s10011_s7 + $0xf0] sm:$0xff]  }
 0x85f   : > { %7788 = vmatpush3.bf16.msra.mxu0 %v8364_v3  ;;  %v5049_v13 = vpack.c.bf16 %v4909_v61, %v4906_v57  ;;  %v8379_v3 = vld [vmem:[%s10011_s7 + $0xd0] sm:$0xff]   ;;  %v8382_v57 = vld [vmem:[%s10011_s7 + $0xe8] sm:$0xff]  }
 0x860   : > { %7793 = vmatprep.subr.bf16.mxu0 %v8365_v16 }
 0x863   : > { %v9811_v19 = vpop.f32.mrb[80].mxu0 }
 0x864   : > { %v4922_v0 = vpop.f32.mrb[81].mxu0 }
 0x865   : > { %v9816_v53 = vpop.f32.mrb[82].mxu0 }
 0x866   : > { %7790 = vmatmul.mubr.msk.bf16.vlgmr.msra.gmra.mrb[108].mxu0 %vm774_vm2, %v5044_v47  ;;  %v5052_v7 = vpack.c.bf16 %v9816_v53, %v9811_v19  ;;  %v4925_v29 = vpop.f32.mrb[83].mxu0  ;;  %v8373_v47 = vld [vmem:[%s10011_s7 + $0xa0] sm:$0xff]  }
 0x867   : > { %7794 = vmatpush3.bf16.msra.mxu0 %v8365_v16  ;;  %7797 = vmatprep.mubr.msk.bf16.mxu0 %vm774_vm2, %v5045_v32  ;;  %v5051_v17 = vpack.c.bf16 %v4925_v29, %v4922_v0  ;;  %v8381_v16 = vld [vmem:[%s10011_s7 + $0xe0] sm:$0xff]   ;;  %v8388_v29 = vld [vmem:[%s10014_s10 + $0x8] sm:$0xff]  }
 0x868   : > { %7795 = vmatprep.subr.bf16.mxu0 %v8366_v22  ;;  %v8385_v0 = vld [vmem:[%s10014_s10 + $0x40] sm:$0xff]  }
 0x869   : > { %v8386_v53 = vld [vmem:[%s10014_s10] sm:$0xff]   ;;  %7397 = vmatprep.subr.bf16.mxu1 %v8385_v0 }
 0x86b   : > { %7796 = vmatpush3.bf16.msra.mxu0 %v8366_v22  ;;  %v9825_v50 = vpop.f32.mrb[84].mxu0 }
 0x86c   : > { %7801 = vmatprep.subr.bf16.mxu0 %v8367_v14  ;;  %v4938_v39 = vpop.f32.mrb[85].mxu0 }
 0x86d   : > { %v9827_v40 = vpop.f32.mrb[86].mxu0 }
 0x86e   : > { %v5054_v36 = vpack.c.bf16 %v9827_v40, %v9825_v50  ;;  %v4941_v45 = vpop.f32.mrb[87].mxu0  ;;  %v8392_v50 = vld [vmem:[%s10014_s10 + $0x18] sm:$0xff]   ;;  %v8394_v40 = vld [vmem:[%s10014_s10 + $0x20] sm:$0xff]  }
 0x86f   : > { %v5053_v44 = vpack.c.bf16 %v4941_v45, %v4938_v39  ;;  %v8393_v39 = vld [vmem:[%s10014_s10 + $0x60] sm:$0xff]   ;;  %v8396_v45 = vld [vmem:[%s10014_s10 + $0x28] sm:$0xff]  }
 0x872   : > { %7798 = vmatmul.mubr.msk.bf16.vlgmr.msra.gmra.mrb[108].mxu0 %vm774_vm2, %v5046_v55  ;;  %v8374_v55 = vld [vmem:[%s10011_s7 + $0xa8] sm:$0xff]  }
 0x873   : > { %7802 = vmatpush3.bf16.msra.mxu0 %v8367_v14  ;;  %7805 = vmatprep.mubr.msk.bf16.mxu0 %vm774_vm2, %v5047_v62  ;;  %v9836_v34 = vpop.f32.mrb[88].mxu0  ;;  %v8378_v62 = vld [vmem:[%s10011_s7 + $0xc8] sm:$0xff]   ;;  %v8391_v14 = vld [vmem:[%s10014_s10 + $0x58] sm:$0xff]  }
 0x874   : > { %7803 = vmatprep.subr.bf16.mxu0 %v8368_v9  ;;  %v4954_v18 = vpop.f32.mrb[89].mxu0 }
 0x875   : > { %v9841_v12 = vpop.f32.mrb[90].mxu0 }
 0x876   : > { %v5056_v60 = vpack.c.bf16 %v9841_v12, %v9836_v34  ;;  %v4957_v38 = vpop.f32.mrb[91].mxu0  ;;  %v8399_v34 = vld [vmem:[%s10014_s10 + $0x78] sm:$0xff]  }
 0x877   : > { %7804 = vmatpush3.bf16.msra.mxu0 %v8368_v9  ;;  %v5055_v42 = vpack.c.bf16 %v4957_v38, %v4954_v18  ;;  %v8398_v9 = vld [vmem:[%s10014_s10 + $0x30] sm:$0xff]  }
 0x878   : > { %7809 = vmatprep.subr.bf16.mxu0 %v8369_v6  ;;  %v6378_v38 = vld [vmem:[%s10013_s9 + $0x10] sm:$0xff] }
 0x87b   : > { %v9845_v1 = vpop.f32.mrb[92].mxu0 }
 0x87c   : > { %v4970_v48 = vpop.f32.mrb[93].mxu0 }
 0x87d   : > { %v9850_v10 = vpop.f32.mrb[94].mxu0 }
 0x87e   : > { %7806 = vmatmul.mubr.msk.bf16.vlgmr.msra.gmra.mrb[108].mxu0 %vm774_vm2, %v5048_v2  ;;  %v5058_v28 = vpack.c.bf16 %v9850_v10, %v9845_v1  ;;  %v4973_v23 = vpop.f32.mrb[95].mxu0  ;;  %v8376_v2 = vld [vmem:[%s10011_s7 + $0xb8] sm:$0xff]  }
 0x87f   : > { %7810 = vmatpush3.bf16.msra.mxu0 %v8369_v6  ;;  %7813 = vmatprep.mubr.msk.bf16.mxu0 %vm774_vm2, %v5049_v13  ;;  %v5057_v26 = vpack.c.bf16 %v4973_v23, %v4970_v48  ;;  %v8400_v6 = vld [vmem:[%s10014_s10 + $0x38] sm:$0xff]  }
 0x880   : > { %7811 = vmatprep.subr.bf16.mxu0 %v8370_v5  ;;  %v6379_v1 = vld [vmem:[%s10013_s9 + $0x18] sm:$0xff] }
 0x883   : > { %7812 = vmatpush3.bf16.msra.mxu0 %v8370_v5  ;;  %v7735_v46 = vpop.f32.mrb[96].mxu0 }
 0x884   : > { %7817 = vmatprep.subr.bf16.mxu0 %v8371_v31  ;;  %v4986_v43 = vpop.f32.mrb[97].mxu0 }
 0x885   : > { %v7736_v20 = vpop.f32.mrb[98].mxu0 }
 0x886   : > { %v5060_v63 = vpack.c.bf16 %v7736_v20, %v7735_v46  ;;  %v4989_v15 = vpop.f32.mrb[99].mxu0 }
 0x887   : > { %v5059_v30 = vpack.c.bf16 %v4989_v15, %v4986_v43  ;;  %v6381_v43 = vld [vmem:[%s10013_s9 + $0x28] sm:$0xff] }
 0x88a   : > { %7814 = vmatmul.mubr.msk.bf16.vlgmr.msra.gmra.mrb[108].mxu0 %vm774_vm2, %v5050_v11  ;;  %v8384_v11 = vld [vmem:[%s10011_s7 + $0xf8] sm:$0xff]  }
 0x88b   : > { %7818 = vmatpush3.bf16.msra.mxu0 %v8371_v31  ;;  %7821 = vmatprep.mubr.msk.bf16.mxu0 %vm774_vm2, %v5051_v17  ;;  %v7739_v51 = vpop.f32.mrb[100].mxu0  ;;  %v8390_v17 = vld [vmem:[%s10014_s10 + $0x10] sm:$0xff]   ;;  %v6380_v31 = vld [vmem:[%s10013_s9 + $0x20] sm:$0xff] }
 0x88c   : > { %7819 = vmatprep.subr.bf16.mxu0 %v8372_v35  ;;  %v5002_v56 = vpop.f32.mrb[101].mxu0 }
 0x88d   : > { %v7740_v52 = vpop.f32.mrb[102].mxu0 }
 0x88e   : > { %v5062_v4 = vpack.c.bf16 %v7740_v52, %v7739_v51  ;;  %v5005_v24 = vpop.f32.mrb[103].mxu0  ;;  %v6382_v51 = vld [vmem:[%s10013_s9 + $0x30] sm:$0xff] }
 0x88f   : > { %7820 = vmatpush3.bf16.msra.mxu0 %v8372_v35  ;;  %v5061_v21 = vpack.c.bf16 %v5005_v24, %v5002_v56  ;;  %v6383_v56 = vld [vmem:[%s10013_s9 + $0x38] sm:$0xff] }
 0x890   : > { %7825 = vmatprep.subr.bf16.mxu0 %v8373_v47 }
 0x893   : > { %v7743_v54 = vpop.f32.mrb[104].mxu0 }
 0x894   : > { %v5018_v33 = vpop.f32.mrb[105].mxu0 }
 0x895   : > { %v7744_v32 = vpop.f32.mrb[106].mxu0 }
 0x896   : > { %7822 = vmatmul.mubr.msk.bf16.vlgmr.msra.gmra.mrb[108].mxu0 %vm774_vm2, %v5052_v7  ;;  %v5064_v25 = vpack.c.bf16 %v7744_v32, %v7743_v54  ;;  %v5021_v41 = vpop.f32.mrb[107].mxu0  ;;  %v8387_v7 = vld [vmem:[%s10014_s10 + $0x48] sm:$0xff]  }
 0x897   : > { %7826 = vmatpush3.bf16.msra.mxu0 %v8373_v47  ;;  %7829 = vmatprep.mubr.msk.bf16.mxu0 %vm774_vm2, %v5053_v44  ;;  %v5063_v37 = vpack.c.bf16 %v5021_v41, %v5018_v33  ;;  %v8397_v44 = vld [vmem:[%s10014_s10 + $0x70] sm:$0xff]  }
 0x898   : > { %7827 = vmatprep.subr.bf16.mxu0 %v8374_v55 }
 0x89b   : > { %7828 = vmatpush3.bf16.msra.mxu0 %v8374_v55 }
 0x89c   : > { %7833 = vmatprep.subr.bf16.mxu0 %v8375_v49 }
 0x8a2   : > { %7830 = vmatmul.mubr.msk.bf16.vlgmr.msra.gmra.mrb[108].mxu0 %vm774_vm2, %v5054_v36  ;;  %v8395_v36 = vld [vmem:[%s10014_s10 + $0x68] sm:$0xff]  }
 0x8a3   : > { %7834 = vmatpush3.bf16.msra.mxu0 %v8375_v49  ;;  %7837 = vmatprep.mubr.msk.bf16.mxu0 %vm774_vm2, %v5055_v42  ;;  %v6377_v42 = vld [vmem:[%s10013_s9 + $0x8] sm:$0xff] }
 0x8a4   : > { %7835 = vmatprep.subr.bf16.mxu0 %v8376_v2 }
 0x8a7   : > { %7836 = vmatpush3.bf16.msra.mxu0 %v8376_v2 }
 0x8a8   : > { %7841 = vmatprep.subr.bf16.mxu0 %v8377_v59 }
 0x8ae   : > { %7838 = vmatmul.mubr.msk.bf16.vlgmr.msra.gmra.mrb[108].mxu0 %vm774_vm2, %v5056_v60  ;;  %v6376_v60 = vld [vmem:[%s10013_s9] sm:$0xff] }
 0x8af   : > { %7842 = vmatpush3.bf16.msra.mxu0 %v8377_v59  ;;  %7845 = vmatprep.mubr.msk.bf16.mxu0 %vm774_vm2, %v5057_v26 }
 0x8b0   : > { %7843 = vmatprep.subr.bf16.mxu0 %v8378_v62 }
 0x8b3   : > { %7844 = vmatpush3.bf16.msra.mxu0 %v8378_v62 }
 0x8b4   : > { %7849 = vmatprep.subr.bf16.mxu0 %v8379_v3 }
 0x8ba   : > { %7846 = vmatmul.mubr.msk.bf16.vlgmr.msra.gmra.mrb[108].mxu0 %vm774_vm2, %v5058_v28 }
 0x8bb   : > { %7850 = vmatpush3.bf16.msra.mxu0 %v8379_v3  ;;  %7853 = vmatprep.mubr.msk.bf16.mxu0 %vm774_vm2, %v5059_v30 }
 0x8bc   : > { %7851 = vmatprep.subr.bf16.mxu0 %v8380_v8 }
 0x8bf   : > { %7852 = vmatpush3.bf16.msra.mxu0 %v8380_v8 }
 0x8c0   : > { %7857 = vmatprep.subr.bf16.mxu0 %v8381_v16 }
 0x8c6   : > { %7854 = vmatmul.mubr.msk.bf16.vlgmr.msra.gmra.mrb[108].mxu0 %vm774_vm2, %v5060_v63 }
 0x8c7   : > { %7858 = vmatpush3.bf16.msra.mxu0 %v8381_v16  ;;  %7861 = vmatprep.mubr.msk.bf16.mxu0 %vm774_vm2, %v5061_v21 }
 0x8c8   : > { %7859 = vmatprep.subr.bf16.mxu0 %v8382_v57 }
 0x8cb   : > { %7860 = vmatpush3.bf16.msra.mxu0 %v8382_v57 }
 0x8cc   : > { %7865 = vmatprep.subr.bf16.mxu0 %v8383_v58 }
 0x8d2   : > { %7862 = vmatmul.mubr.msk.bf16.vlgmr.msra.gmra.mrb[108].mxu0 %vm774_vm2, %v5062_v4 }
 0x8d3   : > { %7866 = vmatpush3.bf16.msra.mxu0 %v8383_v58  ;;  %7869 = vmatprep.mubr.msk.bf16.mxu0 %vm774_vm2, %v5063_v37 }
 0x8d4   : > { %7867 = vmatprep.subr.bf16.mxu0 %v8384_v11 }
 0x8d7   : > { %7868 = vmatpush3.bf16.msra.mxu0 %v8384_v11 }
 0x8de   : > { %7870 = vmatmul.mubr.msk.bf16.vlgmr.msra.gmra.mrb[108].mxu0 %vm774_vm2, %v5064_v25  ;;  %vm6581_vm2 = vcmask 253952  }
 0x9b1   : > { %v7871_v61 = vpop.f32.mrb[108].mxu0 }
 0x9b2   : > { %v6253_v13 = vpop.f32.mrb[109].mxu0 }
 0x9b3   : > { %v7872_v19 = vpop.f32.mrb[110].mxu0  ;;  %7148 = vmatmul.mubr.msk.f32.vlgmr.msra.gmra.mrb[0].mxu1 %vm6274_vm0, %v6253_v13  ;;  %v6444_v13 = vld [vmem:[%s10015_s11] sm:$0x1] }
 0x9b4   : > { %v6256_v22 = vpop.f32.mrb[111].mxu0  ;;  %6357 = vmatprep.mubr.f32.mxu1 %v8415_v27  ;;  %7398 = vmatpush3.bf16.msra.mxu1 %v8386_v53 }
 0x9b5   : > { %7399 = vmatprep.subr.bf16.mxu1 %v8387_v7 }
 0x9b7   : > { %7149 = vmatmul.mubr.msk.f32.gmra.mrb[2].mxu1 %vm6274_vm0, %v6256_v22 }
 0x9b8   : > { %6363 = vmatprep.mubr.f32.mxu1 %v8415_v27  ;;  %7400 = vmatpush3.bf16.msra.mxu1 %v8388_v29 }
 0x9bb   : > { %7150 = vmatmul.mubr.msk.f32.gmra.mrb[4].mxu1 %vm6274_vm0, %v7871_v61 }
 0x9bc   : > { %6369 = vmatprep.mubr.f32.mxu1 %v8415_v27  ;;  %v8389_v27 = vld [vmem:[%s10014_s10 + $0x50] sm:$0xff]  }
 0x9bd   : > { %7401 = vmatprep.subr.bf16.mxu1 %v8389_v27 }
 0x9be   : > { %7402 = vmatpush3.bf16.msra.mxu1 %v8390_v17 }
 0x9bf   : > { %7151 = vmatmul.mubr.msk.f32.gmra.mrb[6].mxu1 %vm6274_vm0, %v7872_v19  ;;  %7403 = vmatprep.subr.bf16.mxu1 %v8391_v14 }
 0x9c2   : > { %7404 = vmatpush3.bf16.msra.mxu1 %v8392_v50 }
 0x9c3   : > { %7405 = vmatprep.subr.bf16.mxu1 %v8393_v39 }
 0x9c6   : > { %7406 = vmatpush3.bf16.msra.mxu1 %v8394_v40 }
 0x9c7   : > { %7407 = vmatprep.subr.bf16.mxu1 %v8395_v36 }
 0x9ca   : > { %7408 = vmatpush3.bf16.msra.mxu1 %v8396_v45 }
 0x9cb   : > { %7409 = vmatprep.subr.bf16.mxu1 %v8397_v44 }
 0x9ce   : > { %7410 = vmatpush3.bf16.msra.mxu1 %v8398_v9 }
 0x9cf   : > { %7411 = vmatprep.subr.bf16.mxu1 %v8399_v34 }
 0x9d2   : > { %7412 = vmatpush3.bf16.msra.mxu1 %v8400_v6 }
 0xa86   : > { %v6353_v18 = vpop.f32.mrb[0].mxu1 }
 0xa87   : > { %v6355_v12 = vpop.f32.mrb[1].mxu1  ;;  %v6384_v48 = vmul.f32 %v6376_v60, %v6353_v18 }
 0xa88   : > { %v6385_v23 = vmul.f32 %v6377_v42, %v6355_v12 }
 0xa8a   : > { %v6359_v5 = vpop.f32.mrb[2].mxu1 }
 0xa8b   : > { %v6386_v10 = vmul.f32 %v6378_v38, %v6359_v5  ;;  %v6361_v28 = vpop.f32.mrb[3].mxu1 }
 0xa8c   : > { %v6387_v26 = vmul.f32 %v6379_v1, %v6361_v28 }
 0xa8d   : > { %v6392_v46 = vadd.f32 %v6386_v10, %v6384_v48 }
 0xa8e   : > { %v6401_v20 = vadd.f32 %v6387_v26, %v6385_v23  ;;  %v6365_v63 = vpop.f32.mrb[4].mxu1 }
 0xa8f   : > { %v6388_v15 = vmul.f32 %v6380_v31, %v6365_v63  ;;  %v6367_v30 = vpop.f32.mrb[5].mxu1 }
 0xa90   : > { %v6389_v35 = vmul.f32 %v6381_v43, %v6367_v30 }
 0xa91   : > { %v6393_v47 = vadd.f32 %v6392_v46, %v6388_v15 }
 0xa92   : > { %v6402_v52 = vadd.f32 %v6401_v20, %v6389_v35  ;;  %v6371_v4 = vpop.f32.mrb[6].mxu1 }
 0xa93   : > { %v6390_v24 = vmul.f32 %v6382_v51, %v6371_v4  ;;  %v6373_v21 = vpop.f32.mrb[7].mxu1 }
 0xa94   : > { %v6391_v54 = vmul.f32 %v6383_v56, %v6373_v21 }
 0xa95   : > { %v6394_v55 = vadd.f32 %v6393_v47, %v6390_v24 }
 0xa96   : > { %v6403_v33 = vadd.f32 %v6402_v52, %v6391_v54 }
 0xa97   : > { %v6395_v32 = vrot.slane %v6394_v55, 4 }
 0xa98   : > { %v6404_v25 = vrot.slane %v6403_v33, 4 }
 0xa99   : > { %v6396_v41 = vadd.f32 %v6395_v32, %v6394_v55 }
 0xa9a   : > { %v6405_v37 = vadd.f32 %v6404_v25, %v6403_v33 }
 0xa9b   : > { %v6397_v49 = vrot.slane %v6396_v41, 2 }
 0xa9c   : > { %v6406_v2 = vrot.slane %v6405_v37, 2 }
 0xa9d   : > { %v6398_v59 = vadd.f32 %v6397_v49, %v6396_v41 }
 0xa9e   : > { %v6407_v62 = vadd.f32 %v6406_v2, %v6405_v37 }
 0xa9f   : > { %v6399_v3 = vrot.slane %v6398_v59, 1 }
 0xaa0   : > { %v6408_v8 = vrot.slane %v6407_v62, 1 }
 0xaa1   : > { %v6400_v16 = vadd.f32 %v6399_v3, %v6398_v59 }
 0xaa2   : > { %v6409_v57 = vadd.f32 %v6408_v8, %v6407_v62 }
 0xaa3   : > { %v6410_v11 = vpack.c.bf16 %v6400_v16, %v6400_v16 }
 0xaa4   : > { %v6411_v58 = vpack.c.bf16 %v6409_v57, %v6409_v57 }
 0xaa6   : > { %6573 = vmatprep.mubr.bf16.mxu1 %v6411_v58 }
 0xaa7   : > { %6574 = vmatmul.mubr.bf16.vlgmr.msra.gmra.mrb[8].mxu1 %v6410_v11 }
 0xb7a   : > { %v7413_v61 = vpop.f32.mrb[8].mxu1 }
 0xb7b   : > { %v7414_v19 = vpop.f32.mrb[9].mxu1 }
 0xb7c   : > { %v7415_v22 = vadd.f32 %v7414_v19, %v7413_v61  ;;  %v7416_v0 = vpop.f32.mrb[10].mxu1 }
 0xb7d   : > { %v7417_v53 = vpop.f32.mrb[11].mxu1 }
 0xb7e   : > { %v6576_v7 = vadd.f32 %v7415_v22, %v6444_v13 }
 0xb80   : > { %6582 = vst.msk [vmem:[%s409_s23] sm:$0x1] %vm6581_vm2, %v6576_v7 }
 0xb81 PF: > { %s22_s21 = sadd.s32 1, %s8411_s21  }
 0xb82   : > { %p19_p4 = scmp.ge.s32.totalorder %s22_s21, 4  }
 0xb84   :  { %21 = sbr.rel (!%p19_p4) target bundleno = 1 (0x1), region = 129 }

</bundles_post_ra>
